<compile_context>
chip_gen: v5e
topology: v5e:2x2
jax: 0.10.0
libtpu: 0.0.40
codegen_flags: <defaults>
</compile_context>

<pallas_src>
import functools

import numpy as np
import jax
import jax.numpy as jnp
from jax import lax
from jax.experimental import pallas as pl
from jax.experimental.pallas import tpu as pltpu


# ----------------------------- in-kernel helpers ---------------------------

def _cmm_right(ar, ai, br, bi, bs, cdt):
    """(ar + i*ai) @ (br + i*bi) with the Gauss 3-multiply trick.

    Data (a*) is 2-D f32 and cast to the MXU compute dtype here; the DFT planes
    (br, bi, bs = br + bi) arrive already in the compute dtype.  Accumulation
    stays in f32.
    """
    p1 = jnp.dot(ar.astype(cdt), br, preferred_element_type=jnp.float32)
    p2 = jnp.dot(ai.astype(cdt), bi, preferred_element_type=jnp.float32)
    p3 = jnp.dot((ar + ai).astype(cdt), bs, preferred_element_type=jnp.float32)
    return p1 - p2, p3 - p1 - p2


def _cmm_left(br, bi, bs, ar, ai, cdt):
    """(br + i*bi) @ (ar + i*ai), batched over the leading dim of the data.

    b* are 2-D (N, N) DFT planes (compute dtype), a* are (G, N, L) f32 data.
    Lowered as a batched MXU matmul (same pattern as 'bqk,bkd->bqd'), so no
    explicit transposes are ever materialised.
    """
    g = ar.shape[0]

    def bc(m):
        return jnp.broadcast_to(m, (g,) + m.shape)

    def mm(lhs, rhs):
        return jnp.einsum('gjy,gyx->gjx', bc(lhs), rhs.astype(cdt),
                          preferred_element_type=jnp.float32)

    p1 = mm(br, ar)
    p2 = mm(bi, ai)
    p3 = mm(bs, ar + ai)
    return p1 - p2, p3 - p1 - p2


# ----------------------------- Pallas kernels ------------------------------

def _aha_kernel(xr_ref, xi_ref, w_ref, sr_ref, si_ref, my_ref, mx_ref,
                or_ref, oi_ref, *, lamda, cdt):
    """out = sum_c conj(S_c) * IFFT2c( W * FFT2c( S_c * x ) ) + lamda * x
    for one (batch, TE-chunk, coil-chunk) grid step.  The coil-chunk axis is a
    reduction axis: the output block stays resident and is accumulated."""
    c_step = pl.program_id(2)

    xr = xr_ref[0]                       # (TEb, Ny, Nx) f32
    xi = xi_ref[0]
    w = w_ref[0]                         # (TEb, Ny, Nx) real 0/1 mask
    sr = sr_ref[0]                       # (Cb, Ny, Nx)
    si = si_ref[0]
    TEb, Ny, Nx = xr.shape
    Cb = sr.shape[0]
    G = TEb * Cb

    # DFT planes (compute dtype), 3 planes per matrix: (real, imag, real+imag).
    fy = (my_ref[0], my_ref[1], my_ref[2])      # Fy   (left multiply)
    by = (my_ref[3], my_ref[4], my_ref[5])      # By   (left multiply, inverse)
    fxt = (mx_ref[0], mx_ref[1], mx_ref[2])     # Fx^T (right multiply)
    bxt = (mx_ref[3], mx_ref[4], mx_ref[5])     # Bx^T (right multiply, inverse)

    # 1) coil images S_c * x via pure broadcasting (no materialised tiling).
    zr = (sr[None] * xr[:, None] - si[None] * xi[:, None]).reshape(G * Ny, Nx)
    zi = (sr[None] * xi[:, None] + si[None] * xr[:, None]).reshape(G * Ny, Nx)

    # 2) FFT along x: one big lane-contraction right-multiply.
    ar, ai = _cmm_right(zr, zi, *fxt, cdt)
    ar = ar.reshape(G, Ny, Nx)
    ai = ai.reshape(G, Ny, Nx)

    # 3) FFT along y: batched left-multiply (no transposes).
    kr, ki = _cmm_left(*fy, ar, ai, cdt)

    # 4) k-space sampling mask (real 0/1), broadcast over the coil axis.
    wb = w[:, None]                              # (TEb, 1, Ny, Nx)
    kr = (kr.reshape(TEb, Cb, Ny, Nx) * wb).reshape(G, Ny, Nx)
    ki = (ki.reshape(TEb, Cb, Ny, Nx) * wb).reshape(G, Ny, Nx)

    # 5) inverse FFT along y: batched left-multiply.
    pr, pi_ = _cmm_left(*by, kr, ki, cdt)

    # 6) inverse FFT along x: one big right-multiply.
    qr, qi = _cmm_right(pr.reshape(G * Ny, Nx), pi_.reshape(G * Ny, Nx),
                        *bxt, cdt)
    qr = qr.reshape(TEb, Cb, Ny, Nx)
    qi = qi.reshape(TEb, Cb, Ny, Nx)

    # 7) coil combine sum_c conj(S_c) * Q_c, accumulated over coil chunks.
    cr = jnp.sum(sr[None] * qr + si[None] * qi, axis=1)
    ci = jnp.sum(sr[None] * qi - si[None] * qr, axis=1)

    @pl.when(c_step == 0)
    def _():
        or_ref[0] = cr + lamda * xr
        oi_ref[0] = ci + lamda * xi

    @pl.when(c_step != 0)
    def _():
        or_ref[0] = or_ref[0] + cr
        oi_ref[0] = oi_ref[0] + ci


def _adjoint_kernel(yr_ref, yi_ref, w_ref, sr_ref, si_ref, my_ref, mx_ref,
                    or_ref, oi_ref, *, cdt):
    """out = sum_c conj(S_c) * IFFT2c( conj(W) * y_c ) for one grid step."""
    c_step = pl.program_id(2)

    yr = yr_ref[0]                       # (TEb, Cb, Ny, Nx)
    yi = yi_ref[0]
    w = w_ref[0]                         # (TEb, Ny, Nx)
    sr = sr_ref[0]                       # (Cb, Ny, Nx)
    si = si_ref[0]
    TEb, Cb, Ny, Nx = yr.shape
    G = TEb * Cb

    by = (my_ref[3], my_ref[4], my_ref[5])
    bxt = (mx_ref[3], mx_ref[4], mx_ref[5])

    wb = w[:, None]                      # conj(W) == W (real 0/1 mask)
    mr = (yr * wb).reshape(G, Ny, Nx)
    mi = (yi * wb).reshape(G, Ny, Nx)

    pr, pi_ = _cmm_left(*by, mr, mi, cdt)
    qr, qi = _cmm_right(pr.reshape(G * Ny, Nx), pi_.reshape(G * Ny, Nx),
                        *bxt, cdt)
    qr = qr.reshape(TEb, Cb, Ny, Nx)
    qi = qi.reshape(TEb, Cb, Ny, Nx)

    cr = jnp.sum(sr[None] * qr + si[None] * qi, axis=1)
    ci = jnp.sum(sr[None] * qi - si[None] * qr, axis=1)

    @pl.when(c_step == 0)
    def _():
        or_ref[0] = cr
        oi_ref[0] = ci

    @pl.when(c_step != 0)
    def _():
        or_ref[0] = or_ref[0] + cr
        oi_ref[0] = oi_ref[0] + ci


# ----------------------------- VMEM budgeting ------------------------------

def _vmem_capacity_bytes():
    try:
        return int(pltpu.get_tpu_info().vmem_capacity_bytes)
    except Exception:
        return 64 * 2 ** 20          # conservative: v7x per-TensorCore VMEM


def _vmem_hard_cap():
    # Never request the full physical VMEM; leave headroom for double buffers
    # and internal compiler scratch (caps ~52 MiB on v7x, ~105 MiB on v5e/v6e).
    return int(0.82 * _vmem_capacity_bytes())


def _vmem_budget():
    return int(0.6 * _vmem_hard_cap())


def _step_bytes(te_blk, c_blk, Ny, Nx, cdt, with_kspace):
    """Rough per-grid-step VMEM footprint (intermediates + 2x pipeline blocks)."""
    g = te_blk * c_blk
    plane = Ny * Nx * 4
    msz = jnp.dtype(cdt).itemsize
    work = 14 * g * plane                      # live f32 intermediates (generous)
    work += 3 * g * Ny * Ny * msz              # broadcast DFT planes (batched mm)
    blocks = (2 * te_blk * plane               # x / adjoint out (real+imag)
              + te_blk * plane                 # mask
              + 2 * c_blk * plane              # coil maps (real+imag)
              + 2 * te_blk * plane             # outputs (real+imag)
              + 6 * (Ny * Ny + Nx * Nx) * msz) # DFT planes
    if with_kspace:
        blocks += 2 * te_blk * c_blk * plane
    return work + 2 * blocks                   # x2: double-buffered pipeline


def _choose_blocks(TE, C, Ny, Nx, cdt, with_kspace, budget):
    """Largest (TE_blk, C_blk) whose working set fits the VMEM budget; prefer
    keeping all coils together (no reduction axis) and shrinking TE first."""
    def divs(n):
        return [d for d in range(n, 0, -1) if n % d == 0]

    for te_blk in divs(TE):
        if _step_bytes(te_blk, C, Ny, Nx, cdt, with_kspace) <= budget:
            return te_blk, C
    for c_blk in divs(C):
        if _step_bytes(1, c_blk, Ny, Nx, cdt, with_kspace) <= budget:
            return 1, c_blk
    return 1, 1


def _compiler_params(step_bytes):
    cap = _vmem_hard_cap()
    limit = int(min(cap, max(32 * 2 ** 20, int(1.25 * step_bytes))))
    return pltpu.CompilerParams(
        dimension_semantics=("parallel", "parallel", "arbitrary"),
        vmem_limit_bytes=limit)


# ----------------------------- pallas_call wrappers ------------------------

def sense_normal_pallas(xr, xi, w, sr, si, my, mx, *, lamda, cdt,
                        te_blk, c_blk):
    """(A^H A + lamda I) x ; x given as (B, TE, Ny, Nx) real/imag planes."""
    B, TE, Ny, Nx = xr.shape
    C = sr.shape[1]
    grid = (B, TE // te_blk, C // c_blk)
    kernel = functools.partial(_aha_kernel, lamda=float(lamda), cdt=cdt)

    x_spec = pl.BlockSpec((1, te_blk, Ny, Nx), lambda b, t, c: (b, t, 0, 0))
    w_spec = pl.BlockSpec((1, te_blk, Ny, Nx), lambda b, t, c: (b, t, 0, 0))
    s_spec = pl.BlockSpec((1, c_blk, Ny, Nx), lambda b, t, c: (b, c, 0, 0))
    my_spec = pl.BlockSpec(my.shape, lambda b, t, c: (0, 0, 0))
    mx_spec = pl.BlockSpec(mx.shape, lambda b, t, c: (0, 0, 0))

    step = _step_bytes(te_blk, c_blk, Ny, Nx, cdt, with_kspace=False)
    outs = pl.pallas_call(
        kernel,
        grid=grid,
        in_specs=[x_spec, x_spec, w_spec, s_spec, s_spec, my_spec, mx_spec],
        out_specs=[x_spec, x_spec],
        out_shape=[jax.ShapeDtypeStruct((B, TE, Ny, Nx), jnp.float32)] * 2,
        compiler_params=_compiler_params(step),
    )(xr, xi, w, sr, si, my, mx)
    return outs[0], outs[1]


def sense_adjoint_pallas(yr, yi, w, sr, si, my, mx, *, cdt, te_blk, c_blk):
    """A^H y ; y given as (B, TE, C, Ny, Nx) real/imag planes."""
    B, TE, C, Ny, Nx = yr.shape
    grid = (B, TE // te_blk, C // c_blk)
    kernel = functools.partial(_adjoint_kernel, cdt=cdt)

    y_spec = pl.BlockSpec((1, te_blk, c_blk, Ny, Nx),
                          lambda b, t, c: (b, t, c, 0, 0))
    w_spec = pl.BlockSpec((1, te_blk, Ny, Nx), lambda b, t, c: (b, t, 0, 0))
    s_spec = pl.BlockSpec((1, c_blk, Ny, Nx), lambda b, t, c: (b, c, 0, 0))
    my_spec = pl.BlockSpec(my.shape, lambda b, t, c: (0, 0, 0))
    mx_spec = pl.BlockSpec(mx.shape, lambda b, t, c: (0, 0, 0))
    o_spec = pl.BlockSpec((1, te_blk, Ny, Nx), lambda b, t, c: (b, t, 0, 0))

    step = _step_bytes(te_blk, c_blk, Ny, Nx, cdt, with_kspace=True)
    outs = pl.pallas_call(
        kernel,
        grid=grid,
        in_specs=[y_spec, y_spec, w_spec, s_spec, s_spec, my_spec, mx_spec],
        out_specs=[o_spec, o_spec],
        out_shape=[jax.ShapeDtypeStruct((B, TE, Ny, Nx), jnp.float32)] * 2,
        compiler_params=_compiler_params(step),
    )(yr, yi, w, sr, si, my, mx)
    return outs[0], outs[1]


# ----------------------------- setup glue ----------------------------------

def build_centered_dft_mats(Ny, Nx, cdt):
    """Centered orthonormal DFT matrices, packed for the kernels:
      my = [Fy | By]      (6, Ny, Ny)   left-multiply operands  (y transforms)
      mx = [Fx^T | Bx^T]  (6, Nx, Nx)   right-multiply operands (x transforms)
    with 3 planes per matrix: (real, imag, real+imag), in the compute dtype,
    so FFT2c(X) = Fy @ X @ Fx^T and IFFT2c(X) = By @ X @ Bx^T.
    """
    def cmats(n):
        eye = np.eye(n, dtype=np.complex64)
        F = np.fft.fftshift(np.fft.fft(np.fft.ifftshift(eye, axes=0), axis=0,
                                       norm='ortho'), axes=0)
        Binv = np.fft.fftshift(np.fft.ifft(np.fft.ifftshift(eye, axes=0), axis=0,
                                           norm='ortho'), axes=0)
        return F.astype(np.complex64), Binv.astype(np.complex64)

    def planes(m):
        r = np.real(m).astype(np.float32)
        i = np.imag(m).astype(np.float32)
        return np.stack([r, i, r + i], axis=0)

    Fy, By = cmats(Ny)
    Fx, Bx = cmats(Nx)
    my = np.concatenate([planes(Fy), planes(By)], axis=0)       # (6, Ny, Ny)
    mx = np.concatenate([planes(Fx.T), planes(Bx.T)], axis=0)   # (6, Nx, Nx)
    return jnp.asarray(my, dtype=cdt), jnp.asarray(mx, dtype=cdt)


def _safe_div(a, b):
    ok = b != 0
    return jnp.where(ok, a / jnp.where(ok, b, 1.0), 0.0)


def cg_solve_batched(normal_op, br, bi, max_iter):
    """Batched CG for the Hermitian PD operator, x0 = 0.  Inner products are
    reduced per batch element, so iterates match independent per-batch CG."""
    # TODO(synk): tol-based early stopping is not implemented
    #             (DataConsistency default tol=0 never triggers it).
    def dot_b(ur, ui, vr, vi):
        return jnp.sum(ur * vr + ui * vi, axis=(1, 2, 3))       # Re <u, v> per b

    def bcast(v):
        return v[:, None, None, None]

    xr = jnp.zeros_like(br)
    xi = jnp.zeros_like(bi)
    rr, ri = br, bi
    pr, pi_ = rr, ri
    rs = dot_b(rr, ri, rr, ri)

    def body(_, carry):
        xr, xi, rr, ri, pr, pi_, rs = carry
        apr, api = normal_op(pr, pi_)
        pap = dot_b(pr, pi_, apr, api)
        alpha = _safe_div(rs, pap)            # guard: fully-masked / zero slices
        xr = xr + bcast(alpha) * pr
        xi = xi + bcast(alpha) * pi_
        rr = rr - bcast(alpha) * apr
        ri = ri - bcast(alpha) * api
        rs_new = dot_b(rr, ri, rr, ri)
        beta = _safe_div(rs_new, rs)
        pr = rr + bcast(beta) * pr
        pi_ = ri + bcast(beta) * pi_
        return (xr, xi, rr, ri, pr, pi_, rs_new)

    xr, xi, *_ = lax.fori_loop(0, max_iter, body,
                               (xr, xi, rr, ri, pr, pi_, rs))
    return xr, xi


def _solve_impl(kspace, sens, my, mx, *, lamda, max_iter, cdt):
    B, T, E, C, Nz, Ny, Nx = kspace.shape
    TE = T * E
    y = kspace.reshape(B, TE, C, Ny, Nx)
    coils = sens.reshape(B, C, Ny, Nx)

    # weights = (rss(y, coil) > 0) — real 0/1 sampling mask, per (b, te).
    rss = jnp.sqrt(jnp.sum(jnp.abs(y) ** 2, axis=2))
    w = (rss > 0).astype(jnp.float32)                           # (B, TE, Ny, Nx)

    yr = jnp.real(y).astype(jnp.float32)                        # (B, TE, C, Ny, Nx)
    yi = jnp.imag(y).astype(jnp.float32)
    sr = jnp.real(coils).astype(jnp.float32)                    # (B, C, Ny, Nx)
    si = jnp.imag(coils).astype(jnp.float32)

    budget = _vmem_budget()
    te_a, c_a = _choose_blocks(TE, C, Ny, Nx, cdt, True, budget)
    te_n, c_n = _choose_blocks(TE, C, Ny, Nx, cdt, False, budget)

    # b = A^H y
    bhr, bhi = sense_adjoint_pallas(yr, yi, w, sr, si, my, mx,
                                    cdt=cdt, te_blk=te_a, c_blk=c_a)

    # CG on (A^H A + lamda I) x = A^H y
    normal_op = lambda ur, ui: sense_normal_pallas(
        ur, ui, w, sr, si, my, mx, lamda=lamda, cdt=cdt,
        te_blk=te_n, c_blk=c_n)
    xr, xi = cg_solve_batched(normal_op, bhr, bhi, max_iter)

    x = (xr + 1j * xi).astype(jnp.complex64)
    return x.reshape(B, T, E, 1, 1, Ny, Nx)


class DataConsistencyPallas:
    """JAX/Pallas port of deepdwi.models.mri.DataConsistency
    (basis = phase_echo = phase_slice = coord = None path)."""

    def __init__(self, sens, kspace, lamda=0.01, max_iter=100, tol=0.0,
                 compute_dtype=jnp.bfloat16):
        assert kspace.ndim == 7
        B, T, E, C, Nz, Ny, Nx = kspace.shape
        assert Nz == 1
        assert sens.shape == (B, 1, 1, C, Nz, Ny, Nx)
        self.sens = sens
        self.kspace = kspace
        self.lamda = float(lamda)
        self.max_iter = int(max_iter)
        self.tol = float(tol)
        self.compute_dtype = compute_dtype
        self.my, self.mx = build_centered_dft_mats(Ny, Nx, compute_dtype)
        self._solve = jax.jit(functools.partial(
            _solve_impl, lamda=self.lamda, max_iter=self.max_iter,
            cdt=self.compute_dtype))
        # TODO(synk): basis (Tensor / nn.Module / Callable), phase_echo,
        #             phase_slice and non-Cartesian coord (NUFFT) branches are
        #             not implemented.

    def __call__(self):
        return self._solve(self.kspace, self.sens, self.my, self.mx)


# ----------------------------- demo / check --------------------------------

if __name__ == "__main__":
    B, T, E, C, Nz, Ny, Nx = 2, 2, 1, 4, 1, 16, 16
    key = jax.random.PRNGKey(0)
    k1, k2, k3, k4 = jax.random.split(key, 4)
    sens = (jax.random.normal(k1, (B, 1, 1, C, Nz, Ny, Nx)) +
            1j * jax.random.normal(k2, (B, 1, 1, C, Nz, Ny, Nx))).astype(jnp.complex64)
    kfull = (jax.random.normal(k3, (B, T, E, C, Nz, Ny, Nx)) +
             1j * jax.random.normal(k4, (B, T, E, C, Nz, Ny, Nx))).astype(jnp.complex64)
    # undersampling: keep every other ky line
    line_mask = (jnp.arange(Ny) % 2 == 0).astype(jnp.complex64)[:, None]   # (Ny, 1)
    kspace = kfull * line_mask

    dc = DataConsistencyPallas(sens, kspace, lamda=0.01, max_iter=10, tol=0.0)
    x = dc()
    x = jax.block_until_ready(x)
    assert x.shape == (B, T, E, 1, 1, Ny, Nx) and x.dtype == jnp.complex64

    # --- correctness check of both Pallas SENSE kernels vs a jnp.fft reference ---
    def fft2c(z):
        return jnp.fft.fftshift(jnp.fft.fft2(jnp.fft.ifftshift(z, axes=(-2, -1)),
                                             axes=(-2, -1), norm='ortho'),
                                axes=(-2, -1))

    def ifft2c(z):
        return jnp.fft.fftshift(jnp.fft.ifft2(jnp.fft.ifftshift(z, axes=(-2, -1)),
                                              axes=(-2, -1), norm='ortho'),
                                axes=(-2, -1))

    TE = T * E
    cdt = dc.compute_dtype
    y = kspace.reshape(B, TE, C, Ny, Nx)
    coils = sens.reshape(B, C, Ny, Nx)
    w = (jnp.sqrt(jnp.sum(jnp.abs(y) ** 2, axis=2)) > 0).astype(jnp.float32)
    yr = jnp.real(y).astype(jnp.float32)
    yi = jnp.imag(y).astype(jnp.float32)
    sr = jnp.real(coils).astype(jnp.float32)
    si = jnp.imag(coils).astype(jnp.float32)

    budget = _vmem_budget()
    te_a, c_a = _choose_blocks(TE, C, Ny, Nx, cdt, True, budget)
    te_n, c_n = _choose_blocks(TE, C, Ny, Nx, cdt, False, budget)

    bhr, bhi = sense_adjoint_pallas(yr, yi, w, sr, si, dc.my, dc.mx,
                                    cdt=cdt, te_blk=te_a, c_blk=c_a)
    ar, ai = sense_normal_pallas(bhr, bhi, w, sr, si, dc.my, dc.mx,
                                 lamda=dc.lamda, cdt=cdt,
                                 te_blk=te_n, c_blk=c_n)
    bhr, bhi, ar, ai = jax.block_until_ready((bhr, bhi, ar, ai))

    wC = w.astype(jnp.complex64)[:, :, None]                    # (B,TE,1,Ny,Nx)
    ahy_ref = jnp.sum(jnp.conj(coils)[:, None] * ifft2c(wC * y), axis=2)
    ahy_pal = bhr + 1j * bhi

    xin = ahy_pal.astype(jnp.complex64)      # check the normal op in isolation
    aha_ref = (jnp.sum(jnp.conj(coils)[:, None]
                       * ifft2c(wC * fft2c(coils[:, None] * xin[:, :, None])),
                       axis=2) + dc.lamda * xin)
    aha_pal = ar + 1j * ai

    def rel(a, b):
        return float(jnp.linalg.norm((a - b).ravel()) /
                     (jnp.linalg.norm(b.ravel()) + 1e-12))

    assert rel(ahy_pal, ahy_ref) < 5e-2, rel(ahy_pal, ahy_ref)
    assert rel(aha_pal, aha_ref) < 5e-2, rel(aha_pal, aha_ref)

    print("KERNEL_OK")
</pallas_src>

<mosaic_0001>
module attributes {stable_mosaic.version = 11 : i64} {
  func.func @_adjoint_kernel(%arg0: i32, %arg1: i32, %arg2: i32, %arg3: memref<1x2x4x16x16xf32, #tpu.memory_space<vmem>>, %arg4: memref<1x2x4x16x16xf32, #tpu.memory_space<vmem>>, %arg5: memref<1x2x16x16xf32, #tpu.memory_space<vmem>>, %arg6: memref<1x4x16x16xf32, #tpu.memory_space<vmem>>, %arg7: memref<1x4x16x16xf32, #tpu.memory_space<vmem>>, %arg8: memref<6x16x16xbf16, #tpu.memory_space<vmem>>, %arg9: memref<6x16x16xbf16, #tpu.memory_space<vmem>>, %arg10: memref<1x2x16x16xf32, #tpu.memory_space<vmem>>, %arg11: memref<1x2x16x16xf32, #tpu.memory_space<vmem>>) attributes {dimension_semantics = [#tpu.dimension_semantics<parallel>, #tpu.dimension_semantics<parallel>, #tpu.dimension_semantics<arbitrary>], iteration_bounds = array<i64: 2, 1, 1>, scalar_prefetch = 0 : i64, scratch_operands = 0 : i64, tpu.core_type = #tpu.core_type<tc>, window_params = [{transform_indices = @transform_0, window_bounds = array<i64: 1, 2, 4, 16, 16>}, {transform_indices = @transform_1, window_bounds = array<i64: 1, 2, 4, 16, 16>}, {transform_indices = @transform_2, window_bounds = array<i64: 1, 2, 16, 16>}, {transform_indices = @transform_3, window_bounds = array<i64: 1, 4, 16, 16>}, {transform_indices = @transform_4, window_bounds = array<i64: 1, 4, 16, 16>}, {pipeline_mode = #tpu.pipeline_mode<synchronous>, transform_indices = @transform_5, window_bounds = array<i64: 6, 16, 16>}, {pipeline_mode = #tpu.pipeline_mode<synchronous>, transform_indices = @transform_6, window_bounds = array<i64: 6, 16, 16>}, {transform_indices = @transform_7, window_bounds = array<i64: 1, 2, 16, 16>}, {transform_indices = @transform_8, window_bounds = array<i64: 1, 2, 16, 16>}]} {
    %c0 = arith.constant 0 : index
    %c0_0 = arith.constant 0 : index
    %c0_1 = arith.constant 0 : index
    %c0_2 = arith.constant 0 : index
    %c0_3 = arith.constant 0 : index
    %0 = vector.load %arg3[%c0, %c0_0, %c0_1, %c0_2, %c0_3] : memref<1x2x4x16x16xf32, #tpu.memory_space<vmem>>, vector<1x2x4x16x16xf32>
    %1 = vector.shape_cast %0 : vector<1x2x4x16x16xf32> to vector<2x4x16x16xf32>
    %c0_4 = arith.constant 0 : index
    %c0_5 = arith.constant 0 : index
    %c0_6 = arith.constant 0 : index
    %c0_7 = arith.constant 0 : index
    %c0_8 = arith.constant 0 : index
    %2 = vector.load %arg4[%c0_4, %c0_5, %c0_6, %c0_7, %c0_8] : memref<1x2x4x16x16xf32, #tpu.memory_space<vmem>>, vector<1x2x4x16x16xf32>
    %3 = vector.shape_cast %2 : vector<1x2x4x16x16xf32> to vector<2x4x16x16xf32>
    %c0_9 = arith.constant 0 : index
    %c0_10 = arith.constant 0 : index
    %c0_11 = arith.constant 0 : index
    %c0_12 = arith.constant 0 : index
    %4 = vector.load %arg5[%c0_9, %c0_10, %c0_11, %c0_12] : memref<1x2x16x16xf32, #tpu.memory_space<vmem>>, vector<1x2x16x16xf32>
    %5 = vector.shape_cast %4 : vector<1x2x16x16xf32> to vector<2x16x16xf32>
    %c0_13 = arith.constant 0 : index
    %c0_14 = arith.constant 0 : index
    %c0_15 = arith.constant 0 : index
    %c0_16 = arith.constant 0 : index
    %6 = vector.load %arg6[%c0_13, %c0_14, %c0_15, %c0_16] : memref<1x4x16x16xf32, #tpu.memory_space<vmem>>, vector<1x4x16x16xf32>
    %7 = vector.shape_cast %6 : vector<1x4x16x16xf32> to vector<4x16x16xf32>
    %c0_17 = arith.constant 0 : index
    %c0_18 = arith.constant 0 : index
    %c0_19 = arith.constant 0 : index
    %c0_20 = arith.constant 0 : index
    %8 = vector.load %arg7[%c0_17, %c0_18, %c0_19, %c0_20] : memref<1x4x16x16xf32, #tpu.memory_space<vmem>>, vector<1x4x16x16xf32>
    %9 = vector.shape_cast %8 : vector<1x4x16x16xf32> to vector<4x16x16xf32>
    %c3 = arith.constant 3 : index
    %c0_21 = arith.constant 0 : index
    %c0_22 = arith.constant 0 : index
    %10 = vector.load %arg8[%c3, %c0_21, %c0_22] : memref<6x16x16xbf16, #tpu.memory_space<vmem>>, vector<1x16x16xbf16>
    %11 = vector.shape_cast %10 : vector<1x16x16xbf16> to vector<16x16xbf16>
    %c4 = arith.constant 4 : index
    %c0_23 = arith.constant 0 : index
    %c0_24 = arith.constant 0 : index
    %12 = vector.load %arg8[%c4, %c0_23, %c0_24] : memref<6x16x16xbf16, #tpu.memory_space<vmem>>, vector<1x16x16xbf16>
    %13 = vector.shape_cast %12 : vector<1x16x16xbf16> to vector<16x16xbf16>
    %c5 = arith.constant 5 : index
    %c0_25 = arith.constant 0 : index
    %c0_26 = arith.constant 0 : index
    %14 = vector.load %arg8[%c5, %c0_25, %c0_26] : memref<6x16x16xbf16, #tpu.memory_space<vmem>>, vector<1x16x16xbf16>
    %15 = vector.shape_cast %14 : vector<1x16x16xbf16> to vector<16x16xbf16>
    %c3_27 = arith.constant 3 : index
    %c0_28 = arith.constant 0 : index
    %c0_29 = arith.constant 0 : index
    %16 = vector.load %arg9[%c3_27, %c0_28, %c0_29] : memref<6x16x16xbf16, #tpu.memory_space<vmem>>, vector<1x16x16xbf16>
    %17 = vector.shape_cast %16 : vector<1x16x16xbf16> to vector<16x16xbf16>
    %c4_30 = arith.constant 4 : index
    %c0_31 = arith.constant 0 : index
    %c0_32 = arith.constant 0 : index
    %18 = vector.load %arg9[%c4_30, %c0_31, %c0_32] : memref<6x16x16xbf16, #tpu.memory_space<vmem>>, vector<1x16x16xbf16>
    %19 = vector.shape_cast %18 : vector<1x16x16xbf16> to vector<16x16xbf16>
    %c5_33 = arith.constant 5 : index
    %c0_34 = arith.constant 0 : index
    %c0_35 = arith.constant 0 : index
    %20 = vector.load %arg9[%c5_33, %c0_34, %c0_35] : memref<6x16x16xbf16, #tpu.memory_space<vmem>>, vector<1x16x16xbf16>
    %21 = vector.shape_cast %20 : vector<1x16x16xbf16> to vector<16x16xbf16>
    %22 = vector.shape_cast %5 : vector<2x16x16xf32> to vector<2x1x16x16xf32>
    %23 = vector.broadcast %22 : vector<2x1x16x16xf32> to vector<2x4x16x16xf32>
    %24 = arith.mulf %1, %23 : vector<2x4x16x16xf32>
    %25 = vector.shape_cast %24 : vector<2x4x16x16xf32> to vector<8x16x16xf32>
    %26 = vector.broadcast %22 : vector<2x1x16x16xf32> to vector<2x4x16x16xf32>
    %27 = arith.mulf %3, %26 : vector<2x4x16x16xf32>
    %28 = vector.shape_cast %27 : vector<2x4x16x16xf32> to vector<8x16x16xf32>
    %29 = vector.shape_cast %11 : vector<16x16xbf16> to vector<1x16x16xbf16>
    %30 = vector.broadcast %29 : vector<1x16x16xbf16> to vector<8x16x16xbf16>
    %31 = arith.truncf %25 : vector<8x16x16xf32> to vector<8x16x16xbf16>
    "tpu.trace_start"() <{level = 10 : i32, message = "gjy,gyx->gjx"}> : () -> ()
    %cst = arith.constant dense<0.000000e+00> : vector<8x16x16xf32>
    %32 = tpu.matmul %30, %31, %cst {dimension_numbers = #tpu.dot_dimension_numbers<[2], [1], [1], [2], [0, 0, 0, 1, 1, 2], [0], [0]>} : vector<8x16x16xbf16>, vector<8x16x16xbf16>, vector<8x16x16xf32> -> vector<8x16x16xf32>
    "tpu.trace_stop"() : () -> ()
    %33 = vector.shape_cast %13 : vector<16x16xbf16> to vector<1x16x16xbf16>
    %34 = vector.broadcast %33 : vector<1x16x16xbf16> to vector<8x16x16xbf16>
    %35 = arith.truncf %28 : vector<8x16x16xf32> to vector<8x16x16xbf16>
    "tpu.trace_start"() <{level = 10 : i32, message = "gjy,gyx->gjx"}> : () -> ()
    %cst_36 = arith.constant dense<0.000000e+00> : vector<8x16x16xf32>
    %36 = tpu.matmul %34, %35, %cst_36 {dimension_numbers = #tpu.dot_dimension_numbers<[2], [1], [1], [2], [0, 0, 0, 1, 1, 2], [0], [0]>} : vector<8x16x16xbf16>, vector<8x16x16xbf16>, vector<8x16x16xf32> -> vector<8x16x16xf32>
    "tpu.trace_stop"() : () -> ()
    %37 = arith.addf %25, %28 : vector<8x16x16xf32>
    %38 = vector.shape_cast %15 : vector<16x16xbf16> to vector<1x16x16xbf16>
    %39 = vector.broadcast %38 : vector<1x16x16xbf16> to vector<8x16x16xbf16>
    %40 = arith.truncf %37 : vector<8x16x16xf32> to vector<8x16x16xbf16>
    "tpu.trace_start"() <{level = 10 : i32, message = "gjy,gyx->gjx"}> : () -> ()
    %cst_37 = arith.constant dense<0.000000e+00> : vector<8x16x16xf32>
    %41 = tpu.matmul %39, %40, %cst_37 {dimension_numbers = #tpu.dot_dimension_numbers<[2], [1], [1], [2], [0, 0, 0, 1, 1, 2], [0], [0]>} : vector<8x16x16xbf16>, vector<8x16x16xbf16>, vector<8x16x16xf32> -> vector<8x16x16xf32>
    "tpu.trace_stop"() : () -> ()
    %42 = arith.subf %32, %36 : vector<8x16x16xf32>
    %43 = arith.subf %41, %32 : vector<8x16x16xf32>
    %44 = arith.subf %43, %36 : vector<8x16x16xf32>
    %45 = vector.shape_cast %42 : vector<8x16x16xf32> to vector<128x16xf32>
    %46 = vector.shape_cast %44 : vector<8x16x16xf32> to vector<128x16xf32>
    %47 = arith.truncf %45 : vector<128x16xf32> to vector<128x16xbf16>
    %cst_38 = arith.constant dense<0.000000e+00> : vector<128x16xf32>
    %48 = tpu.matmul %47, %17, %cst_38 {dimension_numbers = #tpu.dot_dimension_numbers<[1], [0], [0], [1], [0, 0, 1, 1], [], []>} : vector<128x16xbf16>, vector<16x16xbf16>, vector<128x16xf32> -> vector<128x16xf32>
    %49 = arith.truncf %46 : vector<128x16xf32> to vector<128x16xbf16>
    %cst_39 = arith.constant dense<0.000000e+00> : vector<128x16xf32>
    %50 = tpu.matmul %49, %19, %cst_39 {dimension_numbers = #tpu.dot_dimension_numbers<[1], [0], [0], [1], [0, 0, 1, 1], [], []>} : vector<128x16xbf16>, vector<16x16xbf16>, vector<128x16xf32> -> vector<128x16xf32>
    %51 = arith.addf %45, %46 : vector<128x16xf32>
    %52 = arith.truncf %51 : vector<128x16xf32> to vector<128x16xbf16>
    %cst_40 = arith.constant dense<0.000000e+00> : vector<128x16xf32>
    %53 = tpu.matmul %52, %21, %cst_40 {dimension_numbers = #tpu.dot_dimension_numbers<[1], [0], [0], [1], [0, 0, 1, 1], [], []>} : vector<128x16xbf16>, vector<16x16xbf16>, vector<128x16xf32> -> vector<128x16xf32>
    %54 = arith.subf %48, %50 : vector<128x16xf32>
    %55 = arith.subf %53, %48 : vector<128x16xf32>
    %56 = arith.subf %55, %50 : vector<128x16xf32>
    %57 = vector.shape_cast %54 : vector<128x16xf32> to vector<2x4x16x16xf32>
    %58 = vector.shape_cast %56 : vector<128x16xf32> to vector<2x4x16x16xf32>
    %59 = vector.shape_cast %7 : vector<4x16x16xf32> to vector<1x4x16x16xf32>
    %60 = vector.broadcast %59 : vector<1x4x16x16xf32> to vector<2x4x16x16xf32>
    %61 = arith.mulf %60, %57 : vector<2x4x16x16xf32>
    %62 = vector.shape_cast %9 : vector<4x16x16xf32> to vector<1x4x16x16xf32>
    %63 = vector.broadcast %62 : vector<1x4x16x16xf32> to vector<2x4x16x16xf32>
    %64 = arith.mulf %63, %58 : vector<2x4x16x16xf32>
    %65 = arith.addf %61, %64 : vector<2x4x16x16xf32>
    %cst_41 = arith.constant dense<0.000000e+00> : vector<2x16x16xf32>
    %66 = vector.multi_reduction <add>, %65, %cst_41 [1] : vector<2x4x16x16xf32> to vector<2x16x16xf32>
    %67 = vector.shape_cast %7 : vector<4x16x16xf32> to vector<1x4x16x16xf32>
    %68 = vector.broadcast %67 : vector<1x4x16x16xf32> to vector<2x4x16x16xf32>
    %69 = arith.mulf %68, %58 : vector<2x4x16x16xf32>
    %70 = vector.shape_cast %9 : vector<4x16x16xf32> to vector<1x4x16x16xf32>
    %71 = vector.broadcast %70 : vector<1x4x16x16xf32> to vector<2x4x16x16xf32>
    %72 = arith.mulf %71, %57 : vector<2x4x16x16xf32>
    %73 = arith.subf %69, %72 : vector<2x4x16x16xf32>
    %cst_42 = arith.constant dense<0.000000e+00> : vector<2x16x16xf32>
    %74 = vector.multi_reduction <add>, %73, %cst_42 [1] : vector<2x4x16x16xf32> to vector<2x16x16xf32>
    %c0_i32 = arith.constant 0 : i32
    %75 = arith.cmpi eq, %arg2, %c0_i32 : i32
    %76 = arith.extui %75 : i1 to i32
    %c0_i32_43 = arith.constant 0 : i32
    %77 = arith.cmpi ne, %76, %c0_i32_43 : i32
    scf.if %77 {
      %c0_46 = arith.constant 0 : index
      %c0_47 = arith.constant 0 : index
      %c0_48 = arith.constant 0 : index
      %c0_49 = arith.constant 0 : index
      %81 = vector.load %arg10[%c0_46, %c0_47, %c0_48, %c0_49] : memref<1x2x16x16xf32, #tpu.memory_space<vmem>>, vector<1x2x16x16xf32>
      %82 = vector.shape_cast %81 : vector<1x2x16x16xf32> to vector<2x16x16xf32>
      %83 = vector.shape_cast %66 : vector<2x16x16xf32> to vector<1x2x16x16xf32>
      tpu.vector_store %arg10[%c0_46, %c0_47, %c0_48, %c0_49], %83 {strides = array<i32>} : memref<1x2x16x16xf32, #tpu.memory_space<vmem>>, vector<1x2x16x16xf32>,
      %c0_50 = arith.constant 0 : index
      %c0_51 = arith.constant 0 : index
      %c0_52 = arith.constant 0 : index
      %c0_53 = arith.constant 0 : index
      %84 = vector.load %arg11[%c0_50, %c0_51, %c0_52, %c0_53] : memref<1x2x16x16xf32, #tpu.memory_space<vmem>>, vector<1x2x16x16xf32>
      %85 = vector.shape_cast %84 : vector<1x2x16x16xf32> to vector<2x16x16xf32>
      %86 = vector.shape_cast %74 : vector<2x16x16xf32> to vector<1x2x16x16xf32>
      tpu.vector_store %arg11[%c0_50, %c0_51, %c0_52, %c0_53], %86 {strides = array<i32>} : memref<1x2x16x16xf32, #tpu.memory_space<vmem>>, vector<1x2x16x16xf32>,
    } else {
    }
    %c0_i32_44 = arith.constant 0 : i32
    %78 = arith.cmpi ne, %arg2, %c0_i32_44 : i32
    %79 = arith.extui %78 : i1 to i32
    %c0_i32_45 = arith.constant 0 : i32
    %80 = arith.cmpi ne, %79, %c0_i32_45 : i32
    scf.if %80 {
      %c0_46 = arith.constant 0 : index
      %c0_47 = arith.constant 0 : index
      %c0_48 = arith.constant 0 : index
      %c0_49 = arith.constant 0 : index
      %81 = vector.load %arg10[%c0_46, %c0_47, %c0_48, %c0_49] : memref<1x2x16x16xf32, #tpu.memory_space<vmem>>, vector<1x2x16x16xf32>
      %82 = vector.shape_cast %81 : vector<1x2x16x16xf32> to vector<2x16x16xf32>
      %83 = arith.addf %82, %66 : vector<2x16x16xf32>
      %c0_50 = arith.constant 0 : index
      %c0_51 = arith.constant 0 : index
      %c0_52 = arith.constant 0 : index
      %c0_53 = arith.constant 0 : index
      %84 = vector.load %arg10[%c0_50, %c0_51, %c0_52, %c0_53] : memref<1x2x16x16xf32, #tpu.memory_space<vmem>>, vector<1x2x16x16xf32>
      %85 = vector.shape_cast %84 : vector<1x2x16x16xf32> to vector<2x16x16xf32>
      %86 = vector.shape_cast %83 : vector<2x16x16xf32> to vector<1x2x16x16xf32>
      tpu.vector_store %arg10[%c0_50, %c0_51, %c0_52, %c0_53], %86 {strides = array<i32>} : memref<1x2x16x16xf32, #tpu.memory_space<vmem>>, vector<1x2x16x16xf32>,
      %c0_54 = arith.constant 0 : index
      %c0_55 = arith.constant 0 : index
      %c0_56 = arith.constant 0 : index
      %c0_57 = arith.constant 0 : index
      %87 = vector.load %arg11[%c0_54, %c0_55, %c0_56, %c0_57] : memref<1x2x16x16xf32, #tpu.memory_space<vmem>>, vector<1x2x16x16xf32>
      %88 = vector.shape_cast %87 : vector<1x2x16x16xf32> to vector<2x16x16xf32>
      %89 = arith.addf %88, %74 : vector<2x16x16xf32>
      %c0_58 = arith.constant 0 : index
      %c0_59 = arith.constant 0 : index
      %c0_60 = arith.constant 0 : index
      %c0_61 = arith.constant 0 : index
      %90 = vector.load %arg11[%c0_58, %c0_59, %c0_60, %c0_61] : memref<1x2x16x16xf32, #tpu.memory_space<vmem>>, vector<1x2x16x16xf32>
      %91 = vector.shape_cast %90 : vector<1x2x16x16xf32> to vector<2x16x16xf32>
      %92 = vector.shape_cast %89 : vector<2x16x16xf32> to vector<1x2x16x16xf32>
      tpu.vector_store %arg11[%c0_58, %c0_59, %c0_60, %c0_61], %92 {strides = array<i32>} : memref<1x2x16x16xf32, #tpu.memory_space<vmem>>, vector<1x2x16x16xf32>,
    } else {
    }
    return
  }
  func.func @transform_0(%arg0: i32, %arg1: i32, %arg2: i32) -> (i32, i32, i32, i32, i32) {
    %c0_i32 = arith.constant 0 : i32
    %c0_i32_0 = arith.constant 0 : i32
    %c0_i32_1 = arith.constant 0 : i32
    return %arg0, %arg1, %arg2, %c0_i32, %c0_i32_0 : i32, i32, i32, i32, i32
  }
  func.func @transform_1(%arg0: i32, %arg1: i32, %arg2: i32) -> (i32, i32, i32, i32, i32) {
    %c0_i32 = arith.constant 0 : i32
    %c0_i32_0 = arith.constant 0 : i32
    %c0_i32_1 = arith.constant 0 : i32
    return %arg0, %arg1, %arg2, %c0_i32, %c0_i32_0 : i32, i32, i32, i32, i32
  }
  func.func @transform_2(%arg0: i32, %arg1: i32, %arg2: i32) -> (i32, i32, i32, i32) {
    %c0_i32 = arith.constant 0 : i32
    %c0_i32_0 = arith.constant 0 : i32
    %c0_i32_1 = arith.constant 0 : i32
    return %arg0, %arg1, %c0_i32, %c0_i32_0 : i32, i32, i32, i32
  }
  func.func @transform_3(%arg0: i32, %arg1: i32, %arg2: i32) -> (i32, i32, i32, i32) {
    %c0_i32 = arith.constant 0 : i32
    %c0_i32_0 = arith.constant 0 : i32
    %c0_i32_1 = arith.constant 0 : i32
    return %arg0, %arg2, %c0_i32, %c0_i32_0 : i32, i32, i32, i32
  }
  func.func @transform_4(%arg0: i32, %arg1: i32, %arg2: i32) -> (i32, i32, i32, i32) {
    %c0_i32 = arith.constant 0 : i32
    %c0_i32_0 = arith.constant 0 : i32
    %c0_i32_1 = arith.constant 0 : i32
    return %arg0, %arg2, %c0_i32, %c0_i32_0 : i32, i32, i32, i32
  }
  func.func @transform_5(%arg0: i32, %arg1: i32, %arg2: i32) -> (i32, i32, i32) {
    %c0_i32 = arith.constant 0 : i32
    %c0_i32_0 = arith.constant 0 : i32
    %c0_i32_1 = arith.constant 0 : i32
    %c0_i32_2 = arith.constant 0 : i32
    return %c0_i32, %c0_i32_0, %c0_i32_1 : i32, i32, i32
  }
  func.func @transform_6(%arg0: i32, %arg1: i32, %arg2: i32) -> (i32, i32, i32) {
    %c0_i32 = arith.constant 0 : i32
    %c0_i32_0 = arith.constant 0 : i32
    %c0_i32_1 = arith.constant 0 : i32
    %c0_i32_2 = arith.constant 0 : i32
    return %c0_i32, %c0_i32_0, %c0_i32_1 : i32, i32, i32
  }
  func.func @transform_7(%arg0: i32, %arg1: i32, %arg2: i32) -> (i32, i32, i32, i32) {
    %c0_i32 = arith.constant 0 : i32
    %c0_i32_0 = arith.constant 0 : i32
    %c0_i32_1 = arith.constant 0 : i32
    return %arg0, %arg1, %c0_i32, %c0_i32_0 : i32, i32, i32, i32
  }
  func.func @transform_8(%arg0: i32, %arg1: i32, %arg2: i32) -> (i32, i32, i32, i32) {
    %c0_i32 = arith.constant 0 : i32
    %c0_i32_0 = arith.constant 0 : i32
    %c0_i32_1 = arith.constant 0 : i32
    return %arg0, %arg1, %c0_i32, %c0_i32_0 : i32, i32, i32, i32
  }
}

module attributes {stable_mosaic.version = 11 : i64} {
  func.func @_aha_kernel(%arg0: i32, %arg1: i32, %arg2: i32, %arg3: memref<1x2x16x16xf32, #tpu.memory_space<vmem>>, %arg4: memref<1x2x16x16xf32, #tpu.memory_space<vmem>>, %arg5: memref<1x2x16x16xf32, #tpu.memory_space<vmem>>, %arg6: memref<1x4x16x16xf32, #tpu.memory_space<vmem>>, %arg7: memref<1x4x16x16xf32, #tpu.memory_space<vmem>>, %arg8: memref<6x16x16xbf16, #tpu.memory_space<vmem>>, %arg9: memref<6x16x16xbf16, #tpu.memory_space<vmem>>, %arg10: memref<1x2x16x16xf32, #tpu.memory_space<vmem>>, %arg11: memref<1x2x16x16xf32, #tpu.memory_space<vmem>>) attributes {dimension_semantics = [#tpu.dimension_semantics<parallel>, #tpu.dimension_semantics<parallel>, #tpu.dimension_semantics<arbitrary>], iteration_bounds = array<i64: 2, 1, 1>, scalar_prefetch = 0 : i64, scratch_operands = 0 : i64, tpu.core_type = #tpu.core_type<tc>, window_params = [{transform_indices = @transform_0, window_bounds = array<i64: 1, 2, 16, 16>}, {transform_indices = @transform_1, window_bounds = array<i64: 1, 2, 16, 16>}, {transform_indices = @transform_2, window_bounds = array<i64: 1, 2, 16, 16>}, {transform_indices = @transform_3, window_bounds = array<i64: 1, 4, 16, 16>}, {transform_indices = @transform_4, window_bounds = array<i64: 1, 4, 16, 16>}, {pipeline_mode = #tpu.pipeline_mode<synchronous>, transform_indices = @transform_5, window_bounds = array<i64: 6, 16, 16>}, {pipeline_mode = #tpu.pipeline_mode<synchronous>, transform_indices = @transform_6, window_bounds = array<i64: 6, 16, 16>}, {transform_indices = @transform_7, window_bounds = array<i64: 1, 2, 16, 16>}, {transform_indices = @transform_8, window_bounds = array<i64: 1, 2, 16, 16>}]} {
    %c0 = arith.constant 0 : index
    %c0_0 = arith.constant 0 : index
    %c0_1 = arith.constant 0 : index
    %c0_2 = arith.constant 0 : index
    %0 = vector.load %arg3[%c0, %c0_0, %c0_1, %c0_2] : memref<1x2x16x16xf32, #tpu.memory_space<vmem>>, vector<1x2x16x16xf32>
    %1 = vector.shape_cast %0 : vector<1x2x16x16xf32> to vector<2x16x16xf32>
    %c0_3 = arith.constant 0 : index
    %c0_4 = arith.constant 0 : index
    %c0_5 = arith.constant 0 : index
    %c0_6 = arith.constant 0 : index
    %2 = vector.load %arg4[%c0_3, %c0_4, %c0_5, %c0_6] : memref<1x2x16x16xf32, #tpu.memory_space<vmem>>, vector<1x2x16x16xf32>
    %3 = vector.shape_cast %2 : vector<1x2x16x16xf32> to vector<2x16x16xf32>
    %c0_7 = arith.constant 0 : index
    %c0_8 = arith.constant 0 : index
    %c0_9 = arith.constant 0 : index
    %c0_10 = arith.constant 0 : index
    %4 = vector.load %arg5[%c0_7, %c0_8, %c0_9, %c0_10] : memref<1x2x16x16xf32, #tpu.memory_space<vmem>>, vector<1x2x16x16xf32>
    %5 = vector.shape_cast %4 : vector<1x2x16x16xf32> to vector<2x16x16xf32>
    %c0_11 = arith.constant 0 : index
    %c0_12 = arith.constant 0 : index
    %c0_13 = arith.constant 0 : index
    %c0_14 = arith.constant 0 : index
    %6 = vector.load %arg6[%c0_11, %c0_12, %c0_13, %c0_14] : memref<1x4x16x16xf32, #tpu.memory_space<vmem>>, vector<1x4x16x16xf32>
    %7 = vector.shape_cast %6 : vector<1x4x16x16xf32> to vector<4x16x16xf32>
    %c0_15 = arith.constant 0 : index
    %c0_16 = arith.constant 0 : index
    %c0_17 = arith.constant 0 : index
    %c0_18 = arith.constant 0 : index
    %8 = vector.load %arg7[%c0_15, %c0_16, %c0_17, %c0_18] : memref<1x4x16x16xf32, #tpu.memory_space<vmem>>, vector<1x4x16x16xf32>
    %9 = vector.shape_cast %8 : vector<1x4x16x16xf32> to vector<4x16x16xf32>
    %c0_19 = arith.constant 0 : index
    %c0_20 = arith.constant 0 : index
    %c0_21 = arith.constant 0 : index
    %10 = vector.load %arg8[%c0_19, %c0_20, %c0_21] : memref<6x16x16xbf16, #tpu.memory_space<vmem>>, vector<1x16x16xbf16>
    %11 = vector.shape_cast %10 : vector<1x16x16xbf16> to vector<16x16xbf16>
    %c1 = arith.constant 1 : index
    %c0_22 = arith.constant 0 : index
    %c0_23 = arith.constant 0 : index
    %12 = vector.load %arg8[%c1, %c0_22, %c0_23] : memref<6x16x16xbf16, #tpu.memory_space<vmem>>, vector<1x16x16xbf16>
    %13 = vector.shape_cast %12 : vector<1x16x16xbf16> to vector<16x16xbf16>
    %c2 = arith.constant 2 : index
    %c0_24 = arith.constant 0 : index
    %c0_25 = arith.constant 0 : index
    %14 = vector.load %arg8[%c2, %c0_24, %c0_25] : memref<6x16x16xbf16, #tpu.memory_space<vmem>>, vector<1x16x16xbf16>
    %15 = vector.shape_cast %14 : vector<1x16x16xbf16> to vector<16x16xbf16>
    %c3 = arith.constant 3 : index
    %c0_26 = arith.constant 0 : index
    %c0_27 = arith.constant 0 : index
    %16 = vector.load %arg8[%c3, %c0_26, %c0_27] : memref<6x16x16xbf16, #tpu.memory_space<vmem>>, vector<1x16x16xbf16>
    %17 = vector.shape_cast %16 : vector<1x16x16xbf16> to vector<16x16xbf16>
    %c4 = arith.constant 4 : index
    %c0_28 = arith.constant 0 : index
    %c0_29 = arith.constant 0 : index
    %18 = vector.load %arg8[%c4, %c0_28, %c0_29] : memref<6x16x16xbf16, #tpu.memory_space<vmem>>, vector<1x16x16xbf16>
    %19 = vector.shape_cast %18 : vector<1x16x16xbf16> to vector<16x16xbf16>
    %c5 = arith.constant 5 : index
    %c0_30 = arith.constant 0 : index
    %c0_31 = arith.constant 0 : index
    %20 = vector.load %arg8[%c5, %c0_30, %c0_31] : memref<6x16x16xbf16, #tpu.memory_space<vmem>>, vector<1x16x16xbf16>
    %21 = vector.shape_cast %20 : vector<1x16x16xbf16> to vector<16x16xbf16>
    %c0_32 = arith.constant 0 : index
    %c0_33 = arith.constant 0 : index
    %c0_34 = arith.constant 0 : index
    %22 = vector.load %arg9[%c0_32, %c0_33, %c0_34] : memref<6x16x16xbf16, #tpu.memory_space<vmem>>, vector<1x16x16xbf16>
    %23 = vector.shape_cast %22 : vector<1x16x16xbf16> to vector<16x16xbf16>
    %c1_35 = arith.constant 1 : index
    %c0_36 = arith.constant 0 : index
    %c0_37 = arith.constant 0 : index
    %24 = vector.load %arg9[%c1_35, %c0_36, %c0_37] : memref<6x16x16xbf16, #tpu.memory_space<vmem>>, vector<1x16x16xbf16>
    %25 = vector.shape_cast %24 : vector<1x16x16xbf16> to vector<16x16xbf16>
    %c2_38 = arith.constant 2 : index
    %c0_39 = arith.constant 0 : index
    %c0_40 = arith.constant 0 : index
    %26 = vector.load %arg9[%c2_38, %c0_39, %c0_40] : memref<6x16x16xbf16, #tpu.memory_space<vmem>>, vector<1x16x16xbf16>
    %27 = vector.shape_cast %26 : vector<1x16x16xbf16> to vector<16x16xbf16>
    %c3_41 = arith.constant 3 : index
    %c0_42 = arith.constant 0 : index
    %c0_43 = arith.constant 0 : index
    %28 = vector.load %arg9[%c3_41, %c0_42, %c0_43] : memref<6x16x16xbf16, #tpu.memory_space<vmem>>, vector<1x16x16xbf16>
    %29 = vector.shape_cast %28 : vector<1x16x16xbf16> to vector<16x16xbf16>
    %c4_44 = arith.constant 4 : index
    %c0_45 = arith.constant 0 : index
    %c0_46 = arith.constant 0 : index
    %30 = vector.load %arg9[%c4_44, %c0_45, %c0_46] : memref<6x16x16xbf16, #tpu.memory_space<vmem>>, vector<1x16x16xbf16>
    %31 = vector.shape_cast %30 : vector<1x16x16xbf16> to vector<16x16xbf16>
    %c5_47 = arith.constant 5 : index
    %c0_48 = arith.constant 0 : index
    %c0_49 = arith.constant 0 : index
    %32 = vector.load %arg9[%c5_47, %c0_48, %c0_49] : memref<6x16x16xbf16, #tpu.memory_space<vmem>>, vector<1x16x16xbf16>
    %33 = vector.shape_cast %32 : vector<1x16x16xbf16> to vector<16x16xbf16>
    %34 = vector.shape_cast %7 : vector<4x16x16xf32> to vector<1x4x16x16xf32>
    %35 = vector.shape_cast %1 : vector<2x16x16xf32> to vector<2x1x16x16xf32>
    %36 = vector.broadcast %34 : vector<1x4x16x16xf32> to vector<2x4x16x16xf32>
    %37 = vector.broadcast %35 : vector<2x1x16x16xf32> to vector<2x4x16x16xf32>
    %38 = arith.mulf %36, %37 : vector<2x4x16x16xf32>
    %39 = vector.shape_cast %9 : vector<4x16x16xf32> to vector<1x4x16x16xf32>
    %40 = vector.shape_cast %3 : vector<2x16x16xf32> to vector<2x1x16x16xf32>
    %41 = vector.broadcast %39 : vector<1x4x16x16xf32> to vector<2x4x16x16xf32>
    %42 = vector.broadcast %40 : vector<2x1x16x16xf32> to vector<2x4x16x16xf32>
    %43 = arith.mulf %41, %42 : vector<2x4x16x16xf32>
    %44 = arith.subf %38, %43 : vector<2x4x16x16xf32>
    %45 = vector.shape_cast %44 : vector<2x4x16x16xf32> to vector<128x16xf32>
    %46 = vector.shape_cast %7 : vector<4x16x16xf32> to vector<1x4x16x16xf32>
    %47 = vector.shape_cast %3 : vector<2x16x16xf32> to vector<2x1x16x16xf32>
    %48 = vector.broadcast %46 : vector<1x4x16x16xf32> to vector<2x4x16x16xf32>
    %49 = vector.broadcast %47 : vector<2x1x16x16xf32> to vector<2x4x16x16xf32>
    %50 = arith.mulf %48, %49 : vector<2x4x16x16xf32>
    %51 = vector.shape_cast %9 : vector<4x16x16xf32> to vector<1x4x16x16xf32>
    %52 = vector.shape_cast %1 : vector<2x16x16xf32> to vector<2x1x16x16xf32>
    %53 = vector.broadcast %51 : vector<1x4x16x16xf32> to vector<2x4x16x16xf32>
    %54 = vector.broadcast %52 : vector<2x1x16x16xf32> to vector<2x4x16x16xf32>
    %55 = arith.mulf %53, %54 : vector<2x4x16x16xf32>
    %56 = arith.addf %50, %55 : vector<2x4x16x16xf32>
    %57 = vector.shape_cast %56 : vector<2x4x16x16xf32> to vector<128x16xf32>
    %58 = arith.truncf %45 : vector<128x16xf32> to vector<128x16xbf16>
    %cst = arith.constant dense<0.000000e+00> : vector<128x16xf32>
    %59 = tpu.matmul %58, %23, %cst {dimension_numbers = #tpu.dot_dimension_numbers<[1], [0], [0], [1], [0, 0, 1, 1], [], []>} : vector<128x16xbf16>, vector<16x16xbf16>, vector<128x16xf32> -> vector<128x16xf32>
    %60 = arith.truncf %57 : vector<128x16xf32> to vector<128x16xbf16>
    %cst_50 = arith.constant dense<0.000000e+00> : vector<128x16xf32>
    %61 = tpu.matmul %60, %25, %cst_50 {dimension_numbers = #tpu.dot_dimension_numbers<[1], [0], [0], [1], [0, 0, 1, 1], [], []>} : vector<128x16xbf16>, vector<16x16xbf16>, vector<128x16xf32> -> vector<128x16xf32>
    %62 = arith.addf %45, %57 : vector<128x16xf32>
    %63 = arith.truncf %62 : vector<128x16xf32> to vector<128x16xbf16>
    %cst_51 = arith.constant dense<0.000000e+00> : vector<128x16xf32>
    %64 = tpu.matmul %63, %27, %cst_51 {dimension_numbers = #tpu.dot_dimension_numbers<[1], [0], [0], [1], [0, 0, 1, 1], [], []>} : vector<128x16xbf16>, vector<16x16xbf16>, vector<128x16xf32> -> vector<128x16xf32>
    %65 = arith.subf %59, %61 : vector<128x16xf32>
    %66 = arith.subf %64, %59 : vector<128x16xf32>
    %67 = arith.subf %66, %61 : vector<128x16xf32>
    %68 = vector.shape_cast %65 : vector<128x16xf32> to vector<8x16x16xf32>
    %69 = vector.shape_cast %67 : vector<128x16xf32> to vector<8x16x16xf32>
    %70 = vector.shape_cast %11 : vector<16x16xbf16> to vector<1x16x16xbf16>
    %71 = vector.broadcast %70 : vector<1x16x16xbf16> to vector<8x16x16xbf16>
    %72 = arith.truncf %68 : vector<8x16x16xf32> to vector<8x16x16xbf16>
    "tpu.trace_start"() <{level = 10 : i32, message = "gjy,gyx->gjx"}> : () -> ()
    %cst_52 = arith.constant dense<0.000000e+00> : vector<8x16x16xf32>
    %73 = tpu.matmul %71, %72, %cst_52 {dimension_numbers = #tpu.dot_dimension_numbers<[2], [1], [1], [2], [0, 0, 0, 1, 1, 2], [0], [0]>} : vector<8x16x16xbf16>, vector<8x16x16xbf16>, vector<8x16x16xf32> -> vector<8x16x16xf32>
    "tpu.trace_stop"() : () -> ()
    %74 = vector.shape_cast %13 : vector<16x16xbf16> to vector<1x16x16xbf16>
    %75 = vector.broadcast %74 : vector<1x16x16xbf16> to vector<8x16x16xbf16>
    %76 = arith.truncf %69 : vector<8x16x16xf32> to vector<8x16x16xbf16>
    "tpu.trace_start"() <{level = 10 : i32, message = "gjy,gyx->gjx"}> : () -> ()
    %cst_53 = arith.constant dense<0.000000e+00> : vector<8x16x16xf32>
    %77 = tpu.matmul %75, %76, %cst_53 {dimension_numbers = #tpu.dot_dimension_numbers<[2], [1], [1], [2], [0, 0, 0, 1, 1, 2], [0], [0]>} : vector<8x16x16xbf16>, vector<8x16x16xbf16>, vector<8x16x16xf32> -> vector<8x16x16xf32>
    "tpu.trace_stop"() : () -> ()
    %78 = arith.addf %68, %69 : vector<8x16x16xf32>
    %79 = vector.shape_cast %15 : vector<16x16xbf16> to vector<1x16x16xbf16>
    %80 = vector.broadcast %79 : vector<1x16x16xbf16> to vector<8x16x16xbf16>
    %81 = arith.truncf %78 : vector<8x16x16xf32> to vector<8x16x16xbf16>
    "tpu.trace_start"() <{level = 10 : i32, message = "gjy,gyx->gjx"}> : () -> ()
    %cst_54 = arith.constant dense<0.000000e+00> : vector<8x16x16xf32>
    %82 = tpu.matmul %80, %81, %cst_54 {dimension_numbers = #tpu.dot_dimension_numbers<[2], [1], [1], [2], [0, 0, 0, 1, 1, 2], [0], [0]>} : vector<8x16x16xbf16>, vector<8x16x16xbf16>, vector<8x16x16xf32> -> vector<8x16x16xf32>
    "tpu.trace_stop"() : () -> ()
    %83 = arith.subf %73, %77 : vector<8x16x16xf32>
    %84 = arith.subf %82, %73 : vector<8x16x16xf32>
    %85 = arith.subf %84, %77 : vector<8x16x16xf32>
    %86 = vector.shape_cast %5 : vector<2x16x16xf32> to vector<2x1x16x16xf32>
    %87 = vector.shape_cast %83 : vector<8x16x16xf32> to vector<2x4x16x16xf32>
    %88 = vector.broadcast %86 : vector<2x1x16x16xf32> to vector<2x4x16x16xf32>
    %89 = arith.mulf %87, %88 : vector<2x4x16x16xf32>
    %90 = vector.shape_cast %89 : vector<2x4x16x16xf32> to vector<8x16x16xf32>
    %91 = vector.shape_cast %85 : vector<8x16x16xf32> to vector<2x4x16x16xf32>
    %92 = vector.broadcast %86 : vector<2x1x16x16xf32> to vector<2x4x16x16xf32>
    %93 = arith.mulf %91, %92 : vector<2x4x16x16xf32>
    %94 = vector.shape_cast %93 : vector<2x4x16x16xf32> to vector<8x16x16xf32>
    %95 = vector.shape_cast %17 : vector<16x16xbf16> to vector<1x16x16xbf16>
    %96 = vector.broadcast %95 : vector<1x16x16xbf16> to vector<8x16x16xbf16>
    %97 = arith.truncf %90 : vector<8x16x16xf32> to vector<8x16x16xbf16>
    "tpu.trace_start"() <{level = 10 : i32, message = "gjy,gyx->gjx"}> : () -> ()
    %cst_55 = arith.constant dense<0.000000e+00> : vector<8x16x16xf32>
    %98 = tpu.matmul %96, %97, %cst_55 {dimension_numbers = #tpu.dot_dimension_numbers<[2], [1], [1], [2], [0, 0, 0, 1, 1, 2], [0], [0]>} : vector<8x16x16xbf16>, vector<8x16x16xbf16>, vector<8x16x16xf32> -> vector<8x16x16xf32>
    "tpu.trace_stop"() : () -> ()
    %99 = vector.shape_cast %19 : vector<16x16xbf16> to vector<1x16x16xbf16>
    %100 = vector.broadcast %99 : vector<1x16x16xbf16> to vector<8x16x16xbf16>
    %101 = arith.truncf %94 : vector<8x16x16xf32> to vector<8x16x16xbf16>
    "tpu.trace_start"() <{level = 10 : i32, message = "gjy,gyx->gjx"}> : () -> ()
    %cst_56 = arith.constant dense<0.000000e+00> : vector<8x16x16xf32>
    %102 = tpu.matmul %100, %101, %cst_56 {dimension_numbers = #tpu.dot_dimension_numbers<[2], [1], [1], [2], [0, 0, 0, 1, 1, 2], [0], [0]>} : vector<8x16x16xbf16>, vector<8x16x16xbf16>, vector<8x16x16xf32> -> vector<8x16x16xf32>
    "tpu.trace_stop"() : () -> ()
    %103 = arith.addf %90, %94 : vector<8x16x16xf32>
    %104 = vector.shape_cast %21 : vector<16x16xbf16> to vector<1x16x16xbf16>
    %105 = vector.broadcast %104 : vector<1x16x16xbf16> to vector<8x16x16xbf16>
    %106 = arith.truncf %103 : vector<8x16x16xf32> to vector<8x16x16xbf16>
    "tpu.trace_start"() <{level = 10 : i32, message = "gjy,gyx->gjx"}> : () -> ()
    %cst_57 = arith.constant dense<0.000000e+00> : vector<8x16x16xf32>
    %107 = tpu.matmul %105, %106, %cst_57 {dimension_numbers = #tpu.dot_dimension_numbers<[2], [1], [1], [2], [0, 0, 0, 1, 1, 2], [0], [0]>} : vector<8x16x16xbf16>, vector<8x16x16xbf16>, vector<8x16x16xf32> -> vector<8x16x16xf32>
    "tpu.trace_stop"() : () -> ()
    %108 = arith.subf %98, %102 : vector<8x16x16xf32>
    %109 = arith.subf %107, %98 : vector<8x16x16xf32>
    %110 = arith.subf %109, %102 : vector<8x16x16xf32>
    %111 = vector.shape_cast %108 : vector<8x16x16xf32> to vector<128x16xf32>
    %112 = vector.shape_cast %110 : vector<8x16x16xf32> to vector<128x16xf32>
    %113 = arith.truncf %111 : vector<128x16xf32> to vector<128x16xbf16>
    %cst_58 = arith.constant dense<0.000000e+00> : vector<128x16xf32>
    %114 = tpu.matmul %113, %29, %cst_58 {dimension_numbers = #tpu.dot_dimension_numbers<[1], [0], [0], [1], [0, 0, 1, 1], [], []>} : vector<128x16xbf16>, vector<16x16xbf16>, vector<128x16xf32> -> vector<128x16xf32>
    %115 = arith.truncf %112 : vector<128x16xf32> to vector<128x16xbf16>
    %cst_59 = arith.constant dense<0.000000e+00> : vector<128x16xf32>
    %116 = tpu.matmul %115, %31, %cst_59 {dimension_numbers = #tpu.dot_dimension_numbers<[1], [0], [0], [1], [0, 0, 1, 1], [], []>} : vector<128x16xbf16>, vector<16x16xbf16>, vector<128x16xf32> -> vector<128x16xf32>
    %117 = arith.addf %111, %112 : vector<128x16xf32>
    %118 = arith.truncf %117 : vector<128x16xf32> to vector<128x16xbf16>
    %cst_60 = arith.constant dense<0.000000e+00> : vector<128x16xf32>
    %119 = tpu.matmul %118, %33, %cst_60 {dimension_numbers = #tpu.dot_dimension_numbers<[1], [0], [0], [1], [0, 0, 1, 1], [], []>} : vector<128x16xbf16>, vector<16x16xbf16>, vector<128x16xf32> -> vector<128x16xf32>
    %120 = arith.subf %114, %116 : vector<128x16xf32>
    %121 = arith.subf %119, %114 : vector<128x16xf32>
    %122 = arith.subf %121, %116 : vector<128x16xf32>
    %123 = vector.shape_cast %120 : vector<128x16xf32> to vector<2x4x16x16xf32>
    %124 = vector.shape_cast %122 : vector<128x16xf32> to vector<2x4x16x16xf32>
    %125 = vector.shape_cast %7 : vector<4x16x16xf32> to vector<1x4x16x16xf32>
    %126 = vector.broadcast %125 : vector<1x4x16x16xf32> to vector<2x4x16x16xf32>
    %127 = arith.mulf %126, %123 : vector<2x4x16x16xf32>
    %128 = vector.shape_cast %9 : vector<4x16x16xf32> to vector<1x4x16x16xf32>
    %129 = vector.broadcast %128 : vector<1x4x16x16xf32> to vector<2x4x16x16xf32>
    %130 = arith.mulf %129, %124 : vector<2x4x16x16xf32>
    %131 = arith.addf %127, %130 : vector<2x4x16x16xf32>
    %cst_61 = arith.constant dense<0.000000e+00> : vector<2x16x16xf32>
    %132 = vector.multi_reduction <add>, %131, %cst_61 [1] : vector<2x4x16x16xf32> to vector<2x16x16xf32>
    %133 = vector.shape_cast %7 : vector<4x16x16xf32> to vector<1x4x16x16xf32>
    %134 = vector.broadcast %133 : vector<1x4x16x16xf32> to vector<2x4x16x16xf32>
    %135 = arith.mulf %134, %124 : vector<2x4x16x16xf32>
    %136 = vector.shape_cast %9 : vector<4x16x16xf32> to vector<1x4x16x16xf32>
    %137 = vector.broadcast %136 : vector<1x4x16x16xf32> to vector<2x4x16x16xf32>
    %138 = arith.mulf %137, %123 : vector<2x4x16x16xf32>
    %139 = arith.subf %135, %138 : vector<2x4x16x16xf32>
    %cst_62 = arith.constant dense<0.000000e+00> : vector<2x16x16xf32>
    %140 = vector.multi_reduction <add>, %139, %cst_62 [1] : vector<2x4x16x16xf32> to vector<2x16x16xf32>
    %c0_i32 = arith.constant 0 : i32
    %141 = arith.cmpi eq, %arg2, %c0_i32 : i32
    %142 = arith.extui %141 : i1 to i32
    %c0_i32_63 = arith.constant 0 : i32
    %143 = arith.cmpi ne, %142, %c0_i32_63 : i32
    scf.if %143 {
      %cst_66 = arith.constant 0.00999999977 : f32
      %147 = vector.broadcast %cst_66 : f32 to vector<2x16x16xf32>
      %148 = arith.mulf %147, %1 : vector<2x16x16xf32>
      %149 = arith.addf %132, %148 : vector<2x16x16xf32>
      %c0_67 = arith.constant 0 : index
      %c0_68 = arith.constant 0 : index
      %c0_69 = arith.constant 0 : index
      %c0_70 = arith.constant 0 : index
      %150 = vector.load %arg10[%c0_67, %c0_68, %c0_69, %c0_70] : memref<1x2x16x16xf32, #tpu.memory_space<vmem>>, vector<1x2x16x16xf32>
      %151 = vector.shape_cast %150 : vector<1x2x16x16xf32> to vector<2x16x16xf32>
      %152 = vector.shape_cast %149 : vector<2x16x16xf32> to vector<1x2x16x16xf32>
      tpu.vector_store %arg10[%c0_67, %c0_68, %c0_69, %c0_70], %152 {strides = array<i32>} : memref<1x2x16x16xf32, #tpu.memory_space<vmem>>, vector<1x2x16x16xf32>,
      %cst_71 = arith.constant 0.00999999977 : f32
      %153 = vector.broadcast %cst_71 : f32 to vector<2x16x16xf32>
      %154 = arith.mulf %153, %3 : vector<2x16x16xf32>
      %155 = arith.addf %140, %154 : vector<2x16x16xf32>
      %c0_72 = arith.constant 0 : index
      %c0_73 = arith.constant 0 : index
      %c0_74 = arith.constant 0 : index
      %c0_75 = arith.constant 0 : index
      %156 = vector.load %arg11[%c0_72, %c0_73, %c0_74, %c0_75] : memref<1x2x16x16xf32, #tpu.memory_space<vmem>>, vector<1x2x16x16xf32>
      %157 = vector.shape_cast %156 : vector<1x2x16x16xf32> to vector<2x16x16xf32>
      %158 = vector.shape_cast %155 : vector<2x16x16xf32> to vector<1x2x16x16xf32>
      tpu.vector_store %arg11[%c0_72, %c0_73, %c0_74, %c0_75], %158 {strides = array<i32>} : memref<1x2x16x16xf32, #tpu.memory_space<vmem>>, vector<1x2x16x16xf32>,
    } else {
    }
    %c0_i32_64 = arith.constant 0 : i32
    %144 = arith.cmpi ne, %arg2, %c0_i32_64 : i32
    %145 = arith.extui %144 : i1 to i32
    %c0_i32_65 = arith.constant 0 : i32
    %146 = arith.cmpi ne, %145, %c0_i32_65 : i32
    scf.if %146 {
      %c0_66 = arith.constant 0 : index
      %c0_67 = arith.constant 0 : index
      %c0_68 = arith.constant 0 : index
      %c0_69 = arith.constant 0 : index
      %147 = vector.load %arg10[%c0_66, %c0_67, %c0_68, %c0_69] : memref<1x2x16x16xf32, #tpu.memory_space<vmem>>, vector<1x2x16x16xf32>
      %148 = vector.shape_cast %147 : vector<1x2x16x16xf32> to vector<2x16x16xf32>
      %149 = arith.addf %148, %132 : vector<2x16x16xf32>
      %c0_70 = arith.constant 0 : index
      %c0_71 = arith.constant 0 : index
      %c0_72 = arith.constant 0 : index
      %c0_73 = arith.constant 0 : index
      %150 = vector.load %arg10[%c0_70, %c0_71, %c0_72, %c0_73] : memref<1x2x16x16xf32, #tpu.memory_space<vmem>>, vector<1x2x16x16xf32>
      %151 = vector.shape_cast %150 : vector<1x2x16x16xf32> to vector<2x16x16xf32>
      %152 = vector.shape_cast %149 : vector<2x16x16xf32> to vector<1x2x16x16xf32>
      tpu.vector_store %arg10[%c0_70, %c0_71, %c0_72, %c0_73], %152 {strides = array<i32>} : memref<1x2x16x16xf32, #tpu.memory_space<vmem>>, vector<1x2x16x16xf32>,
      %c0_74 = arith.constant 0 : index
      %c0_75 = arith.constant 0 : index
      %c0_76 = arith.constant 0 : index
      %c0_77 = arith.constant 0 : index
      %153 = vector.load %arg11[%c0_74, %c0_75, %c0_76, %c0_77] : memref<1x2x16x16xf32, #tpu.memory_space<vmem>>, vector<1x2x16x16xf32>
      %154 = vector.shape_cast %153 : vector<1x2x16x16xf32> to vector<2x16x16xf32>
      %155 = arith.addf %154, %140 : vector<2x16x16xf32>
      %c0_78 = arith.constant 0 : index
      %c0_79 = arith.constant 0 : index
      %c0_80 = arith.constant 0 : index
      %c0_81 = arith.constant 0 : index
      %156 = vector.load %arg11[%c0_78, %c0_79, %c0_80, %c0_81] : memref<1x2x16x16xf32, #tpu.memory_space<vmem>>, vector<1x2x16x16xf32>
      %157 = vector.shape_cast %156 : vector<1x2x16x16xf32> to vector<2x16x16xf32>
      %158 = vector.shape_cast %155 : vector<2x16x16xf32> to vector<1x2x16x16xf32>
      tpu.vector_store %arg11[%c0_78, %c0_79, %c0_80, %c0_81], %158 {strides = array<i32>} : memref<1x2x16x16xf32, #tpu.memory_space<vmem>>, vector<1x2x16x16xf32>,
    } else {
    }
    return
  }
  func.func @transform_0(%arg0: i32, %arg1: i32, %arg2: i32) -> (i32, i32, i32, i32) {
    %c0_i32 = arith.constant 0 : i32
    %c0_i32_0 = arith.constant 0 : i32
    %c0_i32_1 = arith.constant 0 : i32
    return %arg0, %arg1, %c0_i32, %c0_i32_0 : i32, i32, i32, i32
  }
  func.func @transform_1(%arg0: i32, %arg1: i32, %arg2: i32) -> (i32, i32, i32, i32) {
    %c0_i32 = arith.constant 0 : i32
    %c0_i32_0 = arith.constant 0 : i32
    %c0_i32_1 = arith.constant 0 : i32
    return %arg0, %arg1, %c0_i32, %c0_i32_0 : i32, i32, i32, i32
  }
  func.func @transform_2(%arg0: i32, %arg1: i32, %arg2: i32) -> (i32, i32, i32, i32) {
    %c0_i32 = arith.constant 0 : i32
    %c0_i32_0 = arith.constant 0 : i32
    %c0_i32_1 = arith.constant 0 : i32
    return %arg0, %arg1, %c0_i32, %c0_i32_0 : i32, i32, i32, i32
  }
  func.func @transform_3(%arg0: i32, %arg1: i32, %arg2: i32) -> (i32, i32, i32, i32) {
    %c0_i32 = arith.constant 0 : i32
    %c0_i32_0 = arith.constant 0 : i32
    %c0_i32_1 = arith.constant 0 : i32
    return %arg0, %arg2, %c0_i32, %c0_i32_0 : i32, i32, i32, i32
  }
  func.func @transform_4(%arg0: i32, %arg1: i32, %arg2: i32) -> (i32, i32, i32, i32) {
    %c0_i32 = arith.constant 0 : i32
    %c0_i32_0 = arith.constant 0 : i32
    %c0_i32_1 = arith.constant 0 : i32
    return %arg0, %arg2, %c0_i32, %c0_i32_0 : i32, i32, i32, i32
  }
  func.func @transform_5(%arg0: i32, %arg1: i32, %arg2: i32) -> (i32, i32, i32) {
    %c0_i32 = arith.constant 0 : i32
    %c0_i32_0 = arith.constant 0 : i32
    %c0_i32_1 = arith.constant 0 : i32
    %c0_i32_2 = arith.constant 0 : i32
    return %c0_i32, %c0_i32_0, %c0_i32_1 : i32, i32, i32
  }
  func.func @transform_6(%arg0: i32, %arg1: i32, %arg2: i32) -> (i32, i32, i32) {
    %c0_i32 = arith.constant 0 : i32
    %c0_i32_0 = arith.constant 0 : i32
    %c0_i32_1 = arith.constant 0 : i32
    %c0_i32_2 = arith.constant 0 : i32
    return %c0_i32, %c0_i32_0, %c0_i32_1 : i32, i32, i32
  }
  func.func @transform_7(%arg0: i32, %arg1: i32, %arg2: i32) -> (i32, i32, i32, i32) {
    %c0_i32 = arith.constant 0 : i32
    %c0_i32_0 = arith.constant 0 : i32
    %c0_i32_1 = arith.constant 0 : i32
    return %arg0, %arg1, %c0_i32, %c0_i32_0 : i32, i32, i32, i32
  }
  func.func @transform_8(%arg0: i32, %arg1: i32, %arg2: i32) -> (i32, i32, i32, i32) {
    %c0_i32 = arith.constant 0 : i32
    %c0_i32_0 = arith.constant 0 : i32
    %c0_i32_1 = arith.constant 0 : i32
    return %arg0, %arg1, %c0_i32, %c0_i32_0 : i32, i32, i32, i32
  }
}

</mosaic_0001>

<bundles_post_ra>
// kernel: custom-call.6
= control target key start
LH: loop header
LB: loop body
LE: loop exit
PB: predicated region body
PF: predicated region fallthrough
CT: control target
= control target key end

     0   :  { %s6_s0 = inlined_call_operand.vmem [shape: f32[2,2,16,16], index: 0, kind: output, shape index: {}]  }

// kernel: custom-call.3
= control target key start
LH: loop header
LB: loop body
LE: loop exit
PB: predicated region body
PF: predicated region fallthrough
CT: control target
= control target key end

     0   :  { %s56_s0 = inlined_call_operand.hbm [shape: c64[2,1,1,4,1,16,16], index: 0, kind: input, shape index: {}]   ;;  %s57_s1 = inlined_call_operand.vmem [shape: f32[2,1,1,4,1,16,16], index: 1, kind: output, shape index: {}]  }
   0x1   :  { %s2_s8 = scalar_lea.hbm %s56_s0, 128 }
   0x2   :  { %3 = vsyncpa [#allocation0], 0  ;;  %s5_s9 = sshll.u32 %s2_s8, 4  ;;  %s7_s12 = sshll.u32 %s57_s1, 4  ;;  %s6_s9 = int_to_ptr.hbm [resolvable:$true] %s5_s9  ;;  %s8_s12 = int_to_ptr.vmem [resolvable:$true] %s7_s12 }
   0x3   :  { %10 = dma.hbm_to_vmem [thread:$0]  %s6_s9, 2048, %s8_s12, [#allocation0] }
   0x4   :  { %38 = dma.done.wait [#allocation0], 2048  }
   0x5   :  { %39 = vsyncadd [#allocation0], 4294965248 }
   0x6   :  { %13 = vsyncpa [#allocation0], 1 }

// kernel: custom-call.2
= control target key start
LH: loop header
LB: loop body
LE: loop exit
PB: predicated region body
PF: predicated region fallthrough
CT: control target
= control target key end

     0   :  { %2 = vsyncpa [#allocation0], 0  ;;  %s55_s0 = inlined_call_operand.hbm [shape: c64[2,1,1,4,1,16,16], index: 0, kind: input, shape index: {}]   ;;  %s56_s1 = inlined_call_operand.vmem [shape: f32[2,1,1,4,1,16,16], index: 1, kind: output, shape index: {}]  }
   0x1   :  { %s4_s8 = sshll.u32 %s55_s0, 4  ;;  %s6_s11 = sshll.u32 %s56_s1, 4  ;;  %s5_s8 = int_to_ptr.hbm [resolvable:$true] %s4_s8  ;;  %s7_s11 = int_to_ptr.vmem [resolvable:$true] %s6_s11 }
   0x2   :  { %9 = dma.hbm_to_vmem [thread:$0]  %s5_s8, 2048, %s7_s11, [#allocation0] }
   0x3   :  { %37 = dma.done.wait [#allocation0], 2048  }
   0x4   :  { %38 = vsyncadd [#allocation0], 4294965248 }
   0x5   :  { %12 = vsyncpa [#allocation0], 1 }

// kernel: custom-call.1
= control target key start
LH: loop header
LB: loop body
LE: loop exit
PB: predicated region body
PF: predicated region fallthrough
CT: control target
= control target key end

     0   :  { %s56_s0 = inlined_call_operand.hbm [shape: c64[2,2,1,4,1,16,16], index: 0, kind: input, shape index: {}]   ;;  %s57_s1 = inlined_call_operand.vmem [shape: f32[2,2,1,4,1,16,16], index: 1, kind: output, shape index: {}]  }
   0x1   :  { %s2_s8 = scalar_lea.hbm %s56_s0, 256 }
   0x2   :  { %3 = vsyncpa [#allocation0], 0  ;;  %s5_s9 = sshll.u32 %s2_s8, 4  ;;  %s7_s12 = sshll.u32 %s57_s1, 4  ;;  %s6_s9 = int_to_ptr.hbm [resolvable:$true] %s5_s9  ;;  %s8_s12 = int_to_ptr.vmem [resolvable:$true] %s7_s12 }
   0x3   :  { %10 = dma.hbm_to_vmem [thread:$0]  %s6_s9, 4096, %s8_s12, [#allocation0] }
   0x4   :  { %38 = dma.done.wait [#allocation0], 4096  }
   0x5   :  { %39 = vsyncadd [#allocation0], 4294963200 }
   0x6   :  { %13 = vsyncpa [#allocation0], 1 }

// kernel: custom-call
= control target key start
LH: loop header
LB: loop body
LE: loop exit
PB: predicated region body
PF: predicated region fallthrough
CT: control target
= control target key end

     0   :  { %2 = vsyncpa [#allocation0], 0  ;;  %s55_s0 = inlined_call_operand.hbm [shape: c64[2,2,1,4,1,16,16], index: 0, kind: input, shape index: {}]   ;;  %s56_s1 = inlined_call_operand.vmem [shape: f32[2,2,1,4,1,16,16], index: 1, kind: output, shape index: {}]  }
   0x1   :  { %s4_s8 = sshll.u32 %s55_s0, 4  ;;  %s6_s11 = sshll.u32 %s56_s1, 4  ;;  %s5_s8 = int_to_ptr.hbm [resolvable:$true] %s4_s8  ;;  %s7_s11 = int_to_ptr.vmem [resolvable:$true] %s6_s11 }
   0x2   :  { %9 = dma.hbm_to_vmem [thread:$0]  %s5_s8, 4096, %s7_s11, [#allocation0] }
   0x3   :  { %37 = dma.done.wait [#allocation0], 4096  }
   0x4   :  { %38 = vsyncadd [#allocation0], 4294963200 }
   0x5   :  { %12 = vsyncpa [#allocation0], 1 }

// kernel: custom-call.4
= control target key start
LH: loop header
LB: loop body
LE: loop exit
PB: predicated region body
PF: predicated region fallthrough
CT: control target
= control target key end

     0   :  { %s105_s0 = inlined_call_operand.vmem [shape: f32[2,2,1,1,1,16,16], index: 0, kind: input, shape index: {}]   ;;  %s106_s1 = inlined_call_operand.vmem [shape: f32[2,2,1,1,1,16,16], index: 1, kind: input, shape index: {}]   ;;  %s107_s2 = inlined_call_operand.hbm [shape: c64[2,2,1,1,1,16,16], index: 2, kind: output, shape index: {}]  }
   0x1   :  { %s3_s11 = scalar_lea.hbm %s107_s2, 64 }
   0x2   :  { %4 = vsyncpa [#allocation0], 0  ;;  %s6_s14 = sshll.u32 %s105_s0, 4  ;;  %s8_s17 = sshll.u32 %s107_s2, 4  ;;  %s7_s14 = int_to_ptr.vmem [resolvable:$true] %s6_s14  ;;  %s9_s17 = int_to_ptr.hbm [resolvable:$true] %s8_s17 }
   0x3   :  { %11 = dma.vmem_to_hbm [thread:$0]  %s7_s14, 1024, %s9_s17, [#allocation0] }
   0x4   :  { %74 = dma.done.wait [#allocation0], 1024  }
   0x5   :  { %75 = vsyncadd [#allocation0], 4294966272 }
   0x6   :  { %14 = vsyncpa [#allocation0], 1 }
   0x7   :  { %15 = vsyncpa [#allocation1], 0  ;;  %s17_s20 = sshll.u32 %s106_s1, 4  ;;  %s19_s21 = sshll.u32 %s3_s11, 4  ;;  %s18_s20 = int_to_ptr.vmem [resolvable:$true] %s17_s20  ;;  %s20_s21 = int_to_ptr.hbm [resolvable:$true] %s19_s21 }
   0x8   :  { %22 = dma.vmem_to_hbm [thread:$0]  %s18_s20, 1024, %s20_s21, [#allocation1] }
   0x9   :  { %76 = dma.done.wait [#allocation1], 1024  }
   0xa   :  { %77 = vsyncadd [#allocation1], 4294966272 }
   0xb   :  { %25 = vsyncpa [#allocation1], 1 }

// kernel: _solve_impl.1
= control target key start
LH: loop header
LB: loop body
LE: loop exit
PB: predicated region body
PF: predicated region fallthrough
CT: control target
= control target key end

     0   :  { %s2279_s27 = smov 0   ;;  %s2281_s28 = smov 0   ;;  %s3049_s0 = inlined_call_operand.vmem [shape: f32[2,2,4,16,16], index: 0, kind: input, shape index: {}]   ;;  %s3050_s1 = inlined_call_operand.vmem [shape: f32[2,2,4,16,16], index: 1, kind: input, shape index: {}]   ;;  %s3051_s2 = inlined_call_operand.vmem [shape: f32[2,2,16,16], index: 2, kind: input, shape index: {}]   ;;  %s3052_s3 = inlined_call_operand.vmem [shape: f32[2,4,16,16], index: 3, kind: input, shape index: {}]   ;;  %s3053_s4 = inlined_call_operand.vmem [shape: f32[2,4,16,16], index: 4, kind: input, shape index: {}]   ;;  %s3054_s5 = inlined_call_operand.vmem [shape: bf16[6,16,16], index: 5, kind: input, shape index: {}]   ;;  %s3055_s6 = inlined_call_operand.vmem [shape: bf16[6,16,16], index: 6, kind: input, shape index: {}]   ;;  %s3056_s7 = inlined_call_operand.vmem [shape: f32[2,2,16,16], index: 7, kind: output, shape index: {0}]   ;;  %s3057_s8 = inlined_call_operand.vmem [shape: f32[2,2,16,16], index: 8, kind: output, shape index: {1}]  }
   0x1   :  { %s2283_s29 = smov 0  }
   0x2 LB: > { %s38_s30 = sadd.s32 1, %s2228_s28  ;;  %p2069_p0 = scmp.ge.s32.totalorder %s2232_s29, 1  ;;  %s2232_s29 = sphi %s2283_s29, %s19_s29   ;;  %s2228_s28 = sphi %s2281_s28, %s3059_s28   ;;  %s2224_s27 = sphi %s2279_s27, %s3058_s27  }
   0x3   : > { %p40_p1 = scmp.ge.s32.totalorder %s38_s30, 2  ;;  %p384_p2 = scmp.lt.s32.totalorder %s2232_s29, 3 }
   0x5   : > { %s3061_s30 = smov (%p40_p1, %s38_s30), 0  ;;  %p385_p3 = pnand %p2069_p0, %p384_p2 }
   0x6   : > { %p490_p4 = scmp.lt.s32.totalorder (!%p385_p3), %s2224_s27, 1 }
   0x7   : > { %388 = sbr.rel (%p385_p3) target bundleno = 471 (0x1d7), region = 48 }
   0xc   : > { %s3063_s27 = smov (!%p490_p4, %s2224_s27), 1  ;;  %v2347_v27 = vld [vmem:[%s3054_s5 + $0x18] sm:$0xff]  ;;  %vm707_vm0 = vcmask 130048  }
   0xd   : > { %s2170_s9 = sshll.u32 %s3063_s27, 7  ;;  %s2301_s10 = sshll.u32 %s3063_s27, 5 }
   0xe   : > { %s2306_s13 = scalar_lea.vmem %s3049_s0, %s2170_s9  ;;  %s2312_s16 = scalar_lea.vmem %s3051_s2, %s2301_s10 }
   0xf   : > { %v578_v0 = vld [vmem:[%s2306_s13] sm:$0xff]  ;;  %v579_v1 = vld [vmem:[%s2306_s13 + $0x8] sm:$0xff]  ;;  %v580_v6 = vld [vmem:[%s2306_s13 + $0x10] sm:$0xff]  ;;  %s2332_s19 = scalar_lea.vmem %s3050_s1, %s2170_s9  ;;  %s2173_s15 = sshll.u32 %s3063_s27, 6 }
  0x10   : > { %v2317_v2 = vld [vmem:[%s2312_s16] sm:$0xff]  ;;  %v2320_v3 = vld [vmem:[%s2312_s16 + $0x8] sm:$0xff]  ;;  %v581_v7 = vld [vmem:[%s2306_s13 + $0x18] sm:$0xff]  ;;  %s2807_s18 = scalar_lea.vmem %s3052_s3, %s2173_s15  ;;  %s2812_s21 = scalar_lea.vmem %s3053_s4, %s2173_s15 }
  0x11   : > { %v648_v4 = vmul.f32 %v2317_v2, %v578_v0  ;;  %v649_v5 = vmul.f32 %v2320_v3, %v579_v1  ;;  %v650_v8 = vmul.f32 %v2317_v2, %v580_v6  ;;  %v651_v9 = vmul.f32 %v2320_v3, %v581_v7  ;;  %v582_v14 = vld [vmem:[%s2306_s13 + $0x20] sm:$0xff]  ;;  %v583_v17 = vld [vmem:[%s2306_s13 + $0x28] sm:$0xff]  ;;  %v584_v20 = vld [vmem:[%s2306_s13 + $0x30] sm:$0xff]  ;;  %s2923_s23 = scalar_lea.vmem %s3056_s7, %s2301_s10  ;;  %s2932_s26 = scalar_lea.vmem %s3057_s8, %s2301_s10 }
  0x12   : > { %v2337_v22 = vmul.f32 %v2317_v2, %v582_v14  ;;  %v585_v23 = vld [vmem:[%s2306_s13 + $0x38] sm:$0xff]  ;;  %v594_v24 = vld [vmem:[%s2332_s19] sm:$0xff]  ;;  %v2342_v26 = vmul.f32 %v2320_v3, %v583_v17  ;;  %v595_v28 = vld [vmem:[%s2332_s19 + $0x8] sm:$0xff]  ;;  %v2353_v30 = vmul.f32 %v2317_v2, %v584_v20 }
  0x13   : > { %v680_v10 = vpack.c.bf16 %v648_v4, %v648_v4  ;;  %v681_v11 = vpack.c.bf16 %v649_v5, %v649_v5  ;;  %v682_v12 = vpack.c.bf16 %v650_v8, %v650_v8  ;;  %v683_v13 = vpack.c.bf16 %v651_v9, %v651_v9  ;;  %v596_v31 = vld [vmem:[%s2332_s19 + $0x10] sm:$0xff]  ;;  %v586_v34 = vld [vmem:[%s2306_s13 + $0x40] sm:$0xff]  ;;  %v597_v39 = vld [vmem:[%s2332_s19 + $0x18] sm:$0xff] }
  0x14   : > { %v684_v29 = vpack.c.bf16 %v2337_v22, %v2337_v22  ;;  %v685_v32 = vpack.c.bf16 %v2342_v26, %v2342_v26  ;;  %v2359_v33 = vmul.f32 %v2320_v3, %v585_v23  ;;  %v2363_v35 = vld [vmem:[%s2312_s16 + $0x10] sm:$0xff]  ;;  %v2366_v36 = vmul.f32 %v2317_v2, %v594_v24  ;;  %v587_v43 = vld [vmem:[%s2306_s13 + $0x48] sm:$0xff]  ;;  %v2380_v44 = vld [vmem:[%s2312_s16 + $0x18] sm:$0xff] }
  0x15   : > { %v703_v15 = vunpack.c.l.b16 %v680_v10  ;;  %v704_v16 = vunpack.c.l.b16 %v681_v11  ;;  %v727_v18 = vunpack.c.l.b16 %v682_v12  ;;  %v728_v19 = vunpack.c.l.b16 %v683_v13  ;;  %v588_v52 = vld [vmem:[%s2306_s13 + $0x50] sm:$0xff]  ;;  %v589_v56 = vld [vmem:[%s2306_s13 + $0x58] sm:$0xff]  ;;  %v590_v1 = vld [vmem:[%s2306_s13 + $0x60] sm:$0xff] }
  0x16   : > { %v747_v37 = vunpack.c.l.b16 %v684_v29  ;;  %v2369_v38 = vmul.f32 %v2320_v3, %v595_v28  ;;  %v748_v40 = vunpack.c.l.b16 %v685_v32  ;;  %v686_v41 = vpack.c.bf16 %v2353_v30, %v2353_v30  ;;  %v591_v10 = vld [vmem:[%s2306_s13 + $0x68] sm:$0xff]  ;;  %v593_v28 = vld [vmem:[%s2306_s13 + $0x78] sm:$0xff] }
  0x17   : > { %v705_v21 = vpack.c.b16 %v704_v16, %v703_v15  ;;  %v729_v25 = vpack.c.b16 %v728_v19, %v727_v18  ;;  %v687_v42 = vpack.c.bf16 %v2359_v33, %v2359_v33  ;;  %v1049_v45 = vadd.f32 %v2366_v36, %v648_v4  ;;  %v599_v12 = vld [vmem:[%s2332_s19 + $0x28] sm:$0xff]  ;;  %v592_v16 = vld [vmem:[%s2306_s13 + $0x70] sm:$0xff]  ;;  %v601_v19 = vld [vmem:[%s2332_s19 + $0x38] sm:$0xff] }
  0x18   : > { %v2384_v46 = vmul.f32 %v2317_v2, %v596_v31  ;;  %v2389_v47 = vmul.f32 %v2363_v35, %v586_v34  ;;  %v1050_v48 = vadd.f32 %v2369_v38, %v649_v5  ;;  %v749_v49 = vpack.c.b16 %v748_v40, %v747_v37  ;;  %v600_v18 = vld [vmem:[%s2332_s19 + $0x30] sm:$0xff] }
  0x19   : > { %718 = vmatpush.bf16.msra.mxu0 %v705_v21  ;;  %738 = vmatpush.bf16.msra.mxu1 %v729_v25  ;;  %v767_v50 = vunpack.c.l.b16 %v686_v41  ;;  %v768_v51 = vunpack.c.l.b16 %v687_v42  ;;  %v2394_v53 = vmul.f32 %v2320_v3, %v597_v39  ;;  %v2398_v55 = vmul.f32 %v2380_v44, %v587_v43  ;;  %v602_v41 = vld [vmem:[%s2332_s19 + $0x40] sm:$0xff]  ;;  %v603_v42 = vld [vmem:[%s2332_s19 + $0x48] sm:$0xff] }
  0x1a   : > { %v1051_v54 = vadd.f32 %v2384_v46, %v650_v8  ;;  %758 = vmatpush.bf16.msra.mxu2 %v749_v49  ;;  %v688_v59 = vpack.c.bf16 %v2389_v47, %v2389_v47  ;;  %v2407_v61 = vmul.f32 %v2363_v35, %v588_v52  ;;  %v1065_v62 = vpack.c.bf16 %v1049_v45, %v1049_v45  ;;  %v598_v8 = vld [vmem:[%s2332_s19 + $0x20] sm:$0xff]  ;;  %v604_v49 = vld [vmem:[%s2332_s19 + $0x50] sm:$0xff] }
  0x1b   : > { %v769_v57 = vpack.c.b16 %v768_v51, %v767_v50  ;;  %v1052_v58 = vadd.f32 %v2394_v53, %v651_v9  ;;  %v689_v60 = vpack.c.bf16 %v2398_v55, %v2398_v55  ;;  %v1066_v63 = vpack.c.bf16 %v1050_v48, %v1050_v48  ;;  %v605_v50 = vld [vmem:[%s2332_s19 + $0x58] sm:$0xff] }
  0x1c   : > { %2100 = vmatmul.msk.bf16.vlgmr.msra.gmra.mxu0 %vm707_vm0, %v2347_v27  ;;  %2101 = vmatmul.msk.bf16.vlgmr.msra.gmra.mxu1 %vm707_vm0, %v2347_v27  ;;  %v2410_v0 = vmul.f32 %v2380_v44, %v589_v56  ;;  %v1067_v4 = vpack.c.bf16 %v1051_v54, %v1051_v54  ;;  %v787_v5 = vunpack.c.l.b16 %v688_v59  ;;  %v690_v7 = vpack.c.bf16 %v2407_v61, %v2407_v61  ;;  %v607_v54 = vld [vmem:[%s2332_s19 + $0x68] sm:$0xff] }
  0x1d   : > { %778 = vmatpush.bf16.msra.mxu3 %v769_v57  ;;  %2102 = vmatmul.msk.bf16.vlgmr.msra.gmra.mxu2 %vm707_vm0, %v2347_v27  ;;  %v788_v6 = vunpack.c.l.b16 %v689_v60  ;;  %v1068_v11 = vpack.c.bf16 %v1052_v58, %v1052_v58  ;;  %v2425_v15 = vmul.f32 %v2363_v35, %v590_v1  ;;  %v2428_v17 = vunpack.c.l.b16 %v1065_v62  ;;  %v609_v1 = vld [vmem:[%s2332_s19 + $0x78] sm:$0xff] }
  0x1e   : > { %v691_v9 = vpack.c.bf16 %v2410_v0, %v2410_v0  ;;  %v807_v14 = vunpack.c.l.b16 %v690_v7  ;;  %v2432_v21 = vunpack.c.l.b16 %v1066_v63  ;;  %v2434_v23 = vunpack.c.l.b16 %v1067_v4  ;;  %v608_v63 = vld [vmem:[%s2332_s19 + $0x70] sm:$0xff] }
  0x1f   : > { %v789_v13 = vpack.c.b16 %v788_v6, %v787_v5  ;;  %v668_v24 = vmul.f32 %v2317_v2, %v598_v8  ;;  %v2438_v25 = vmul.f32 %v2380_v44, %v591_v10  ;;  %v669_v29 = vmul.f32 %v2320_v3, %v599_v12 }
  0x20   : > { %2103 = vmatmul.msk.bf16.vlgmr.msra.gmra.mxu3 %vm707_vm0, %v2347_v27  ;;  %v808_v20 = vunpack.c.l.b16 %v691_v9  ;;  %v692_v32 = vpack.c.bf16 %v2425_v15, %v2425_v15  ;;  %v2445_v34 = vmul.f32 %v2363_v35, %v592_v16  ;;  %v2447_v37 = vunpack.c.l.b16 %v1068_v11 }
  0x21   : > { %798 = vmatpush.bf16.msrb.mxu0 %v789_v13  ;;  %v670_v39 = vmul.f32 %v2317_v2, %v600_v18  ;;  %v671_v40 = vmul.f32 %v2320_v3, %v601_v19  ;;  %v693_v43 = vpack.c.bf16 %v2438_v25, %v2438_v25  ;;  %v2456_v45 = vadd.f32 %v668_v24, %v2337_v22  ;;  %v606_v22 = vld [vmem:[%s2332_s19 + $0x60] sm:$0xff] }
  0x22   : > { %v809_v31 = vpack.c.b16 %v808_v20, %v807_v14  ;;  %v2459_v48 = vadd.f32 %v669_v29, %v2342_v26  ;;  %v827_v51 = vunpack.c.l.b16 %v692_v32  ;;  %v2464_v2 = vmul.f32 %v2380_v44, %v593_v28 }
  0x23   : > { %v2467_v3 = vadd.f32 %v670_v39, %v2353_v30  ;;  %v2470_v52 = vadd.f32 %v671_v40, %v2359_v33  ;;  %v828_v56 = vunpack.c.l.b16 %v693_v43  ;;  %v694_v26 = vpack.c.bf16 %v2445_v34, %v2445_v34 }
  0x24   : > { %818 = vmatpush.bf16.msrb.mxu1 %v809_v31  ;;  %v2477_v57 = vmul.f32 %v2363_v35, %v602_v41  ;;  %v2480_v58 = vmul.f32 %v2380_v44, %v603_v42  ;;  %v695_v59 = vpack.c.bf16 %v2464_v2, %v2464_v2  ;;  %v865_v30 = vpack.c.bf16 %v2366_v36, %v2366_v36 }
  0x25   : > { %v2489_v33 = vmul.f32 %v2363_v35, %v604_v49  ;;  %v2492_v60 = vmul.f32 %v2380_v44, %v605_v50  ;;  %v829_v62 = vpack.c.b16 %v828_v56, %v827_v51  ;;  %v847_v4 = vunpack.c.l.b16 %v694_v26 }
  0x26   : > { %v2499_v5 = vmul.f32 %v2363_v35, %v606_v22  ;;  %v2502_v6 = vmul.f32 %v2380_v44, %v607_v54  ;;  %v848_v36 = vunpack.c.l.b16 %v695_v59  ;;  %v866_v7 = vpack.c.bf16 %v2369_v38, %v2369_v38 }
  0x27   : > { %838 = vmatpush.bf16.msrb.mxu2 %v829_v62  ;;  %v888_v8 = vunpack.c.l.b16 %v865_v30  ;;  %v867_v9 = vpack.c.bf16 %v2384_v46, %v2384_v46  ;;  %v868_v10 = vpack.c.bf16 %v2394_v53, %v2394_v53  ;;  %v869_v11 = vpack.c.bf16 %v668_v24, %v668_v24 }
  0x28   : > { %v2511_v12 = vmul.f32 %v2363_v35, %v608_v63  ;;  %v2514_v13 = vmul.f32 %v2380_v44, %v609_v1  ;;  %v849_v14 = vpack.c.b16 %v848_v36, %v847_v4  ;;  %v889_v16 = vunpack.c.l.b16 %v866_v7  ;;  %v2543_v63 = vld [vmem:[%s3054_s5 + $0x20] sm:$0xff] }
  0x29   : > { %v911_v18 = vunpack.c.l.b16 %v867_v9  ;;  %v912_v19 = vunpack.c.l.b16 %v868_v10  ;;  %v870_v38 = vpack.c.bf16 %v669_v29, %v669_v29  ;;  %v931_v20 = vunpack.c.l.b16 %v869_v11 }
  0x2a   : > { %858 = vmatpush.bf16.msrb.mxu3 %v849_v14  ;;  %v890_v28 = vpack.c.b16 %v889_v16, %v888_v8  ;;  %v871_v31 = vpack.c.bf16 %v670_v39, %v670_v39  ;;  %v872_v46 = vpack.c.bf16 %v671_v40, %v671_v40  ;;  %v873_v53 = vpack.c.bf16 %v2477_v57, %v2477_v57 }
  0x2b   : > { %v913_v35 = vpack.c.b16 %v912_v19, %v911_v18  ;;  %v932_v24 = vunpack.c.l.b16 %v870_v38  ;;  %v874_v44 = vpack.c.bf16 %v2480_v58, %v2480_v58  ;;  %v875_v32 = vpack.c.bf16 %v2489_v33, %v2489_v33 }
  0x2c   : > { %2104 = vmatmul.msk.bf16.vlgmr.msrb.gmra.mxu0 %vm707_vm0, %v2347_v27  ;;  %2105 = vmatmul.msk.bf16.vlgmr.msrb.gmra.mxu1 %vm707_vm0, %v2347_v27  ;;  %v951_v29 = vunpack.c.l.b16 %v871_v31  ;;  %v952_v41 = vunpack.c.l.b16 %v872_v46  ;;  %v971_v42 = vunpack.c.l.b16 %v873_v53  ;;  %v876_v39 = vpack.c.bf16 %v2492_v60, %v2492_v60 }
  0x2d   : > { %2106 = vmatmul.msk.bf16.vlgmr.msrb.gmra.mxu2 %vm707_vm0, %v2347_v27  ;;  %902 = vmatpush.bf16.msra.mxu0 %v890_v28  ;;  %v933_v40 = vpack.c.b16 %v932_v24, %v931_v20  ;;  %v972_v43 = vunpack.c.l.b16 %v874_v44  ;;  %v991_v49 = vunpack.c.l.b16 %v875_v32  ;;  %v877_v50 = vpack.c.bf16 %v2499_v5, %v2499_v5  ;;  %v2179_v44 = vld [vmem:[%s3054_s5 + $0x28] sm:$0xff] }
  0x2e   : > { %922 = vmatpush.bf16.msra.mxu1 %v913_v35  ;;  %v953_v51 = vpack.c.b16 %v952_v41, %v951_v29  ;;  %v992_v22 = vunpack.c.l.b16 %v876_v39  ;;  %v878_v54 = vpack.c.bf16 %v2502_v6, %v2502_v6  ;;  %v879_v56 = vpack.c.bf16 %v2511_v12, %v2511_v12 }
  0x2f   : > { %v1069_v26 = vpack.c.bf16 %v2456_v45, %v2456_v45  ;;  %942 = vmatpush.bf16.msra.mxu2 %v933_v40  ;;  %v1011_v59 = vunpack.c.l.b16 %v877_v50  ;;  %v880_v30 = vpack.c.bf16 %v2514_v13, %v2514_v13  ;;  %v1070_v62 = vpack.c.bf16 %v2459_v48, %v2459_v48 }
  0x30   : > { %2107 = vmatmul.msk.bf16.vlgmr.msrb.gmra.mxu3 %vm707_vm0, %v2347_v27  ;;  %v973_v27 = vpack.c.b16 %v972_v43, %v971_v42  ;;  %v993_v1 = vpack.c.b16 %v992_v22, %v991_v49  ;;  %v1012_v4 = vunpack.c.l.b16 %v878_v54  ;;  %v1031_v36 = vunpack.c.l.b16 %v879_v56  ;;  %v2180_v49 = vld [vmem:[%s3055_s6 + $0x18] sm:$0xff] }
  0x31   : > { %962 = vmatpush.bf16.msra.mxu3 %v953_v51  ;;  %v1071_v45 = vpack.c.bf16 %v2467_v3, %v2467_v3  ;;  %v1032_v7 = vunpack.c.l.b16 %v880_v30  ;;  %v1072_v8 = vpack.c.bf16 %v2470_v52, %v2470_v52  ;;  %v1090_v48 = vpack.c.b16 %v2432_v21, %v2428_v17 }
  0x32   : > { %982 = vmatpush.bf16.msrb.mxu0 %v973_v27  ;;  %1002 = vmatpush.bf16.msrb.mxu1 %v993_v1  ;;  %v1013_v9 = vpack.c.b16 %v1012_v4, %v1011_v59  ;;  %v1113_v10 = vpack.c.b16 %v2447_v37, %v2434_v23  ;;  %v1131_v14 = vunpack.c.l.b16 %v1069_v26  ;;  %v1132_v16 = vunpack.c.l.b16 %v1070_v62 }
  0x33   : > { %v1033_v11 = vpack.c.b16 %v1032_v7, %v1031_v36  ;;  %v1057_v3 = vadd.f32 %v2477_v57, %v2389_v47  ;;  %v1058_v52 = vadd.f32 %v2480_v58, %v2398_v55  ;;  %v1151_v17 = vunpack.c.l.b16 %v1071_v45  ;;  %v2182_v7 = vld [vmem:[%s3055_s6 + $0x28] sm:$0xff] }
  0x34   : > { %1022 = vmatpush.bf16.msrb.mxu2 %v1013_v9  ;;  %v1152_v21 = vunpack.c.l.b16 %v1072_v8  ;;  %v1059_v23 = vadd.f32 %v2489_v33, %v2407_v61  ;;  %v1060_v37 = vadd.f32 %v2492_v60, %v2410_v0  ;;  %v1133_v18 = vpack.c.b16 %v1132_v16, %v1131_v14  ;;  %v2181_v14 = vld [vmem:[%s3055_s6 + $0x20] sm:$0xff] }
  0x35   : > { %1042 = vmatpush.bf16.msrb.mxu3 %v1033_v11  ;;  %v1073_v19 = vpack.c.bf16 %v1057_v3, %v1057_v3  ;;  %v1074_v47 = vpack.c.bf16 %v1058_v52, %v1058_v52  ;;  %v1061_v58 = vadd.f32 %v2499_v5, %v2425_v15  ;;  %v1062_v61 = vadd.f32 %v2502_v6, %v2438_v25 }
  0x36   : > { %v1075_v57 = vpack.c.bf16 %v1059_v23, %v1059_v23  ;;  %v1076_v38 = vpack.c.bf16 %v1060_v37, %v1060_v37  ;;  %v1153_v55 = vpack.c.b16 %v1152_v21, %v1151_v17  ;;  %v1063_v28 = vadd.f32 %v2511_v12, %v2445_v34 }
  0x37   : > { %v1171_v33 = vunpack.c.l.b16 %v1073_v19  ;;  %v1172_v0 = vunpack.c.l.b16 %v1074_v47  ;;  %v1064_v31 = vadd.f32 %v2514_v13, %v2464_v2  ;;  %v1077_v46 = vpack.c.bf16 %v1061_v58, %v1061_v58 }
  0x38   : > { %v1191_v60 = vunpack.c.l.b16 %v1075_v57  ;;  %v1192_v20 = vunpack.c.l.b16 %v1076_v38  ;;  %v1078_v15 = vpack.c.bf16 %v1062_v61, %v1062_v61  ;;  %v1079_v53 = vpack.c.bf16 %v1063_v28, %v1063_v28 }
  0x39   : > { %v1173_v5 = vpack.c.b16 %v1172_v0, %v1171_v33  ;;  %v1080_v25 = vpack.c.bf16 %v1064_v31, %v1064_v31  ;;  %v1211_v35 = vunpack.c.l.b16 %v1077_v46 }
  0x3a   : > { %v1193_v6 = vpack.c.b16 %v1192_v20, %v1191_v60  ;;  %v1212_v24 = vunpack.c.l.b16 %v1078_v15  ;;  %v1231_v34 = vunpack.c.l.b16 %v1079_v53 }
  0x3b   : > { %v1232_v12 = vunpack.c.l.b16 %v1080_v25 }
  0x3c   : > { %2112 = vmatmul.msk.bf16.vlgmr.msra.gmra.mxu0 %vm707_vm0, %v2543_v63  ;;  %2113 = vmatmul.msk.bf16.vlgmr.msra.gmra.mxu1 %vm707_vm0, %v2543_v63  ;;  %v1213_v2 = vpack.c.b16 %v1212_v24, %v1211_v35 }
  0x3d   : > { %1102 = vmatpush.bf16.msra.mxu0 %v1090_v48  ;;  %1122 = vmatpush.bf16.msra.mxu1 %v1113_v10  ;;  %v1233_v13 = vpack.c.b16 %v1232_v12, %v1231_v34 }
  0x3e   : > { %2114 = vmatmul.msk.bf16.vlgmr.msra.gmra.mxu2 %vm707_vm0, %v2543_v63 }
  0x3f   : > { %1142 = vmatpush.bf16.msra.mxu2 %v1133_v18 }
  0x40   : > { %2115 = vmatmul.msk.bf16.vlgmr.msra.gmra.mxu3 %vm707_vm0, %v2543_v63 }
  0x41   : > { %1162 = vmatpush.bf16.msra.mxu3 %v1153_v55 }
  0x4c   : > { %2116 = vmatmul.msk.bf16.vlgmr.msrb.gmra.mxu0 %vm707_vm0, %v2543_v63  ;;  %2117 = vmatmul.msk.bf16.vlgmr.msrb.gmra.mxu1 %vm707_vm0, %v2543_v63 }
  0x4d   : > { %1182 = vmatpush.bf16.msrb.mxu0 %v1173_v5  ;;  %1202 = vmatpush.bf16.msrb.mxu1 %v1193_v6 }
  0x4e   : > { %2118 = vmatmul.msk.bf16.vlgmr.msrb.gmra.mxu2 %vm707_vm0, %v2543_v63 }
  0x4f   : > { %1222 = vmatpush.bf16.msrb.mxu2 %v1213_v2 }
  0x50   : > { %2119 = vmatmul.msk.bf16.vlgmr.msrb.gmra.mxu3 %vm707_vm0, %v2543_v63 }
  0x51   : > { %1242 = vmatpush.bf16.msrb.mxu3 %v1233_v13 }
  0x5c   : > { %2124 = vmatmul.msk.bf16.vlgmr.msra.gmra.mxu0 %vm707_vm0, %v2179_v44  ;;  %2125 = vmatmul.msk.bf16.vlgmr.msra.gmra.mxu1 %vm707_vm0, %v2179_v44 }
  0x5d   : > { %1342 = vmatpush.bf16.msra.mxu0 %v2180_v49  ;;  %1429 = vmatpush.bf16.msra.mxu1 %v2181_v14 }
  0x5e   : > { %2126 = vmatmul.msk.bf16.vlgmr.msra.gmra.mxu2 %vm707_vm0, %v2179_v44 }
  0x5f   : > { %1532 = vmatpush.bf16.msra.mxu2 %v2182_v7 }
  0x60   : > { %2127 = vmatmul.msk.bf16.vlgmr.msra.gmra.mxu3 %vm707_vm0, %v2179_v44 }
  0x61   : > { %2183 = vmatpush.bf16.msra.mxu3 %v2180_v49 }
  0x6c   : > { %2128 = vmatmul.msk.bf16.vlgmr.msrb.gmra.mxu0 %vm707_vm0, %v2179_v44  ;;  %2129 = vmatmul.msk.bf16.vlgmr.msrb.gmra.mxu1 %vm707_vm0, %v2179_v44 }
  0x6e   : > { %2130 = vmatmul.msk.bf16.vlgmr.msrb.gmra.mxu2 %vm707_vm0, %v2179_v44 }
  0x70   : > { %2131 = vmatmul.msk.bf16.vlgmr.msrb.gmra.mxu3 %vm707_vm0, %v2179_v44 }
  0x71   : > { %2184 = vmatpush.bf16.msrb.mxu3 %v2181_v14 }
  0x99   : > { %v2596_v32 = vpop.f32.mrf.mxu0  ;;  %v2598_v29 = vpop.f32.mrf.mxu1 }
  0xa0   : > { %v2604_v39 = vpop.f32.mrf.mxu2 }
  0xa1   : > { %v2600_v41 = vpop.f32.mrf.mxu0  ;;  %v2602_v42 = vpop.f32.mrf.mxu1 }
  0xa3   : > { %v2606_v40 = vpop.f32.mrf.mxu3 }
  0xa8   : > { %v2615_v51 = vpop.f32.mrf.mxu2 }
  0xa9   : > { %v2608_v43 = vpop.f32.mrf.mxu0  ;;  %v2613_v50 = vpop.f32.mrf.mxu1 }
  0xab   : > { %v2617_v22 = vpop.f32.mrf.mxu3 }
  0xb0   : > { %v2623_v26 = vpop.f32.mrf.mxu2 }
  0xb1   : > { %v2619_v54 = vpop.f32.mrf.mxu0  ;;  %v2621_v56 = vpop.f32.mrf.mxu1 }
  0xb3   : > { %v2625_v27 = vpop.f32.mrf.mxu3 }
  0xb8   : > { %v2627_v62 = vpop.f32.mrf.mxu2 }
  0xb9   : > { %v904_v59 = vpop.f32.mrf.mxu0  ;;  %v924_v30 = vpop.f32.mrf.mxu1 }
  0xba   : > { %v1249_v4 = vsub.f32 %v2596_v32, %v904_v59  ;;  %v1251_v21 = vsub.f32 %v2598_v29, %v924_v30 }
  0xbb   : > { %v2629_v63 = vpop.f32.mrf.mxu3 }
  0xc1   : > { %v906_v1 = vpop.f32.mrf.mxu0  ;;  %v926_v45 = vpop.f32.mrf.mxu1 }
  0xc2   : > { %v1250_v36 = vsub.f32 %v2600_v41, %v906_v1  ;;  %v2636_v9 = vpop.f32.mrf.mxu2  ;;  %v1252_v3 = vsub.f32 %v2602_v42, %v926_v45 }
  0xc3   : > { %v2639_v48 = vpop.f32.mrf.mxu3  ;;  %v1253_v6 = vsub.f32 %v2604_v39, %v2636_v9 }
  0xc4   : > { %v1297_v8 = vpack.c.bf16 %v1250_v36, %v1249_v4  ;;  %v1298_v57 = vpack.c.bf16 %v1252_v3, %v1251_v21 }
  0xc6   : > { %2136 = vmatmul.msk.bf16.vlgmr.msra.gmra.mxu0 %vm707_vm0, %v1297_v8 }
  0xc9   : > { %v984_v10 = vpop.f32.mrf.mxu0  ;;  %v2641_v11 = vpop.f32.mrf.mxu1 }
  0xca   : > { %v2646_v16 = vpop.f32.mrf.mxu2  ;;  %v2655_v23 = vsub.f32 %v2608_v43, %v984_v10  ;;  %v2665_v19 = vsub.f32 %v2613_v50, %v2641_v11 }
  0xcb   : > { %v2649_v52 = vpop.f32.mrf.mxu3  ;;  %v1254_v15 = vsub.f32 %v2615_v51, %v2646_v16 }
  0xcd   : > { %v1299_v13 = vpack.c.bf16 %v1254_v15, %v1253_v6 }
  0xd1   : > { %v2651_v17 = vpop.f32.mrf.mxu0  ;;  %v2661_v18 = vpop.f32.mrf.mxu1 }
  0xd2   : > { %v2659_v37 = vsub.f32 %v2619_v54, %v2651_v17  ;;  %v2669_v47 = vsub.f32 %v2621_v56, %v2661_v18  ;;  %v2675_v58 = vpop.f32.mrf.mxu2 }
  0xd3   : > { %v2678_v61 = vpop.f32.mrf.mxu3  ;;  %v2685_v28 = vsub.f32 %v2623_v26, %v2675_v58 }
  0xd4   : > { %v1301_v38 = vpack.c.bf16 %v2659_v37, %v2655_v23  ;;  %v1302_v55 = vpack.c.bf16 %v2669_v47, %v2665_v19 }
  0xd6   : > { %2137 = vmatmul.msk.bf16.gmra.mxu0 %vm707_vm0, %v1298_v57 }
  0xd9   : > { %v1104_v33 = vpop.f32.mrf.mxu0  ;;  %v1124_v0 = vpop.f32.mrf.mxu1 }
  0xda   : > { %v2680_v60 = vpop.f32.mrf.mxu2  ;;  %v1265_v20 = vsub.f32 %v1104_v33, %v2596_v32  ;;  %v1267_v46 = vsub.f32 %v1124_v0, %v2598_v29 }
  0xdb   : > { %v2689_v31 = vsub.f32 %v2627_v62, %v2680_v60  ;;  %v2694_v5 = vpop.f32.mrf.mxu3 }
  0xdc   : > { %v1281_v35 = vsub.f32 %v1265_v20, %v904_v59  ;;  %v2701_v12 = vsub.f32 %v1267_v46, %v924_v30 }
  0xdd   : > { %v1303_v53 = vpack.c.bf16 %v2689_v31, %v2685_v28 }
  0xde   : > { %v1471_v29 = vadd.f32 %v1281_v35, %v1249_v4  ;;  %v1473_v59 = vadd.f32 %v2701_v12, %v1251_v21  ;;  %v1264_v21 = vsub.f32 %v2629_v63, %v2694_v5 }
  0xdf   : > { %2142 = vmatmul.msk.bf16.vlgmr.msra.gmra.mxu3 %vm707_vm0, %v1303_v53 }
  0xe0   : > { %2185 = vmatpush.bf16.msra.mxu3 %v2182_v7 }
  0xe1   : > { %v1106_v25 = vpop.f32.mrf.mxu0  ;;  %v1126_v34 = vpop.f32.mrf.mxu1 }
  0xe2   : > { %v1266_v24 = vsub.f32 %v1106_v25, %v2600_v41  ;;  %v1268_v2 = vsub.f32 %v1126_v34, %v2602_v42  ;;  %v1144_v49 = vpop.f32.mrf.mxu2 }
  0xe3   : > { %v1164_v57 = vpop.f32.mrf.mxu3 }
  0xe4   : > { %v1282_v44 = vsub.f32 %v1266_v24, %v906_v1  ;;  %v1284_v32 = vsub.f32 %v1268_v2, %v926_v45  ;;  %v1269_v1 = vsub.f32 %v1144_v49, %v2604_v39  ;;  %v1271_v7 = vsub.f32 %v1164_v57, %v2606_v40 }
  0xe5   : > { %v1255_v2 = vsub.f32 %v2606_v40, %v2639_v48 }
  0xe6   : > { %v1384_v8 = vpack.c.bf16 %v1282_v44, %v1281_v35  ;;  %v1472_v14 = vadd.f32 %v1282_v44, %v1250_v36  ;;  %2138 = vmatmul.msk.bf16.gmra.mxu0 %vm707_vm0, %v1299_v13  ;;  %v1474_v41 = vadd.f32 %v1284_v32, %v1252_v3  ;;  %v1385_v30 = vpack.c.bf16 %v1284_v32, %v2701_v12 }
  0xe7   : > { %v1285_v46 = vsub.f32 %v1269_v1, %v2636_v9  ;;  %v1287_v25 = vsub.f32 %v1271_v7, %v2639_v48 }
  0xe8   : > { %v1487_v33 = vpack.c.bf16 %v1472_v14, %v1471_v29  ;;  %2148 = vmatmul.msk.bf16.vlgmr.msra.gmra.mxu1 %vm707_vm0, %v1384_v8  ;;  %v1488_v0 = vpack.c.bf16 %v1474_v41, %v1473_v59 }
  0xe9   : > { %v1184_v42 = vpop.f32.mrf.mxu0  ;;  %v1204_v45 = vpop.f32.mrf.mxu1 }
  0xea   : > { %v1273_v4 = vsub.f32 %v1184_v42, %v2608_v43  ;;  %2160 = vmatmul.msk.bf16.vlgmr.msra.gmra.mxu2 %vm707_vm0, %v1487_v33  ;;  %v1275_v36 = vsub.f32 %v1204_v45, %v2613_v50  ;;  %v1146_v39 = vpop.f32.mrf.mxu2  ;;  %v1263_v50 = vsub.f32 %v2625_v27, %v2678_v61 }
  0xeb   : > { %v1270_v53 = vsub.f32 %v1146_v39, %v2615_v51  ;;  %v1166_v9 = vpop.f32.mrf.mxu3  ;;  %v1475_v51 = vadd.f32 %v1285_v46, %v1253_v6 }
  0xec   : > { %v2714_v3 = vsub.f32 %v1273_v4, %v984_v10  ;;  %v2719_v20 = vsub.f32 %v1275_v36, %v2641_v11  ;;  %v1256_v11 = vsub.f32 %v2617_v22, %v2649_v52  ;;  %v1304_v35 = vpack.c.bf16 %v1264_v21, %v1263_v50 }
  0xed   : > { %v1286_v24 = vsub.f32 %v1270_v53, %v2646_v16  ;;  %v1272_v34 = vsub.f32 %v1166_v9, %v2617_v22  ;;  %v1477_v16 = vadd.f32 %v1287_v25, %v1255_v2 }
  0xee   : > { %v2724_v43 = vadd.f32 %v2714_v3, %v2655_v23  ;;  %v2731_v10 = vadd.f32 %v2719_v20, %v2665_v19  ;;  %v1300_v14 = vpack.c.bf16 %v1256_v11, %v1255_v2 }
  0xef   : > { %v1476_v32 = vadd.f32 %v1286_v24, %v1254_v15  ;;  %v1288_v29 = vsub.f32 %v1272_v34, %v2649_v52  ;;  %2143 = vmatmul.msk.bf16.gmra.mxu3 %vm707_vm0, %v1304_v35  ;;  %v1386_v8 = vpack.c.bf16 %v1286_v24, %v1285_v46 }
  0xf1   : > { %v1186_v12 = vpop.f32.mrf.mxu0  ;;  %v1206_v44 = vpop.f32.mrf.mxu1  ;;  %v1478_v59 = vadd.f32 %v1288_v29, %v1256_v11  ;;  %v1489_v40 = vpack.c.bf16 %v1476_v32, %v1475_v51  ;;  %v1387_v48 = vpack.c.bf16 %v1288_v29, %v1287_v25 }
  0xf2   : > { %v1274_v13 = vsub.f32 %v1186_v12, %v2619_v54  ;;  %v1276_v49 = vsub.f32 %v1206_v44, %v2621_v56  ;;  %v1224_v6 = vpop.f32.mrf.mxu2 }
  0xf3   : > { %v1277_v15 = vsub.f32 %v1224_v6, %v2623_v26  ;;  %v1490_v57 = vpack.c.bf16 %v1478_v59, %v1477_v16  ;;  %v2822_v16 = vld [vmem:[%s2812_s21] sm:$0xff] }
  0xf4   : > { %v1290_v22 = vsub.f32 %v1274_v13, %v2651_v17  ;;  %v1292_v41 = vsub.f32 %v1276_v49, %v2661_v18  ;;  %v1244_v17 = vpop.f32.mrf.mxu3 }
  0xf5   : > { %v1293_v42 = vsub.f32 %v1277_v15, %v2675_v58  ;;  %v1279_v1 = vsub.f32 %v1244_v17, %v2625_v27 }
  0xf6   : > { %v1480_v54 = vadd.f32 %v1290_v22, %v2659_v37  ;;  %2139 = vmatmul.msk.bf16.gmra.mxu0 %vm707_vm0, %v1300_v14  ;;  %v1388_v52 = vpack.c.bf16 %v1290_v22, %v2714_v3  ;;  %v1482_v56 = vadd.f32 %v1292_v41, %v2669_v47  ;;  %v1389_v33 = vpack.c.bf16 %v1292_v41, %v2719_v20  ;;  %v2819_v14 = vld [vmem:[%s2807_s18] sm:$0xff] }
  0xf7   : > { %v1483_v26 = vadd.f32 %v1293_v42, %v2685_v28  ;;  %v1295_v45 = vsub.f32 %v1279_v1, %v2678_v61 }
  0xf8   : > { %2149 = vmatmul.msk.bf16.gmra.mxu1 %vm707_vm0, %v1385_v30  ;;  %v1491_v18 = vpack.c.bf16 %v1480_v54, %v2724_v43  ;;  %v1492_v4 = vpack.c.bf16 %v1482_v56, %v2731_v10 }
  0xf9   : > { %v1485_v36 = vadd.f32 %v1295_v45, %v1263_v50 }
  0xfa   : > { %2161 = vmatmul.msk.bf16.gmra.mxu2 %vm707_vm0, %v1488_v0  ;;  %v1226_v7 = vpop.f32.mrf.mxu2 }
  0xfb   : > { %v1278_v3 = vsub.f32 %v1226_v7, %v2627_v62  ;;  %v2843_v7 = vld [vmem:[%s2812_s21 + $0x20] sm:$0xff] }
  0xfc   : > { %v1246_v20 = vpop.f32.mrf.mxu3 }
  0xfd   : > { %v1294_v30 = vsub.f32 %v1278_v3, %v2680_v60  ;;  %v1280_v46 = vsub.f32 %v1246_v20, %v2629_v63 }
  0xff   : > { %v1390_v58 = vpack.c.bf16 %v1294_v30, %v1293_v42  ;;  %v1484_v27 = vadd.f32 %v1294_v30, %v2689_v31  ;;  %v1296_v39 = vsub.f32 %v1280_v46, %v2694_v5  ;;  %v2849_v30 = vld [vmem:[%s2812_s21 + $0x8] sm:$0xff] }
 0x101   : > { %v1493_v43 = vpack.c.bf16 %v1484_v27, %v1483_v26  ;;  %v1486_v0 = vadd.f32 %v1296_v39, %v1264_v21  ;;  %2154 = vmatmul.msk.bf16.vlgmr.msrb.gmra.mxu3 %vm707_vm0, %v1390_v58  ;;  %v1391_v28 = vpack.c.bf16 %v1296_v39, %v1295_v45 }
 0x103   : > { %v1494_v62 = vpack.c.bf16 %v1486_v0, %v1485_v36  ;;  %v2840_v36 = vld [vmem:[%s2807_s18 + $0x20] sm:$0xff] }
 0x106   : > { %2140 = vmatmul.msk.bf16.gmra.mxu0 %vm707_vm0, %v1301_v38 }
 0x108   : > { %2150 = vmatmul.msk.bf16.gmra.mxu1 %vm707_vm0, %v1386_v8 }
 0x10a   : > { %2162 = vmatmul.msk.bf16.gmra.mxu2 %vm707_vm0, %v1489_v40 }
 0x111   : > { %2155 = vmatmul.msk.bf16.gmra.mxu3 %vm707_vm0, %v1391_v28 }
 0x116   : > { %2141 = vmatmul.msk.bf16.gmra.mxu0 %vm707_vm0, %v1302_v55 }
 0x118   : > { %2151 = vmatmul.msk.bf16.gmra.mxu1 %vm707_vm0, %v1387_v48 }
 0x11a   : > { %2163 = vmatmul.msk.bf16.gmra.mxu2 %vm707_vm0, %v1490_v57  ;;  %v2829_v57 = vld [vmem:[%s2807_s18 + $0x10] sm:$0xff] }
 0x121   : > { %2166 = vmatmul.msk.bf16.vlgmr.msra.gmra.mxu3 %vm707_vm0, %v1493_v43 }
 0x128   : > { %2152 = vmatmul.msk.bf16.gmra.mxu1 %vm707_vm0, %v1388_v52 }
 0x12a   : > { %2164 = vmatmul.msk.bf16.gmra.mxu2 %vm707_vm0, %v1491_v18  ;;  %v2835_v18 = vld [vmem:[%s2807_s18 + $0x8] sm:$0xff] }
 0x131   : > { %2167 = vmatmul.msk.bf16.gmra.mxu3 %vm707_vm0, %v1494_v62 }
 0x138   : > { %2153 = vmatmul.msk.bf16.gmra.mxu1 %vm707_vm0, %v1389_v33  ;;  %v2832_v33 = vld [vmem:[%s2812_s21 + $0x10] sm:$0xff] }
 0x13a   : > { %2165 = vmatmul.msk.bf16.gmra.mxu2 %vm707_vm0, %v1492_v4 }
 0x143   : > { %v1344_v63 = vpop.f32.mrf.mxu0 }
 0x14b   : > { %v1346_v23 = vpop.f32.mrf.mxu0 }
 0x153   : > { %v1349_v47 = vpop.f32.mrf.mxu0 }
 0x15b   : > { %v2789_v60 = vpop.f32.mrf.mxu0 }
 0x162   : > { %v2785_v19 = vpop.f32.mrf.mxu3 }
 0x163   : > { %v1354_v50 = vpop.f32.mrf.mxu0 }
 0x165   : > { %v1431_v37 = vpop.f32.mrf.mxu1 }
 0x166   : > { %v1574_v49 = vsub.f32 %v1344_v63, %v1431_v37 }
 0x168   : > { %v1622_v52 = vmul.f32 %v1574_v49, %v2819_v14  ;;  %v1714_v15 = vmul.f32 %v1574_v49, %v2822_v16 }
 0x16a   : > { %v2787_v61 = vpop.f32.mrf.mxu3 }
 0x16b   : > { %v2797_v35 = vpop.f32.mrf.mxu0 }
 0x16d   : > { %v1433_v38 = vpop.f32.mrf.mxu1  ;;  %v1534_v55 = vpop.f32.mrf.mxu2 }
 0x16e   : > { %v1590_v34 = vsub.f32 %v1534_v55, %v1344_v63  ;;  %v1575_v56 = vsub.f32 %v1346_v23, %v1433_v38 }
 0x170   : > { %v1606_v13 = vsub.f32 %v1590_v34, %v1431_v37  ;;  %v1623_v43 = vmul.f32 %v1575_v56, %v2835_v18  ;;  %v2868_v55 = vmul.f32 %v1575_v56, %v2849_v30  ;;  %v2896_v56 = vld [vmem:[%s2812_s21 + $0x28] sm:$0xff] }
 0x172   : > { %v2791_v21 = vpop.f32.mrf.mxu3  ;;  %v1638_v59 = vmul.f32 %v1606_v13, %v2822_v16  ;;  %v1698_v41 = vmul.f32 %v1606_v13, %v2819_v14 }
 0x173   : > { %v2814_v44 = vpop.f32.mrf.mxu0 }
 0x174   : > { %v1654_v4 = vadd.f32 %v1638_v59, %v1622_v52  ;;  %v1730_v26 = vsub.f32 %v1698_v41, %v1714_v15  ;;  %v2893_v15 = vld [vmem:[%s2807_s18 + $0x28] sm:$0xff] }
 0x175   : > { %v1436_v31 = vpop.f32.mrf.mxu1  ;;  %v1536_v5 = vpop.f32.mrf.mxu2 }
 0x176   : > { %v1591_v8 = vsub.f32 %v1536_v5, %v1346_v23  ;;  %v1576_v40 = vsub.f32 %v1349_v47, %v1436_v31  ;;  %v2872_v5 = vld [vmem:[%s2807_s18 + $0x18] sm:$0xff] }
 0x178   : > { %v1607_v17 = vsub.f32 %v1591_v8, %v1433_v38  ;;  %v1624_v46 = vmul.f32 %v1576_v40, %v2829_v57  ;;  %v1716_v0 = vmul.f32 %v1576_v40, %v2832_v33 }
 0x17a   : > { %v2795_v11 = vpop.f32.mrf.mxu3  ;;  %v1639_v28 = vmul.f32 %v1607_v17, %v2849_v30  ;;  %v2859_v62 = vmul.f32 %v1607_v17, %v2835_v18 }
 0x17b   : > { %v2861_v63 = vpop.f32.mrf.mxu0 }
 0x17c   : > { %v1731_v49 = vsub.f32 %v2859_v62, %v2868_v55 }
 0x17d   : > { %v2793_v53 = vpop.f32.mrf.mxu1  ;;  %v1539_v10 = vpop.f32.mrf.mxu2 }
 0x17e   : > { %v1592_v51 = vsub.f32 %v1539_v10, %v1349_v47  ;;  %v1577_v23 = vsub.f32 %v2789_v60, %v2793_v53 }
 0x180   : > { %v1608_v22 = vsub.f32 %v1592_v51, %v1436_v31  ;;  %v1670_v31 = vsel %vm707_vm0, %v1654_v4, 0.0  ;;  %v2903_v4 = vld [vmem:[%s2807_s18 + $0x30] sm:$0xff] }
 0x182   : > { %v1640_v42 = vmul.f32 %v1608_v22, %v2832_v33  ;;  %v1700_v45 = vmul.f32 %v1608_v22, %v2829_v57  ;;  %v1625_v22 = vmul.f32 %v1577_v23, %v2872_v5 }
 0x184   : > { %v2799_v24 = vpop.f32.mrf.mxu3  ;;  %v1656_v37 = vadd.f32 %v1640_v42, %v1624_v46  ;;  %v1732_v10 = vsub.f32 %v1700_v45, %v1716_v0  ;;  %v2916_v0 = vpop.f32.mrf.mxu0 }
 0x185   : > { %v1441_v25 = vpop.f32.mrf.mxu1  ;;  %v1541_v9 = vpop.f32.mrf.mxu2 }
 0x186   : > { %v1578_v1 = vsub.f32 %v1354_v50, %v1441_v25  ;;  %v1593_v3 = vsub.f32 %v1541_v9, %v2789_v60  ;;  %v1746_v9 = vsel %vm707_vm0, %v1730_v26, 0.0  ;;  %v1671_v41 = vsel %vm707_vm0, %v1656_v37, 0.0 }
 0x188   : > { %v1626_v47 = vmul.f32 %v1578_v1, %v2840_v36  ;;  %v1718_v38 = vmul.f32 %v1578_v1, %v2843_v7 }
 0x18c   : > { %v2816_v32 = vpop.f32.mrf.mxu3 }
 0x18d   : > { %v2802_v12 = vpop.f32.mrf.mxu1  ;;  %v1544_v2 = vpop.f32.mrf.mxu2 }
 0x18e   : > { %v1594_v29 = vsub.f32 %v1544_v2, %v1354_v50  ;;  %v2875_v50 = vld [vmem:[%s2812_s21 + $0x18] sm:$0xff]  ;;  %v1579_v40 = vsub.f32 %v2797_v35, %v2802_v12 }
 0x18f   : > { %v1717_v59 = vmul.f32 %v1577_v23, %v2875_v50 }
 0x190   : > { %v1610_v48 = vsub.f32 %v1594_v29, %v1441_v25  ;;  %v1609_v25 = vsub.f32 %v1593_v3, %v2793_v53  ;;  %v1655_v29 = vadd.f32 %v1639_v28, %v1623_v43  ;;  %v1719_v43 = vmul.f32 %v1579_v40, %v2896_v56 }
 0x192   : > { %v1642_v58 = vmul.f32 %v1610_v48, %v2843_v7  ;;  %v1702_v27 = vmul.f32 %v1610_v48, %v2840_v36  ;;  %v1747_v48 = vsel %vm707_vm0, %v1732_v10, 0.0  ;;  %v1701_v52 = vmul.f32 %v1609_v25, %v2872_v5 }
 0x194   : > { %v2846_v20 = vpop.f32.mrf.mxu3  ;;  %v1658_v60 = vadd.f32 %v1642_v58, %v1626_v47  ;;  %v1734_v34 = vsub.f32 %v1702_v27, %v1718_v38  ;;  %v1672_v58 = vadd.f32 %v1671_v41, %v1670_v31  ;;  %v1748_v27 = vadd.f32 %v1747_v48, %v1746_v9 }
 0x195   : > { %v1446_v6 = vpop.f32.mrf.mxu1  ;;  %v1546_v54 = vpop.f32.mrf.mxu2  ;;  %v1733_v62 = vsub.f32 %v1701_v52, %v1717_v59  ;;  %v1753_v48 = vsel %vm707_vm0, %v1731_v49, 0.0  ;;  %v2941_v52 = vld [vmem:[%s2807_s18 + $0x38] sm:$0xff] }
 0x196   : > { %v1595_v39 = vsub.f32 %v1546_v54, %v2797_v35  ;;  %v1580_v8 = vsub.f32 %v2814_v44, %v1446_v6  ;;  %v1641_v54 = vmul.f32 %v1609_v25, %v2875_v50  ;;  %v1673_v42 = vsel %vm707_vm0, %v1658_v60, 0.0  ;;  %v2906_v35 = vld [vmem:[%s2812_s21 + $0x30] sm:$0xff] }
 0x197   : > { %v1749_v1 = vsel %vm707_vm0, %v1734_v34, 0.0  ;;  %v1674_v47 = vadd.f32 %v1673_v42, %v1672_v58  ;;  %v1754_v59 = vsel %vm707_vm0, %v1733_v62, 0.0 }
 0x198   : > { %v1611_v2 = vsub.f32 %v1595_v39, %v2802_v12  ;;  %v1628_v45 = vmul.f32 %v1580_v8, %v2903_v4  ;;  %v1720_v3 = vmul.f32 %v1580_v8, %v2906_v35  ;;  %v1627_v39 = vmul.f32 %v1579_v40, %v2893_v15 }
 0x199   : > { %v1657_v28 = vadd.f32 %v1641_v54, %v1625_v22  ;;  %v1750_v38 = vadd.f32 %v1749_v1, %v1748_v27 }
 0x19a   : > { %v1643_v12 = vmul.f32 %v1611_v2, %v2896_v56  ;;  %v1703_v26 = vmul.f32 %v1611_v2, %v2893_v15 }
 0x19b   : > { %v1678_v22 = vsel %vm707_vm0, %v1657_v28, 0.0 }
 0x19c   : > { %v1659_v55 = vadd.f32 %v1643_v12, %v1627_v39  ;;  %v1735_v10 = vsub.f32 %v1703_v26, %v1719_v43  ;;  %v1755_v12 = vadd.f32 %v1754_v59, %v1753_v48  ;;  %v1366_v43 = vpop.f32.mrf.mxu0 }
 0x19d   : > { %v1448_v51 = vpop.f32.mrf.mxu1  ;;  %v1549_v13 = vpop.f32.mrf.mxu2 }
 0x19e   : > { %v1596_v53 = vsub.f32 %v1549_v13, %v2814_v44  ;;  %v2898_v44 = vpop.f32.mrf.mxu3  ;;  %v1581_v31 = vsub.f32 %v2861_v63, %v1448_v51  ;;  %v1756_v54 = vsel %vm707_vm0, %v1735_v10, 0.0  ;;  %v1587_v10 = vsub.f32 %v2787_v61, %v2816_v32 }
 0x1a0   : > { %v1612_v17 = vsub.f32 %v1596_v53, %v1446_v6  ;;  %v1677_v53 = vsel %vm707_vm0, %v1655_v29, 0.0  ;;  %v1629_v29 = vmul.f32 %v1581_v31, %v2941_v52 }
 0x1a1   : > { %v1679_v1 = vadd.f32 %v1678_v22, %v1677_v53 }
 0x1a2   : > { %v1644_v46 = vmul.f32 %v1612_v17, %v2906_v35  ;;  %v1704_v6 = vmul.f32 %v1612_v17, %v2903_v4  ;;  %v2944_v17 = vld [vmem:[%s2812_s21 + $0x38] sm:$0xff] }
 0x1a3   : > { %v1721_v42 = vmul.f32 %v1581_v31, %v2944_v17 }
 0x1a4   : > { %v1660_v23 = vadd.f32 %v1644_v46, %v1628_v45  ;;  %v1736_v37 = vsub.f32 %v1704_v6, %v1720_v3  ;;  %v1757_v46 = vadd.f32 %v1756_v54, %v1755_v12 }
 0x1a5   : > { %v1451_v25 = vpop.f32.mrf.mxu1  ;;  %v1551_v60 = vpop.f32.mrf.mxu2 }
 0x1a6   : > { %v1675_v9 = vsel %vm707_vm0, %v1660_v23, 0.0  ;;  %v1751_v34 = vsel %vm707_vm0, %v1736_v37, 0.0  ;;  %v1597_v2 = vsub.f32 %v1551_v60, %v2861_v63  ;;  %v1564_v41 = vpop.f32.mrf.mxu3  ;;  %v1680_v63 = vsel %vm707_vm0, %v1659_v55, 0.0 }
 0x1a7   : > { %v1676_v13 = vadd.f32 %v1675_v9, %v1674_v47  ;;  %v1752_v8 = vadd.f32 %v1751_v34, %v1750_v38  ;;  %v1681_v3 = vadd.f32 %v1680_v63, %v1679_v1  ;;  %v1602_v37 = vsub.f32 %v1564_v41, %v2785_v19 }
 0x1a8   : > { %v1613_v40 = vsub.f32 %v1597_v2, %v1448_v51  ;;  %v1586_v55 = vsub.f32 %v2785_v19, %v2799_v24  ;;  %v1588_v9 = vsub.f32 %v2791_v21, %v2846_v20  ;;  %v2973_v19 = vmul.f32 %v1587_v10, %v2893_v15 }
 0x1a9   : > { %1778 = vst.msk [vmem:[%s2923_s23] sm:$0xff] %vm707_vm0, %v1676_v13  ;;  %v1618_v60 = vsub.f32 %v1602_v37, %v2799_v24  ;;  %v1369_v13 = vpop.f32.mrf.mxu0  ;;  %v1582_v59 = vsub.f32 %v2916_v0, %v1451_v25  ;;  %v2980_v63 = vmul.f32 %v1587_v10, %v2896_v56 }
 0x1aa   : > { %1782 = vst.msk [vmem:[%s2932_s26] sm:$0xff] %vm707_vm0, %v1752_v8  ;;  %v1645_v51 = vmul.f32 %v1613_v40, %v2944_v17  ;;  %v1705_v49 = vmul.f32 %v1613_v40, %v2941_v52  ;;  %v1634_v53 = vmul.f32 %v1586_v55, %v2840_v36  ;;  %v1726_v22 = vmul.f32 %v1586_v55, %v2843_v7 }
 0x1ab   : > { %v1650_v24 = vmul.f32 %v1618_v60, %v2843_v7  ;;  %v1710_v41 = vmul.f32 %v1618_v60, %v2840_v36  ;;  %v1630_v36 = vmul.f32 %v1582_v59, %v2819_v14 }
 0x1ac   : > { %v1661_v26 = vadd.f32 %v1645_v51, %v1629_v29  ;;  %v1737_v45 = vsub.f32 %v1705_v49, %v1721_v42  ;;  %v1728_v42 = vmul.f32 %v1588_v9, %v2906_v35  ;;  %v1722_v49 = vmul.f32 %v1582_v59, %v2822_v16 }
 0x1ad   : > { %v1453_v6 = vpop.f32.mrf.mxu1  ;;  %v1554_v58 = vpop.f32.mrf.mxu2  ;;  %v1666_v12 = vadd.f32 %v1650_v24, %v1634_v53 }
 0x1ae   : > { %v1682_v27 = vsel %vm707_vm0, %v1661_v26, 0.0  ;;  %v1758_v39 = vsel %vm707_vm0, %v1737_v45, 0.0  ;;  %v1566_v23 = vpop.f32.mrf.mxu3  ;;  %v1598_v47 = vsub.f32 %v1554_v58, %v2916_v0  ;;  %v1583_v54 = vsub.f32 %v1366_v43, %v1453_v6 }
 0x1af   : > { %v1683_v28 = vadd.f32 %v1682_v27, %v1681_v3  ;;  %v1759_v62 = vadd.f32 %v1758_v39, %v1757_v46  ;;  %v1603_v40 = vsub.f32 %v1566_v23, %v2787_v61  ;;  %v1589_v61 = vsub.f32 %v2795_v11, %v2898_v44 }
 0x1b0   : > { %v1614_v34 = vsub.f32 %v1598_v47, %v1451_v25  ;;  %v1742_v26 = vsub.f32 %v1710_v41, %v1726_v22  ;;  %v1631_v46 = vmul.f32 %v1583_v54, %v2835_v18  ;;  %v1723_v58 = vmul.f32 %v1583_v54, %v2849_v30 }
 0x1b1   : > { %1779 = vst.msk [vmem:[%s2923_s23 + $0x8] sm:$0xff] %vm707_vm0, %v1683_v28  ;;  %v1619_v45 = vsub.f32 %v1603_v40, %v2816_v32  ;;  %v1371_v47 = vpop.f32.mrf.mxu0 }
 0x1b2   : > { %1783 = vst.msk [vmem:[%s2932_s26 + $0x8] sm:$0xff] %vm707_vm0, %v1759_v62  ;;  %v1646_v29 = vmul.f32 %v1614_v34, %v2822_v16  ;;  %v1706_v51 = vmul.f32 %v1614_v34, %v2819_v14  ;;  %v1763_v55 = vsel %vm707_vm0, %v1742_v26, 0.0 }
 0x1b5   : > { %v1556_v38 = vpop.f32.mrf.mxu2  ;;  %v1456_v31 = vpop.f32.mrf.mxu1 }
 0x1b6   : > { %v1569_v2 = vpop.f32.mrf.mxu3  ;;  %v1599_v48 = vsub.f32 %v1556_v38, %v1366_v43  ;;  %v1584_v7 = vsub.f32 %v1369_v13, %v1456_v31  ;;  %v1738_v43 = vsub.f32 %v1706_v51, %v1722_v49  ;;  %v1687_v38 = vsel %vm707_vm0, %v1666_v12, 0.0 }
 0x1b7   : > { %v1604_v8 = vsub.f32 %v1569_v2, %v2791_v21  ;;  %v1636_v21 = vmul.f32 %v1588_v9, %v2903_v4 }
 0x1b8   : > { %v1615_v3 = vsub.f32 %v1599_v48, %v1453_v6  ;;  %v1632_v16 = vmul.f32 %v1584_v7, %v2829_v57  ;;  %v1724_v23 = vmul.f32 %v1584_v7, %v2832_v33  ;;  %v1637_v7 = vmul.f32 %v1589_v61, %v2941_v52 }
 0x1b9   : > { %v1620_v0 = vsub.f32 %v1604_v8, %v2846_v20  ;;  %v1662_v20 = vadd.f32 %v1646_v29, %v1630_v36 }
 0x1ba   : > { %v1707_v10 = vmul.f32 %v1615_v3, %v2835_v18 }
 0x1bb   : > { %v1652_v28 = vmul.f32 %v1620_v0, %v2906_v35  ;;  %v1712_v14 = vmul.f32 %v1620_v0, %v2903_v4  ;;  %v1651_v35 = vmul.f32 %v1619_v45, %v2896_v56  ;;  %v1647_v4 = vmul.f32 %v1615_v3, %v2849_v30 }
 0x1bc   : > { %v1711_v30 = vmul.f32 %v1619_v45, %v2893_v15  ;;  %v1739_v24 = vsub.f32 %v1707_v10, %v1723_v58 }
 0x1bd   : > { %v1559_v25 = vpop.f32.mrf.mxu2  ;;  %v1458_v62 = vpop.f32.mrf.mxu1  ;;  %v1668_v34 = vadd.f32 %v1652_v28, %v1636_v21  ;;  %v1663_v18 = vadd.f32 %v1647_v4, %v1631_v46 }
 0x1be   : > { %v1600_v1 = vsub.f32 %v1559_v25, %v1369_v13  ;;  %v1571_v27 = vpop.f32.mrf.mxu3  ;;  %v1585_v60 = vsub.f32 %v1371_v47, %v1458_v62  ;;  %v1729_v25 = vmul.f32 %v1589_v61, %v2944_v17  ;;  %v1743_v12 = vsub.f32 %v1711_v30, %v2980_v63 }
 0x1bf   : > { %v1605_v32 = vsub.f32 %v1571_v27, %v2795_v11  ;;  %v1684_v11 = vsel %vm707_vm0, %v1662_v20, 0.0  ;;  %v1689_v21 = vsel %vm707_vm0, %v1668_v34, 0.0  ;;  %v1691_v3 = vsel %vm707_vm0, %v1663_v18, 0.0 }
 0x1c0   : > { %v1616_v39 = vsub.f32 %v1600_v1, %v1456_v31  ;;  %v1633_v41 = vmul.f32 %v1585_v60, %v2872_v5  ;;  %v1725_v40 = vmul.f32 %v1585_v60, %v2875_v50  ;;  %v1667_v1 = vadd.f32 %v1651_v35, %v2973_v19 }
 0x1c1   : > { %v1621_v13 = vsub.f32 %v1605_v32, %v2898_v44  ;;  %v1767_v46 = vsel %vm707_vm0, %v1739_v24, 0.0  ;;  %v1770_v58 = vsel %vm707_vm0, %v1743_v12, 0.0 }
 0x1c2   : > { %v1648_v6 = vmul.f32 %v1616_v39, %v2832_v33  ;;  %v1708_v37 = vmul.f32 %v1616_v39, %v2829_v57  ;;  %v1760_v33 = vsel %vm707_vm0, %v1738_v43, 0.0  ;;  %v1744_v57 = vsub.f32 %v1712_v14, %v1728_v42 }
 0x1c3   : > { %v1653_v42 = vmul.f32 %v1621_v13, %v2944_v17  ;;  %v1713_v15 = vmul.f32 %v1621_v13, %v2941_v52  ;;  %v1694_v61 = vsel %vm707_vm0, %v1667_v1, 0.0 }
 0x1c4   : > { %v1664_v31 = vadd.f32 %v1648_v6, %v1632_v16  ;;  %v1740_v9 = vsub.f32 %v1708_v37, %v1724_v23  ;;  %v1765_v44 = vsel %vm707_vm0, %v1744_v57, 0.0 }
 0x1c5   : > { %v1561_v2 = vpop.f32.mrf.mxu2 }
 0x1c6   : > { %v1685_v8 = vsel %vm707_vm0, %v1664_v31, 0.0  ;;  %v1761_v56 = vsel %vm707_vm0, %v1740_v9, 0.0  ;;  %v1601_v53 = vsub.f32 %v1561_v2, %v1371_v47 }
 0x1c7   : > { %v1686_v22 = vadd.f32 %v1685_v8, %v1684_v11  ;;  %v1762_v59 = vadd.f32 %v1761_v56, %v1760_v33 }
 0x1c8   : > { %v1617_v48 = vsub.f32 %v1601_v53, %v1458_v62 }
 0x1c9   : > { %v1688_v54 = vadd.f32 %v1687_v38, %v1686_v22  ;;  %v1764_v29 = vadd.f32 %v1763_v55, %v1762_v59 }
 0x1ca   : > { %v1649_v51 = vmul.f32 %v1617_v48, %v2875_v50  ;;  %v1709_v0 = vmul.f32 %v1617_v48, %v2872_v5  ;;  %v1669_v5 = vadd.f32 %v1653_v42, %v1637_v7  ;;  %v1745_v50 = vsub.f32 %v1713_v15, %v1729_v25 }
 0x1cb   : > { %v1690_v36 = vadd.f32 %v1689_v21, %v1688_v54  ;;  %v1766_v49 = vadd.f32 %v1765_v44, %v1764_v29 }
 0x1cc   : > { %v1665_v26 = vadd.f32 %v1649_v51, %v1633_v41  ;;  %v1741_v45 = vsub.f32 %v1709_v0, %v1725_v40  ;;  %v1696_v39 = vsel %vm707_vm0, %v1669_v5, 0.0  ;;  %v1772_v43 = vsel %vm707_vm0, %v1745_v50, 0.0 }
 0x1cd   : > { %1780 = vst.msk [vmem:[%s2923_s23 + $0x10] sm:$0xff] %vm707_vm0, %v1690_v36 }
 0x1ce   : > { %1784 = vst.msk [vmem:[%s2932_s26 + $0x10] sm:$0xff] %vm707_vm0, %v1766_v49  ;;  %v1692_v52 = vsel %vm707_vm0, %v1665_v26, 0.0  ;;  %v1768_v17 = vsel %vm707_vm0, %v1741_v45, 0.0 }
 0x1cf   : > { %v1693_v19 = vadd.f32 %v1692_v52, %v1691_v3  ;;  %v1769_v63 = vadd.f32 %v1768_v17, %v1767_v46 }
 0x1d1   : > { %v1695_v20 = vadd.f32 %v1694_v61, %v1693_v19  ;;  %v1771_v27 = vadd.f32 %v1770_v58, %v1769_v63 }
 0x1d3   : > { %v1697_v28 = vadd.f32 %v1696_v39, %v1695_v20  ;;  %v1773_v14 = vadd.f32 %v1772_v43, %v1771_v27 }
 0x1d5   : > { %1781 = vst.msk [vmem:[%s2923_s23 + $0x18] sm:$0xff] %vm707_vm0, %v1697_v28 }
 0x1d6   : > { %1785 = vst.msk [vmem:[%s2932_s26 + $0x18] sm:$0xff] %vm707_vm0, %v1773_v14 }
 0x1d7 PF: > { %s19_s29 = sadd.s32 1, %s2232_s29   ;;  %s3058_s27 = smov %s2228_s28 }
 0x1d8   : > { %p16_p5 = scmp.ge.s32.totalorder %s19_s29, 4   ;;  %s3059_s28 = smov %s3061_s30 }
 0x1da   :  { %18 = sbr.rel (!%p16_p5) target bundleno = 2 (0x2), region = 116 }

// kernel: closed_call.4
= control target key start
LH: loop header
LB: loop body
LE: loop exit
PB: predicated region body
PF: predicated region fallthrough
CT: control target
= control target key end

     0   :  { %s3384_s27 = smov 0   ;;  %s3386_s28 = smov 0   ;;  %s4497_s0 = inlined_call_operand.vmem [shape: f32[2,2,16,16], index: 0, kind: input, shape index: {}]   ;;  %s4498_s1 = inlined_call_operand.vmem [shape: f32[2,2,16,16], index: 1, kind: input, shape index: {}]   ;;  %s4499_s2 = inlined_call_operand.vmem [shape: f32[2,2,16,16], index: 2, kind: input, shape index: {}]   ;;  %s4500_s3 = inlined_call_operand.vmem [shape: f32[2,4,16,16], index: 3, kind: input, shape index: {}]   ;;  %s4501_s4 = inlined_call_operand.vmem [shape: f32[2,4,16,16], index: 4, kind: input, shape index: {}]   ;;  %s4502_s5 = inlined_call_operand.vmem [shape: bf16[6,16,16], index: 5, kind: input, shape index: {}]   ;;  %s4503_s6 = inlined_call_operand.vmem [shape: bf16[6,16,16], index: 6, kind: input, shape index: {}]   ;;  %s4504_s7 = inlined_call_operand.vmem [shape: f32[2,2,16,16], index: 7, kind: output, shape index: {0}]   ;;  %s4505_s8 = inlined_call_operand.vmem [shape: f32[2,2,16,16], index: 8, kind: output, shape index: {1}]  }
   0x1   :  { %s3388_s29 = smov 0  }
   0x2 LB: > { %s38_s30 = sadd.s32 1, %s3333_s28  ;;  %p3064_p0 = scmp.ge.s32.totalorder %s3337_s29, 1  ;;  %s3337_s29 = sphi %s3388_s29, %s19_s29   ;;  %s3333_s28 = sphi %s3386_s28, %s4507_s28   ;;  %s3329_s27 = sphi %s3384_s27, %s4506_s27  }
   0x3   : > { %p40_p1 = scmp.ge.s32.totalorder %s38_s30, 2  ;;  %p368_p2 = scmp.lt.s32.totalorder %s3337_s29, 3 }
   0x5   : > { %s4509_s30 = smov (%p40_p1, %s38_s30), 0  ;;  %p369_p3 = pnand %p3064_p0, %p368_p2 }
   0x6   : > { %p463_p4 = scmp.lt.s32.totalorder (!%p369_p3), %s3329_s27, 1 }
   0x7   : > { %372 = sbr.rel (%p369_p3) target bundleno = 885 (0x375), region = 48 }
   0xc   : > { %v3258_v0 = vld [vmem:[%s4503_s6] sm:$0xff]  ;;  %v3259_v1 = vld [vmem:[%s4503_s6 + $0x8] sm:$0xff]  ;;  %v3411_v2 = vld [vmem:[%s4503_s6 + $0x10] sm:$0xff]  ;;  %s4511_s27 = smov (!%p463_p4, %s3329_s27), 1  ;;  %vm712_vm0 = vcmask 130048  }
   0xd   : > { %744 = vmatpush.bf16.msra.mxu0 %v3258_v0  ;;  %3264 = vmatpush.bf16.msra.mxu3 %v3258_v0  ;;  %s3414_s15 = sshll.u32 %s4511_s27, 5  ;;  %s3248_s16 = sshll.u32 %s4511_s27, 6 }
   0xe   : > { %831 = vmatpush.bf16.msra.mxu1 %v3259_v1  ;;  %934 = vmatpush.bf16.msra.mxu2 %v3411_v2  ;;  %s3420_s19 = scalar_lea.vmem %s4497_s0, %s3414_s15  ;;  %s3426_s22 = scalar_lea.vmem %s4498_s1, %s3414_s15 }
   0xf   : > { %s3431_s25 = scalar_lea.vmem %s4500_s3, %s3248_s16  ;;  %s3436_s9 = scalar_lea.vmem %s4501_s4, %s3248_s16  ;;  %v3439_v3 = vld [vmem:[%s3420_s19] sm:$0xff]  ;;  %v3442_v4 = vld [vmem:[%s3420_s19 + $0x8] sm:$0xff]  ;;  %v3467_v13 = vld [vmem:[%s3420_s19 + $0x10] sm:$0xff] }
  0x10   : > { %v3445_v5 = vld [vmem:[%s3426_s22] sm:$0xff]  ;;  %v3448_v6 = vld [vmem:[%s3426_s22 + $0x8] sm:$0xff]  ;;  %v3474_v16 = vld [vmem:[%s3420_s19 + $0x18] sm:$0xff]  ;;  %s3843_s20 = scalar_lea.vmem %s4499_s2, %s3414_s15  ;;  %s4390_s21 = scalar_lea.vmem %s4504_s7, %s3414_s15 }
  0x11   : > { %3265 = vmatpush.bf16.msrb.mxu3 %v3259_v1  ;;  %v3451_v7 = vld [vmem:[%s3431_s25] sm:$0xff]  ;;  %v3454_v8 = vld [vmem:[%s3431_s25 + $0x8] sm:$0xff]  ;;  %v3477_v17 = vld [vmem:[%s3426_s22 + $0x10] sm:$0xff]  ;;  %s4398_s26 = scalar_lea.vmem %s4505_s8, %s3414_s15 }
  0x12   : > { %v3457_v9 = vld [vmem:[%s3436_s9] sm:$0xff]  ;;  %v3460_v10 = vld [vmem:[%s3436_s9 + $0x8] sm:$0xff]  ;;  %v602_v11 = vmul.f32 %v3451_v7, %v3439_v3  ;;  %v603_v12 = vmul.f32 %v3454_v8, %v3442_v4  ;;  %v3480_v18 = vld [vmem:[%s3426_s22 + $0x18] sm:$0xff]  ;;  %v650_v19 = vmul.f32 %v3451_v7, %v3445_v5  ;;  %v651_v24 = vmul.f32 %v3454_v8, %v3448_v6 }
  0x13   : > { %v618_v14 = vmul.f32 %v3457_v9, %v3445_v5  ;;  %v619_v15 = vmul.f32 %v3460_v10, %v3448_v6  ;;  %v666_v20 = vmul.f32 %v3457_v9, %v3439_v3  ;;  %v3487_v21 = vld [vmem:[%s3431_s25 + $0x20] sm:$0xff]  ;;  %v3490_v22 = vld [vmem:[%s3431_s25 + $0x28] sm:$0xff]  ;;  %v667_v25 = vmul.f32 %v3460_v10, %v3442_v4  ;;  %v3516_v39 = vld [vmem:[%s3431_s25 + $0x10] sm:$0xff] }
  0x14   : > { %v3493_v23 = vld [vmem:[%s3436_s9 + $0x20] sm:$0xff]  ;;  %v3500_v28 = vld [vmem:[%s3436_s9 + $0x28] sm:$0xff]  ;;  %v614_v29 = vmul.f32 %v3487_v21, %v3467_v13  ;;  %v615_v30 = vmul.f32 %v3490_v22, %v3474_v16  ;;  %v3521_v43 = vld [vmem:[%s3431_s25 + $0x18] sm:$0xff]  ;;  %v604_v48 = vmul.f32 %v3516_v39, %v3439_v3  ;;  %v652_v55 = vmul.f32 %v3516_v39, %v3445_v5 }
  0x15   : > { %v634_v26 = vsub.f32 %v602_v11, %v618_v14  ;;  %v635_v27 = vsub.f32 %v603_v12, %v619_v15  ;;  %v630_v31 = vmul.f32 %v3493_v23, %v3477_v17  ;;  %v631_v32 = vmul.f32 %v3500_v28, %v3480_v18  ;;  %v3524_v44 = vld [vmem:[%s3436_s9 + $0x10] sm:$0xff]  ;;  %v3527_v45 = vld [vmem:[%s3436_s9 + $0x18] sm:$0xff] }
  0x16   : > { %v682_v34 = vadd.f32 %v666_v20, %v650_v19  ;;  %v683_v37 = vadd.f32 %v667_v25, %v651_v24  ;;  %v3532_v47 = vld [vmem:[%s3431_s25 + $0x30] sm:$0xff]  ;;  %v605_v49 = vmul.f32 %v3521_v43, %v3442_v4  ;;  %v620_v50 = vmul.f32 %v3524_v44, %v3445_v5  ;;  %v3543_v52 = vld [vmem:[%s3431_s25 + $0x38] sm:$0xff] }
  0x17   : > { %v698_v33 = vpack.c.bf16 %v635_v27, %v634_v26  ;;  %v3510_v35 = vsub.f32 %v614_v29, %v630_v31  ;;  %v3512_v36 = vsub.f32 %v615_v30, %v631_v32  ;;  %v621_v51 = vmul.f32 %v3527_v45, %v3448_v6  ;;  %v3546_v53 = vld [vmem:[%s3436_s9 + $0x30] sm:$0xff]  ;;  %v3549_v54 = vld [vmem:[%s3436_s9 + $0x38] sm:$0xff] }
  0x18   : > { %v873_v38 = vadd.f32 %v682_v34, %v634_v26  ;;  %v786_v41 = vpack.c.bf16 %v683_v37, %v682_v34  ;;  %v874_v42 = vadd.f32 %v683_v37, %v635_v27  ;;  %v653_v56 = vmul.f32 %v3521_v43, %v3448_v6 }
  0x19   : > { %3103 = vmatmul.msk.bf16.vlgmr.msra.gmra.mxu0 %vm712_vm0, %v698_v33  ;;  %v704_v40 = vpack.c.bf16 %v3512_v36, %v3510_v35  ;;  %v668_v57 = vmul.f32 %v3524_v44, %v3439_v3  ;;  %v669_v58 = vmul.f32 %v3527_v45, %v3442_v4  ;;  %v616_v59 = vmul.f32 %v3532_v47, %v3467_v13 }
  0x1a   : > { %3115 = vmatmul.msk.bf16.vlgmr.msra.gmra.mxu1 %vm712_vm0, %v786_v41  ;;  %v889_v46 = vpack.c.bf16 %v874_v42, %v873_v38  ;;  %v617_v60 = vmul.f32 %v3543_v52, %v3474_v16  ;;  %v632_v61 = vmul.f32 %v3546_v53, %v3477_v17  ;;  %v633_v62 = vmul.f32 %v3549_v54, %v3480_v18 }
  0x1b   : > { %3109 = vmatmul.msk.bf16.vlgmr.msra.gmra.mxu3 %vm712_vm0, %v704_v40  ;;  %v636_v63 = vsub.f32 %v604_v48, %v620_v50  ;;  %v637_v0 = vsub.f32 %v605_v49, %v621_v51  ;;  %v684_v1 = vadd.f32 %v668_v57, %v652_v55  ;;  %v606_v26 = vmul.f32 %v3487_v21, %v3439_v3 }
  0x1c   : > { %3266 = vmatpush.bf16.msra.mxu3 %v3411_v2  ;;  %3127 = vmatmul.msk.bf16.vlgmr.msra.gmra.mxu2 %vm712_vm0, %v889_v46  ;;  %v685_v2 = vadd.f32 %v669_v58, %v653_v56  ;;  %v3569_v11 = vsub.f32 %v616_v59, %v632_v61  ;;  %v3571_v12 = vsub.f32 %v617_v60, %v633_v62 }
  0x1d   : > { %v699_v14 = vpack.c.bf16 %v637_v0, %v636_v63  ;;  %v875_v15 = vadd.f32 %v684_v1, %v636_v63  ;;  %v607_v27 = vmul.f32 %v3490_v22, %v3442_v4  ;;  %v622_v29 = vmul.f32 %v3493_v23, %v3445_v5 }
  0x1e   : > { %v876_v19 = vadd.f32 %v685_v2, %v637_v0  ;;  %v705_v20 = vpack.c.bf16 %v3571_v12, %v3569_v11  ;;  %v787_v24 = vpack.c.bf16 %v685_v2, %v684_v1  ;;  %v623_v30 = vmul.f32 %v3500_v28, %v3448_v6 }
  0x1f   : > { %v654_v31 = vmul.f32 %v3487_v21, %v3445_v5  ;;  %v655_v32 = vmul.f32 %v3490_v22, %v3448_v6  ;;  %v670_v33 = vmul.f32 %v3493_v23, %v3439_v3  ;;  %v671_v34 = vmul.f32 %v3500_v28, %v3442_v4 }
  0x20   : > { %v890_v25 = vpack.c.bf16 %v876_v19, %v875_v15  ;;  %v662_v37 = vmul.f32 %v3487_v21, %v3477_v17  ;;  %v663_v38 = vmul.f32 %v3490_v22, %v3480_v18  ;;  %v678_v40 = vmul.f32 %v3493_v23, %v3467_v13 }
  0x21   : > { %v679_v41 = vmul.f32 %v3500_v28, %v3474_v16  ;;  %v638_v42 = vsub.f32 %v606_v26, %v622_v29  ;;  %v639_v46 = vsub.f32 %v607_v27, %v623_v30  ;;  %v686_v48 = vadd.f32 %v670_v33, %v654_v31 }
  0x22   : > { %v687_v49 = vadd.f32 %v671_v34, %v655_v32  ;;  %v694_v50 = vadd.f32 %v678_v40, %v662_v37  ;;  %v608_v23 = vmul.f32 %v3532_v47, %v3439_v3  ;;  %v609_v28 = vmul.f32 %v3543_v52, %v3442_v4 }
  0x23   : > { %v695_v51 = vadd.f32 %v679_v41, %v663_v38  ;;  %v700_v55 = vpack.c.bf16 %v639_v46, %v638_v42  ;;  %v877_v56 = vadd.f32 %v686_v48, %v638_v42  ;;  %v624_v59 = vmul.f32 %v3546_v53, %v3445_v5 }
  0x24   : > { %v878_v57 = vadd.f32 %v687_v49, %v639_v46  ;;  %v788_v58 = vpack.c.bf16 %v687_v49, %v686_v48  ;;  %v625_v60 = vmul.f32 %v3549_v54, %v3448_v6  ;;  %v656_v61 = vmul.f32 %v3532_v47, %v3445_v5 }
  0x25   : > { %v792_v21 = vpack.c.bf16 %v695_v51, %v694_v50  ;;  %v657_v62 = vmul.f32 %v3543_v52, %v3448_v6  ;;  %v672_v63 = vmul.f32 %v3546_v53, %v3439_v3  ;;  %v673_v0 = vmul.f32 %v3549_v54, %v3442_v4 }
  0x26   : > { %v891_v22 = vpack.c.bf16 %v878_v57, %v877_v56  ;;  %v664_v1 = vmul.f32 %v3532_v47, %v3477_v17  ;;  %v665_v2 = vmul.f32 %v3543_v52, %v3480_v18  ;;  %v681_v5 = vmul.f32 %v3549_v54, %v3474_v16 }
  0x27   : > { %v640_v15 = vsub.f32 %v608_v23, %v624_v59  ;;  %v641_v6 = vsub.f32 %v609_v28, %v625_v60  ;;  %v688_v19 = vadd.f32 %v672_v63, %v656_v61  ;;  %v611_v54 = vmul.f32 %v3454_v8, %v3474_v16 }
  0x28   : > { %v626_v29 = vmul.f32 %v3457_v9, %v3477_v17  ;;  %v627_v30 = vmul.f32 %v3460_v10, %v3480_v18  ;;  %v658_v31 = vmul.f32 %v3451_v7, %v3477_v17  ;;  %v659_v32 = vmul.f32 %v3454_v8, %v3480_v18 }
  0x29   : > { %3104 = vmatmul.msk.bf16.gmra.mxu0 %vm712_vm0, %v699_v14  ;;  %v680_v14 = vmul.f32 %v3546_v53, %v3467_v13  ;;  %v879_v4 = vadd.f32 %v688_v19, %v640_v15  ;;  %v610_v53 = vmul.f32 %v3451_v7, %v3467_v13  ;;  %v674_v33 = vmul.f32 %v3457_v9, %v3467_v13 }
  0x2a   : > { %3116 = vmatmul.msk.bf16.gmra.mxu1 %vm712_vm0, %v787_v24  ;;  %v697_v24 = vadd.f32 %v681_v5, %v665_v2  ;;  %v675_v34 = vmul.f32 %v3460_v10, %v3474_v16  ;;  %v643_v38 = vsub.f32 %v611_v54, %v627_v30  ;;  %v885_v42 = vadd.f32 %v694_v50, %v3510_v35 }
  0x2b   : > { %3110 = vmatmul.msk.bf16.gmra.mxu3 %vm712_vm0, %v705_v20  ;;  %v689_v20 = vadd.f32 %v673_v0, %v657_v62  ;;  %v696_v3 = vadd.f32 %v680_v14, %v664_v1  ;;  %v642_v37 = vsub.f32 %v610_v53, %v626_v29  ;;  %v690_v40 = vadd.f32 %v674_v33, %v658_v31 }
  0x2c   : > { %3128 = vmatmul.msk.bf16.gmra.mxu2 %vm712_vm0, %v890_v25  ;;  %v701_v25 = vpack.c.bf16 %v641_v6, %v640_v15  ;;  %v691_v41 = vadd.f32 %v675_v34, %v659_v32  ;;  %v886_v46 = vadd.f32 %v695_v51, %v3512_v36  ;;  %v612_v9 = vmul.f32 %v3516_v39, %v3467_v13 }
  0x2d   : > { %v880_v26 = vadd.f32 %v689_v20, %v641_v6  ;;  %v789_v27 = vpack.c.bf16 %v689_v20, %v688_v19  ;;  %v793_v47 = vpack.c.bf16 %v697_v24, %v696_v3  ;;  %v702_v48 = vpack.c.bf16 %v643_v38, %v642_v37 }
  0x2e   : > { %v881_v49 = vadd.f32 %v690_v40, %v642_v37  ;;  %v882_v7 = vadd.f32 %v691_v41, %v643_v38  ;;  %v790_v56 = vpack.c.bf16 %v691_v41, %v690_v40  ;;  %v613_v10 = vmul.f32 %v3521_v43, %v3474_v16 }
  0x2f   : > { %v892_v52 = vpack.c.bf16 %v880_v26, %v879_v4  ;;  %v628_v35 = vmul.f32 %v3524_v44, %v3477_v17  ;;  %v629_v36 = vmul.f32 %v3527_v45, %v3480_v18  ;;  %v660_v50 = vmul.f32 %v3516_v39, %v3477_v17  ;;  %v3686_v26 = vld [vmem:[%s4502_s5] sm:$0xff] }
  0x30   : > { %v893_v8 = vpack.c.bf16 %v882_v7, %v881_v49  ;;  %v661_v51 = vmul.f32 %v3521_v43, %v3480_v18  ;;  %v676_v57 = vmul.f32 %v3524_v44, %v3467_v13  ;;  %v887_v59 = vadd.f32 %v696_v3, %v3569_v11 }
  0x31   : > { %v888_v60 = vadd.f32 %v697_v24, %v3571_v12 }
  0x32   : > { %v692_v23 = vadd.f32 %v676_v57, %v660_v50 }
  0x33   : > { %v896_v63 = vpack.c.bf16 %v888_v60, %v887_v59 }
  0x39   : > { %3105 = vmatmul.msk.bf16.gmra.mxu0 %vm712_vm0, %v700_v55  ;;  %v895_v55 = vpack.c.bf16 %v886_v46, %v885_v42 }
  0x3a   : > { %3117 = vmatmul.msk.bf16.gmra.mxu1 %vm712_vm0, %v788_v58  ;;  %v677_v58 = vmul.f32 %v3527_v45, %v3474_v16 }
  0x3b   : > { %3121 = vmatmul.msk.bf16.vlgmr.msrb.gmra.mxu3 %vm712_vm0, %v792_v21  ;;  %v644_v21 = vsub.f32 %v612_v9, %v628_v35 }
  0x3c   : > { %3129 = vmatmul.msk.bf16.gmra.mxu2 %vm712_vm0, %v891_v22  ;;  %v645_v22 = vsub.f32 %v613_v10, %v629_v36  ;;  %v693_v28 = vadd.f32 %v677_v58, %v661_v51 }
  0x3d   : > { %v883_v62 = vadd.f32 %v692_v23, %v644_v21 }
  0x3e   : > { %v703_v61 = vpack.c.bf16 %v645_v22, %v644_v21  ;;  %v884_v17 = vadd.f32 %v693_v28, %v645_v22  ;;  %v791_v39 = vpack.c.bf16 %v693_v28, %v692_v23 }
  0x40   : > { %v894_v18 = vpack.c.bf16 %v884_v17, %v883_v62 }
  0x49   : > { %3106 = vmatmul.msk.bf16.gmra.mxu0 %vm712_vm0, %v701_v25 }
  0x4a   : > { %3118 = vmatmul.msk.bf16.gmra.mxu1 %vm712_vm0, %v789_v27 }
  0x4b   : > { %3122 = vmatmul.msk.bf16.gmra.mxu3 %vm712_vm0, %v793_v47 }
  0x4c   : > { %3130 = vmatmul.msk.bf16.gmra.mxu2 %vm712_vm0, %v892_v52 }
  0x59   : > { %3107 = vmatmul.msk.bf16.gmra.mxu0 %vm712_vm0, %v702_v48 }
  0x5a   : > { %3119 = vmatmul.msk.bf16.gmra.mxu1 %vm712_vm0, %v790_v56 }
  0x5b   : > { %3133 = vmatmul.msk.bf16.vlgmr.msra.gmra.mxu3 %vm712_vm0, %v895_v55  ;;  %v3699_v55 = vld [vmem:[%s4502_s5 + $0x8] sm:$0xff] }
  0x5c   : > { %3131 = vmatmul.msk.bf16.gmra.mxu2 %vm712_vm0, %v893_v8 }
  0x69   : > { %3108 = vmatmul.msk.bf16.gmra.mxu0 %vm712_vm0, %v703_v61 }
  0x6a   : > { %3120 = vmatmul.msk.bf16.gmra.mxu1 %vm712_vm0, %v791_v39 }
  0x6b   : > { %3134 = vmatmul.msk.bf16.gmra.mxu3 %vm712_vm0, %v896_v63 }
  0x6c   : > { %3132 = vmatmul.msk.bf16.gmra.mxu2 %vm712_vm0, %v894_v18 }
  0x96   : > { %v746_v13 = vpop.f32.mrf.mxu0 }
  0x97   : > { %v833_v16 = vpop.f32.mrf.mxu1 }
  0x98   : > { %v976_v43 = vsub.f32 %v746_v13, %v833_v16 }
  0x9a   : > { %v1024_v0 = vpack.c.bf16 %v976_v43, %v976_v43 }
  0x9c   : > { %v1047_v15 = vunpack.c.l.b16 %v1024_v0 }
  0x9e   : > { %v748_v44 = vpop.f32.mrf.mxu0  ;;  %v3679_v45 = vpop.f32.mrf.mxu3 }
  0x9f   : > { %v835_v11 = vpop.f32.mrf.mxu1  ;;  %v936_v12 = vpop.f32.mrf.mxu2 }
  0xa0   : > { %v977_v1 = vsub.f32 %v748_v44, %v835_v11  ;;  %v992_v2 = vsub.f32 %v936_v12, %v746_v13 }
  0xa2   : > { %v1025_v14 = vpack.c.bf16 %v977_v1, %v977_v1  ;;  %v1008_v5 = vsub.f32 %v992_v2, %v833_v16 }
  0xa4   : > { %v1048_v6 = vunpack.c.l.b16 %v1025_v14  ;;  %v1392_v19 = vadd.f32 %v1008_v5, %v976_v43  ;;  %v1208_v52 = vpack.c.bf16 %v1008_v5, %v1008_v5 }
  0xa6   : > { %v751_v20 = vpop.f32.mrf.mxu0  ;;  %v3681_v3 = vpop.f32.mrf.mxu3  ;;  %v1049_v24 = vpack.c.b16 %v1048_v6, %v1047_v15  ;;  %v1408_v53 = vpack.c.bf16 %v1392_v19, %v1392_v19  ;;  %v1231_v34 = vunpack.c.l.b16 %v1208_v52 }
  0xa7   : > { %v838_v25 = vpop.f32.mrf.mxu1  ;;  %v938_v4 = vpop.f32.mrf.mxu2 }
  0xa8   : > { %v993_v27 = vsub.f32 %v938_v4, %v748_v44  ;;  %1061 = vmatpush.bf16.msrb.mxu3 %v1049_v24  ;;  %v978_v54 = vsub.f32 %v751_v20, %v838_v25  ;;  %v3692_v38 = vunpack.c.l.b16 %v1408_v53 }
  0xaa   : > { %v1009_v47 = vsub.f32 %v993_v27, %v835_v11  ;;  %v1026_v40 = vpack.c.bf16 %v978_v54, %v978_v54 }
  0xab   : > { %3139 = vmatmul.msk.bf16.vlgmr.msrb.gmra.mxu3 %vm712_vm0, %v3686_v26 }
  0xac   : > { %v1393_v29 = vadd.f32 %v1009_v47, %v977_v1  ;;  %v1209_v31 = vpack.c.bf16 %v1009_v47, %v1009_v47  ;;  %v1070_v9 = vunpack.c.l.b16 %v1026_v40 }
  0xae   : > { %v753_v30 = vpop.f32.mrf.mxu0  ;;  %v3690_v32 = vpop.f32.mrf.mxu3  ;;  %v1409_v33 = vpack.c.bf16 %v1393_v29, %v1393_v29  ;;  %v1232_v37 = vunpack.c.l.b16 %v1209_v31 }
  0xaf   : > { %v840_v41 = vpop.f32.mrf.mxu1  ;;  %v941_v42 = vpop.f32.mrf.mxu2 }
  0xb0   : > { %v3694_v46 = vunpack.c.l.b16 %v1409_v33  ;;  %v979_v48 = vsub.f32 %v753_v30, %v840_v41  ;;  %v994_v49 = vsub.f32 %v941_v42, %v751_v20  ;;  %v1233_v7 = vpack.c.b16 %v1232_v37, %v1231_v34 }
  0xb2   : > { %v1027_v56 = vpack.c.bf16 %v979_v48, %v979_v48  ;;  %1245 = vmatpush.bf16.msrb.mxu0 %v1233_v7  ;;  %v1433_v8 = vpack.c.b16 %v3694_v46, %v3692_v38  ;;  %v1010_v35 = vsub.f32 %v994_v49, %v838_v25 }
  0xb4   : > { %v1071_v10 = vunpack.c.l.b16 %v1027_v56  ;;  %v1394_v21 = vadd.f32 %v1010_v35, %v978_v54  ;;  %v1210_v28 = vpack.c.bf16 %v1010_v35, %v1010_v35 }
  0xb5   : > { %3151 = vmatmul.msk.bf16.vlgmr.msrb.gmra.mxu0 %vm712_vm0, %v3699_v55 }
  0xb6   : > { %v756_v36 = vpop.f32.mrf.mxu0  ;;  %v3703_v50 = vpop.f32.mrf.mxu3  ;;  %v1072_v51 = vpack.c.b16 %v1071_v10, %v1070_v9  ;;  %v1410_v59 = vpack.c.bf16 %v1394_v21, %v1394_v21  ;;  %v1254_v43 = vunpack.c.l.b16 %v1210_v28 }
  0xb7   : > { %v843_v57 = vpop.f32.mrf.mxu1  ;;  %v943_v58 = vpop.f32.mrf.mxu2 }
  0xb8   : > { %v995_v22 = vsub.f32 %v943_v58, %v753_v30  ;;  %1081 = vmatpush.bf16.msra.mxu3 %v1072_v51  ;;  %v3709_v60 = vsub.f32 %v756_v36, %v843_v57  ;;  %v3713_v44 = vunpack.c.l.b16 %v1410_v59 }
  0xba   : > { %v1011_v23 = vsub.f32 %v995_v22, %v840_v41  ;;  %v1028_v11 = vpack.c.bf16 %v3709_v60, %v3709_v60 }
  0xbb   : > { %3140 = vmatmul.msk.bf16.vlgmr.msra.gmra.mxu3 %vm712_vm0, %v3686_v26 }
  0xbc   : > { %v1395_v61 = vadd.f32 %v1011_v23, %v979_v48  ;;  %v1211_v17 = vpack.c.bf16 %v1011_v23, %v1011_v23  ;;  %v1090_v15 = vunpack.c.l.b16 %v1028_v11 }
  0xbe   : > { %v758_v62 = vpop.f32.mrf.mxu0  ;;  %v3711_v39 = vpop.f32.mrf.mxu3  ;;  %v1411_v63 = vpack.c.bf16 %v1395_v61, %v1395_v61  ;;  %v1255_v18 = vunpack.c.l.b16 %v1211_v17 }
  0xbf   : > { %v845_v13 = vpop.f32.mrf.mxu1  ;;  %v946_v16 = vpop.f32.mrf.mxu2 }
  0xc0   : > { %v3717_v12 = vunpack.c.l.b16 %v1411_v63  ;;  %v3719_v0 = vsub.f32 %v758_v62, %v845_v13  ;;  %v1256_v1 = vpack.c.b16 %v1255_v18, %v1254_v43  ;;  %v996_v5 = vsub.f32 %v946_v16, %v756_v36 }
  0xc2   : > { %v1029_v2 = vpack.c.bf16 %v3719_v0, %v3719_v0  ;;  %v1456_v14 = vpack.c.b16 %v3717_v12, %v3713_v44  ;;  %1265 = vmatpush.bf16.msrb.mxu1 %v1256_v1  ;;  %v1012_v25 = vsub.f32 %v996_v5, %v843_v57 }
  0xc4   : > { %v1091_v6 = vunpack.c.l.b16 %v1029_v2  ;;  %v1212_v53 = vpack.c.bf16 %v1012_v25, %v1012_v25 }
  0xc5   : > { %3152 = vmatmul.msk.bf16.vlgmr.msrb.gmra.mxu1 %vm712_vm0, %v3699_v55 }
  0xc6   : > { %v761_v19 = vpop.f32.mrf.mxu0  ;;  %v3725_v20 = vpop.f32.mrf.mxu3  ;;  %v1092_v24 = vpack.c.b16 %v1091_v6, %v1090_v15  ;;  %v1274_v40 = vunpack.c.l.b16 %v1212_v53  ;;  %v1396_v15 = vadd.f32 %v1012_v25, %v3709_v60 }
  0xc7   : > { %v848_v4 = vpop.f32.mrf.mxu1  ;;  %v948_v27 = vpop.f32.mrf.mxu2 }
  0xc8   : > { %v997_v47 = vsub.f32 %v948_v27, %v758_v62  ;;  %1101 = vmatpush.bf16.msrb.mxu3 %v1092_v24  ;;  %v982_v54 = vsub.f32 %v761_v19, %v848_v4 }
  0xca   : > { %v1013_v52 = vsub.f32 %v997_v47, %v845_v13  ;;  %v1030_v41 = vpack.c.bf16 %v982_v54, %v982_v54 }
  0xcb   : > { %3141 = vmatmul.msk.bf16.vlgmr.msrb.gmra.mxu3 %vm712_vm0, %v3686_v26 }
  0xcc   : > { %v1213_v30 = vpack.c.bf16 %v1013_v52, %v1013_v52  ;;  %v1110_v56 = vunpack.c.l.b16 %v1030_v41  ;;  %v989_v41 = vsub.f32 %v3681_v3, %v3725_v20 }
  0xce   : > { %v763_v29 = vpop.f32.mrf.mxu0  ;;  %v3731_v31 = vpop.f32.mrf.mxu3  ;;  %v1275_v33 = vunpack.c.l.b16 %v1213_v30 }
  0xcf   : > { %v850_v34 = vpop.f32.mrf.mxu1  ;;  %v951_v37 = vpop.f32.mrf.mxu2 }
  0xd0   : > { %v983_v42 = vsub.f32 %v763_v29, %v850_v34  ;;  %v998_v48 = vsub.f32 %v951_v37, %v761_v19  ;;  %v1276_v49 = vpack.c.b16 %v1275_v33, %v1274_v40  ;;  %v1397_v19 = vadd.f32 %v1013_v52, %v3719_v0 }
  0xd1   : > { %v1412_v33 = vpack.c.bf16 %v1396_v15, %v1396_v15  ;;  %v1037_v15 = vpack.c.bf16 %v989_v41, %v989_v41 }
  0xd2   : > { %v1031_v7 = vpack.c.bf16 %v983_v42, %v983_v42  ;;  %1285 = vmatpush.bf16.msrb.mxu2 %v1276_v49  ;;  %v3733_v35 = vsub.f32 %v998_v48, %v848_v4 }
  0xd4   : > { %v1111_v9 = vunpack.c.l.b16 %v1031_v7  ;;  %v1398_v22 = vadd.f32 %v3733_v35, %v982_v54  ;;  %v988_v54 = vsub.f32 %v3679_v45, %v3711_v39  ;;  %v1474_v7 = vunpack.c.l.b16 %v1412_v33 }
  0xd5   : > { %3153 = vmatmul.msk.bf16.vlgmr.msrb.gmra.mxu2 %vm712_vm0, %v3699_v55 }
  0xd6   : > { %v766_v10 = vpop.f32.mrf.mxu0  ;;  %v3735_v36 = vpop.f32.mrf.mxu3  ;;  %v1112_v51 = vpack.c.b16 %v1111_v9, %v1110_v56  ;;  %v1414_v62 = vpack.c.bf16 %v1398_v22, %v1398_v22 }
  0xd7   : > { %v853_v57 = vpop.f32.mrf.mxu1  ;;  %v953_v58 = vpop.f32.mrf.mxu2 }
  0xd8   : > { %v999_v21 = vsub.f32 %v953_v58, %v763_v29  ;;  %1121 = vmatpush.bf16.msra.mxu3 %v1112_v51  ;;  %v984_v28 = vsub.f32 %v766_v10, %v853_v57  ;;  %v3748_v2 = vunpack.c.l.b16 %v1414_v62 }
  0xda   : > { %v3740_v23 = vsub.f32 %v999_v21, %v850_v34  ;;  %v1032_v43 = vpack.c.bf16 %v984_v28, %v984_v28  ;;  %v1413_v34 = vpack.c.bf16 %v1397_v19, %v1397_v19 }
  0xdb   : > { %3142 = vmatmul.msk.bf16.vlgmr.msra.gmra.mxu3 %vm712_vm0, %v3686_v26 }
  0xdc   : > { %v1399_v59 = vadd.f32 %v3740_v23, %v983_v42  ;;  %v1130_v27 = vunpack.c.l.b16 %v1032_v43  ;;  %v1475_v51 = vunpack.c.l.b16 %v1413_v34 }
  0xde   : > { %v768_v61 = vpop.f32.mrf.mxu0  ;;  %v966_v17 = vpop.f32.mrf.mxu3  ;;  %v1415_v63 = vpack.c.bf16 %v1399_v59, %v1399_v59 }
  0xdf   : > { %v1004_v18 = vsub.f32 %v966_v17, %v3679_v45  ;;  %v855_v13 = vpop.f32.mrf.mxu1  ;;  %v956_v16 = vpop.f32.mrf.mxu2  ;;  %v1036_v45 = vpack.c.bf16 %v988_v54, %v988_v54 }
  0xe0   : > { %v3746_v11 = vunpack.c.l.b16 %v1415_v63  ;;  %v985_v1 = vsub.f32 %v768_v61, %v855_v13  ;;  %v1000_v5 = vsub.f32 %v956_v16, %v766_v10 }
  0xe1   : > { %v1020_v24 = vsub.f32 %v1004_v18, %v3711_v39 }
  0xe2   : > { %v1033_v6 = vpack.c.bf16 %v985_v1, %v985_v1  ;;  %v1496_v4 = vpack.c.b16 %v3746_v11, %v3748_v2  ;;  %v1016_v29 = vsub.f32 %v1000_v5, %v853_v57  ;;  %v990_v57 = vsub.f32 %v3690_v32, %v3731_v31 }
  0xe3   : > { %v1220_v0 = vpack.c.bf16 %v1020_v24, %v1020_v24  ;;  %v1404_v52 = vadd.f32 %v1020_v24, %v988_v54 }
  0xe4   : > { %v1131_v47 = vunpack.c.l.b16 %v1033_v6  ;;  %v1216_v39 = vpack.c.bf16 %v1016_v29, %v1016_v29  ;;  %v1400_v49 = vadd.f32 %v1016_v29, %v984_v28  ;;  %v3773_v28 = vsub.f32 %v3703_v50, %v3735_v36 }
  0xe5   : > { %v1354_v58 = vunpack.c.l.b16 %v1220_v0  ;;  %v1420_v21 = vpack.c.bf16 %v1404_v52, %v1404_v52  ;;  %v1038_v33 = vpack.c.bf16 %v990_v57, %v990_v57 }
  0xe6   : > { %v3755_v53 = vpop.f32.mrf.mxu0  ;;  %v968_v30 = vpop.f32.mrf.mxu3  ;;  %v1132_v25 = vpack.c.b16 %v1131_v47, %v1130_v27  ;;  %v1416_v62 = vpack.c.bf16 %v1400_v49, %v1400_v49  ;;  %v1476_v47 = vpack.c.b16 %v1475_v51, %v1474_v7 }
  0xe7   : > { %v1005_v60 = vsub.f32 %v968_v30, %v3681_v3  ;;  %v3760_v37 = vpop.f32.mrf.mxu1  ;;  %v958_v40 = vpop.f32.mrf.mxu2  ;;  %v1554_v6 = vunpack.c.l.b16 %v1420_v21  ;;  %v1190_v49 = vunpack.c.l.b16 %v1038_v33 }
  0xe8   : > { %v1001_v48 = vsub.f32 %v958_v40, %v768_v61  ;;  %1141 = vmatpush.bf16.msrb.mxu3 %v1132_v25  ;;  %v986_v22 = vsub.f32 %v3755_v53, %v3760_v37  ;;  %v1314_v61 = vunpack.c.l.b16 %v1216_v39  ;;  %v1514_v25 = vunpack.c.l.b16 %v1416_v62 }
  0xe9   : > { %v1021_v42 = vsub.f32 %v1005_v60, %v3725_v20  ;;  %v1039_v60 = vpack.c.bf16 %v3773_v28, %v3773_v28 }
  0xea   : > { %v1017_v10 = vsub.f32 %v1001_v48, %v855_v13  ;;  %v1034_v54 = vpack.c.bf16 %v986_v22, %v986_v22 }
  0xeb   : > { %v1221_v56 = vpack.c.bf16 %v1021_v42, %v1021_v42  ;;  %v1405_v9 = vadd.f32 %v1021_v42, %v989_v41  ;;  %3143 = vmatmul.msk.bf16.vlgmr.msrb.gmra.mxu3 %vm712_vm0, %v3686_v26  ;;  %v1171_v41 = vunpack.c.l.b16 %v1037_v15 }
  0xec   : > { %v1217_v59 = vpack.c.bf16 %v1017_v10, %v1017_v10  ;;  %v1401_v17 = vadd.f32 %v1017_v10, %v985_v1  ;;  %v1150_v42 = vunpack.c.l.b16 %v1034_v54 }
  0xed   : > { %v1355_v3 = vunpack.c.l.b16 %v1221_v56  ;;  %v1421_v20 = vpack.c.bf16 %v1405_v9, %v1405_v9 }
  0xee   : > { %v971_v63 = vpop.f32.mrf.mxu3  ;;  %v773_v18 = vpop.f32.mrf.mxu0  ;;  %v1315_v16 = vunpack.c.l.b16 %v1217_v59  ;;  %v1417_v19 = vpack.c.bf16 %v1401_v17, %v1401_v17  ;;  %v3798_v59 = vld [vmem:[%s4502_s5 + $0x10] sm:$0xff] }
  0xef   : > { %v1555_v13 = vunpack.c.l.b16 %v1421_v20  ;;  %v1006_v43 = vsub.f32 %v971_v63, %v3690_v32  ;;  %v1356_v5 = vpack.c.b16 %v1355_v3, %v1354_v58  ;;  %v860_v24 = vpop.f32.mrf.mxu1  ;;  %v961_v27 = vpop.f32.mrf.mxu2  ;;  %v1214_v63 = vpack.c.bf16 %v3733_v35, %v3733_v35 }
  0xf0   : > { %v987_v30 = vsub.f32 %v773_v18, %v860_v24  ;;  %v1316_v1 = vpack.c.b16 %v1315_v16, %v1314_v61  ;;  %v1515_v32 = vunpack.c.l.b16 %v1417_v19  ;;  %v1002_v52 = vsub.f32 %v961_v27, %v3755_v53 }
  0xf1   : > { %v3777_v29 = vsub.f32 %v1006_v43, %v3731_v31  ;;  %1365 = vmatpush.bf16.msra.mxu2 %v1356_v5  ;;  %v1556_v40 = vpack.c.b16 %v1555_v13, %v1554_v6  ;;  %v1170_v31 = vunpack.c.l.b16 %v1036_v45  ;;  %v1191_v53 = vunpack.c.l.b16 %v1039_v60 }
  0xf2   : > { %v1035_v0 = vpack.c.bf16 %v987_v30, %v987_v30  ;;  %1325 = vmatpush.bf16.msra.mxu0 %v1316_v1  ;;  %v1516_v39 = vpack.c.b16 %v1515_v32, %v1514_v25  ;;  %v1018_v7 = vsub.f32 %v1002_v52, %v3760_v37  ;;  %v1294_v16 = vunpack.c.l.b16 %v1214_v63 }
  0xf3   : > { %v3782_v34 = vadd.f32 %v3777_v29, %v990_v57  ;;  %v1172_v9 = vpack.c.b16 %v1171_v41, %v1170_v31  ;;  %v1192_v51 = vpack.c.b16 %v1191_v53, %v1190_v49  ;;  %v1222_v43 = vpack.c.bf16 %v3777_v29, %v3777_v29  ;;  %v3858_v29 = vld [vmem:[%s3843_s20 + $0x8] sm:$0xff] }
  0xf4   : > { %3157 = vmatmul.msk.bf16.vlgmr.msra.gmra.mxu2 %vm712_vm0, %v3699_v55  ;;  %v1151_v48 = vunpack.c.l.b16 %v1035_v0  ;;  %v1218_v38 = vpack.c.bf16 %v1018_v7, %v1018_v7  ;;  %v1402_v46 = vadd.f32 %v1018_v7, %v986_v22  ;;  %v1215_v22 = vpack.c.bf16 %v3740_v23, %v3740_v23 }
  0xf5   : > { %1485 = vmatpush.bf16.msrb.mxu2 %v1476_v47  ;;  %3155 = vmatmul.msk.bf16.vlgmr.msra.gmra.mxu0 %vm712_vm0, %v3699_v55  ;;  %v1374_v5 = vunpack.c.l.b16 %v1222_v43 }
  0xf6   : > { %1445 = vmatpush.bf16.msrb.mxu0 %v1433_v8  ;;  %v1152_v45 = vpack.c.b16 %v1151_v48, %v1150_v42  ;;  %v1334_v21 = vunpack.c.l.b16 %v1218_v38  ;;  %v1418_v3 = vpack.c.bf16 %v1402_v46, %v1402_v46  ;;  %v1295_v23 = vunpack.c.l.b16 %v1215_v22  ;;  %v973_v13 = vpop.f32.mrf.mxu3  ;;  %v3902_v46 = vld [vmem:[%s4502_s5 + $0x18] sm:$0xff] }
  0xf7   : > { %v963_v56 = vpop.f32.mrf.mxu2  ;;  %v1007_v44 = vsub.f32 %v973_v13, %v3703_v50 }
  0xf8   : > { %v1003_v10 = vsub.f32 %v963_v56, %v773_v18  ;;  %1161 = vmatpush.bf16.msra.mxu3 %v1152_v45  ;;  %v1534_v17 = vunpack.c.l.b16 %v1418_v3  ;;  %v1296_v12 = vpack.c.b16 %v1295_v23, %v1294_v16  ;;  %v3930_v23 = vld [vmem:[%s3843_s20 + $0x10] sm:$0xff] }
  0xf9   : > { %1565 = vmatpush.bf16.msra.mxu2 %v1556_v40 }
  0xfa   : > { %1525 = vmatpush.bf16.msra.mxu0 %v1516_v39  ;;  %v1019_v8 = vsub.f32 %v1003_v10, %v860_v24 }
  0xfb   : > { %3144 = vmatmul.msk.bf16.vlgmr.msra.gmra.mxu3 %vm712_vm0, %v3686_v26 }
  0xfc   : > { %1181 = vmatpush.bf16.msrb.mxu3 %v1172_v9  ;;  %v1219_v57 = vpack.c.bf16 %v1019_v8, %v1019_v8  ;;  %v1403_v58 = vadd.f32 %v1019_v8, %v987_v30 }
  0xfe   : > { %v1335_v37 = vunpack.c.l.b16 %v1219_v57  ;;  %v1419_v20 = vpack.c.bf16 %v1403_v58, %v1403_v58 }
 0x100   : > { %1201 = vmatpush.bf16.msra.mxu3 %v1192_v51  ;;  %v1535_v61 = vunpack.c.l.b16 %v1419_v20  ;;  %v1336_v62 = vpack.c.b16 %v1335_v37, %v1334_v21 }
 0x102   : > { %1345 = vmatpush.bf16.msra.mxu1 %v1336_v62  ;;  %v1536_v18 = vpack.c.b16 %v1535_v61, %v1534_v17 }
 0x104   : > { %3165 = vmatmul.msk.bf16.vlgmr.msrb.gmra.mxu2 %vm712_vm0, %v3798_v59 }
 0x105   : > { %3156 = vmatmul.msk.bf16.vlgmr.msra.gmra.mxu1 %vm712_vm0, %v3699_v55  ;;  %3163 = vmatmul.msk.bf16.vlgmr.msrb.gmra.mxu0 %vm712_vm0, %v3798_v59 }
 0x106   : > { %1465 = vmatpush.bf16.msrb.mxu1 %v1456_v14  ;;  %v1023_v14 = vsub.f32 %v1007_v44, %v3735_v36 }
 0x108   : > { %v1223_v35 = vpack.c.bf16 %v1023_v14, %v1023_v14  ;;  %v1407_v36 = vadd.f32 %v1023_v14, %v3773_v28  ;;  %v3852_v28 = vld [vmem:[%s3843_s20] sm:$0xff] }
 0x10a   : > { %1545 = vmatpush.bf16.msra.mxu1 %v1536_v18  ;;  %v1375_v50 = vunpack.c.l.b16 %v1223_v35  ;;  %v1423_v19 = vpack.c.bf16 %v1407_v36, %v1407_v36 }
 0x10b   : > { %3145 = vmatmul.msk.bf16.vlgmr.msrb.gmra.mxu3 %vm712_vm0, %v3686_v26 }
 0x10c   : > { %1305 = vmatpush.bf16.msrb.mxu3 %v1296_v12  ;;  %v1376_v15 = vpack.c.b16 %v1375_v50, %v1374_v5  ;;  %v1575_v2 = vunpack.c.l.b16 %v1423_v19  ;;  %v3940_v12 = vld [vmem:[%s3843_s20 + $0x18] sm:$0xff] }
 0x114   : > { %3169 = vmatmul.msk.bf16.vlgmr.msra.gmra.mxu2 %vm712_vm0, %v3798_v59 }
 0x115   : > { %3164 = vmatmul.msk.bf16.vlgmr.msrb.gmra.mxu1 %vm712_vm0, %v3798_v59  ;;  %3167 = vmatmul.msk.bf16.vlgmr.msra.gmra.mxu0 %vm712_vm0, %v3798_v59 }
 0x11b   : > { %3146 = vmatmul.msk.bf16.vlgmr.msra.gmra.mxu3 %vm712_vm0, %v3686_v26  ;;  %v1422_v26 = vpack.c.bf16 %v3782_v34, %v3782_v34 }
 0x11c   : > { %1385 = vmatpush.bf16.msra.mxu3 %v1376_v15 }
 0x11d   : > { %v1574_v27 = vunpack.c.l.b16 %v1422_v26 }
 0x11f   : > { %v1576_v54 = vpack.c.b16 %v1575_v2, %v1574_v27 }
 0x125   : > { %3168 = vmatmul.msk.bf16.vlgmr.msra.gmra.mxu1 %vm712_vm0, %v3798_v59 }
 0x12b   : > { %3154 = vmatmul.msk.bf16.vlgmr.msrb.gmra.mxu3 %vm712_vm0, %v3699_v55 }
 0x12c   : > { %1505 = vmatpush.bf16.msrb.mxu3 %v1496_v4 }
 0x12e   : > { %v3835_v6 = vpop.f32.mrf.mxu3 }
 0x132   : > { %v3837_v24 = vpop.f32.mrf.mxu0 }
 0x133   : > { %v1592_v11 = vsub.f32 %v3835_v6, %v3837_v24 }
 0x135   : > { %v3855_v47 = vmul.f32 %v1592_v11, %v3852_v28 }
 0x136   : > { %v3849_v4 = vpop.f32.mrf.mxu3 }
 0x137   : > { %v1672_v33 = vpack.c.bf16 %v3855_v47, %v3855_v47 }
 0x139   : > { %v1695_v34 = vunpack.c.l.b16 %v1672_v33 }
 0x13a   : > { %v3860_v30 = vpop.f32.mrf.mxu0 }
 0x13b   : > { %3158 = vmatmul.msk.bf16.vlgmr.msra.gmra.mxu3 %vm712_vm0, %v3699_v55  ;;  %v1593_v1 = vsub.f32 %v3849_v4, %v3860_v30 }
 0x13c   : > { %1585 = vmatpush.bf16.msra.mxu3 %v1576_v54 }
 0x13d   : > { %v3869_v60 = vmul.f32 %v1593_v1, %v3858_v29 }
 0x13e   : > { %v3871_v25 = vpop.f32.mrf.mxu3 }
 0x13f   : > { %v1673_v32 = vpack.c.bf16 %v3869_v60, %v3869_v60 }
 0x141   : > { %v1696_v0 = vunpack.c.l.b16 %v1673_v32 }
 0x142   : > { %v3875_v52 = vpop.f32.mrf.mxu1 }
 0x143   : > { %v1697_v55 = vpack.c.b16 %v1696_v0, %v1695_v34  ;;  %v1594_v31 = vsub.f32 %v3871_v25, %v3875_v52 }
 0x145   : > { %1709 = vmatpush.bf16.msrb.mxu0 %v1697_v55  ;;  %v3882_v41 = vmul.f32 %v1594_v31, %v3852_v28 }
 0x146   : > { %v3877_v40 = vpop.f32.mrf.mxu3 }
 0x147   : > { %v1674_v39 = vpack.c.bf16 %v3882_v41, %v3882_v41 }
 0x148   : > { %3175 = vmatmul.msk.bf16.vlgmr.msrb.gmra.mxu0 %vm712_vm0, %v3902_v46 }
 0x149   : > { %v1718_v45 = vunpack.c.l.b16 %v1674_v39 }
 0x14a   : > { %v3886_v42 = vpop.f32.mrf.mxu1 }
 0x14b   : > { %3166 = vmatmul.msk.bf16.vlgmr.msrb.gmra.mxu3 %vm712_vm0, %v3798_v59  ;;  %v1595_v48 = vsub.f32 %v3877_v40, %v3886_v42 }
 0x14d   : > { %v3893_v53 = vmul.f32 %v1595_v48, %v3858_v29 }
 0x14e   : > { %v1103_v49 = vpop.f32.mrf.mxu3 }
 0x14f   : > { %v1675_v7 = vpack.c.bf16 %v3893_v53, %v3893_v53 }
 0x151   : > { %v1719_v56 = vunpack.c.l.b16 %v1675_v7 }
 0x153   : > { %v1720_v9 = vpack.c.b16 %v1719_v56, %v1718_v45 }
 0x155   : > { %1729 = vmatpush.bf16.msrb.mxu1 %v1720_v9 }
 0x156   : > { %v3897_v10 = vpop.f32.mrf.mxu3 }
 0x158   : > { %v1287_v38 = vpop.f32.mrf.mxu2  ;;  %3176 = vmatmul.msk.bf16.vlgmr.msrb.gmra.mxu1 %vm712_vm0, %v3902_v46 }
 0x159   : > { %v1596_v8 = vsub.f32 %v1103_v49, %v1287_v38 }
 0x15b   : > { %3170 = vmatmul.msk.bf16.vlgmr.msra.gmra.mxu3 %vm712_vm0, %v3798_v59  ;;  %v1644_v57 = vmul.f32 %v1596_v8, %v3852_v28 }
 0x15d   : > { %v1676_v3 = vpack.c.bf16 %v1644_v57, %v1644_v57 }
 0x15e   : > { %v3910_v51 = vpop.f32.mrf.mxu3 }
 0x15f   : > { %v1738_v61 = vunpack.c.l.b16 %v1676_v3 }
 0x160   : > { %v1289_v58 = vpop.f32.mrf.mxu2 }
 0x161   : > { %v1597_v21 = vsub.f32 %v3897_v10, %v1289_v58 }
 0x163   : > { %v3915_v37 = vmul.f32 %v1597_v21, %v3858_v29 }
 0x165   : > { %v1677_v20 = vpack.c.bf16 %v3915_v37, %v3915_v37 }
 0x166   : > { %v3919_v59 = vpop.f32.mrf.mxu3 }
 0x167   : > { %v1739_v62 = vunpack.c.l.b16 %v1677_v20 }
 0x169   : > { %v1740_v22 = vpack.c.b16 %v1739_v62, %v1738_v61 }
 0x16b   : > { %1749 = vmatpush.bf16.msrb.mxu2 %v1740_v22 }
 0x16e   : > { %v3921_v17 = vpop.f32.mrf.mxu3  ;;  %3177 = vmatmul.msk.bf16.vlgmr.msrb.gmra.mxu2 %vm712_vm0, %v3902_v46 }
 0x172   : > { %v3925_v63 = vpop.f32.mrf.mxu0 }
 0x173   : > { %v1600_v18 = vsub.f32 %v3921_v17, %v3925_v63 }
 0x175   : > { %v3937_v44 = vmul.f32 %v1600_v18, %v3930_v23 }
 0x176   : > { %v3932_v13 = vpop.f32.mrf.mxu3 }
 0x177   : > { %v3934_v16 = vpop.f32.mrf.mxu2  ;;  %v1680_v43 = vpack.c.bf16 %v3937_v44, %v3937_v44 }
 0x179   : > { %v1778_v19 = vunpack.c.l.b16 %v1680_v43 }
 0x17a   : > { %v3942_v14 = vpop.f32.mrf.mxu0 }
 0x17b   : > { %v1601_v35 = vsub.f32 %v3932_v13, %v3942_v14 }
 0x17d   : > { %v3949_v50 = vmul.f32 %v1601_v35, %v3940_v12 }
 0x17e   : > { %v3951_v5 = vpop.f32.mrf.mxu3 }
 0x17f   : > { %v3953_v15 = vpop.f32.mrf.mxu2  ;;  %v1681_v36 = vpack.c.bf16 %v3949_v50, %v3949_v50 }
 0x181   : > { %v1779_v26 = vunpack.c.l.b16 %v1681_v36 }
 0x182   : > { %v3957_v11 = vpop.f32.mrf.mxu1  ;;  %v1447_v2 = vpop.f32.mrf.mxu0 }
 0x183   : > { %v1780_v27 = vpack.c.b16 %v1779_v26, %v1778_v19  ;;  %v1608_v54 = vsub.f32 %v1447_v2, %v3835_v6  ;;  %v1602_v1 = vsub.f32 %v3951_v5, %v3957_v11 }
 0x185   : > { %1789 = vmatpush.bf16.msra.mxu0 %v1780_v27  ;;  %v1624_v0 = vsub.f32 %v1608_v54, %v3837_v24  ;;  %v3968_v55 = vmul.f32 %v1602_v1, %v3930_v23 }
 0x186   : > { %v3962_v33 = vpop.f32.mrf.mxu3 }
 0x187   : > { %v1487_v32 = vpop.f32.mrf.mxu2  ;;  %v1682_v45 = vpack.c.bf16 %v3968_v55, %v3968_v55 }
 0x188   : > { %v1612_v34 = vsub.f32 %v1487_v32, %v1103_v49  ;;  %3179 = vmatmul.msk.bf16.vlgmr.msra.gmra.mxu0 %vm712_vm0, %v3902_v46  ;;  %v1656_v49 = vmul.f32 %v1624_v0, %v3852_v28 }
 0x189   : > { %v1798_v62 = vunpack.c.l.b16 %v1682_v45 }
 0x18a   : > { %v1628_v31 = vsub.f32 %v1612_v34, %v1287_v38  ;;  %v3970_v48 = vpop.f32.mrf.mxu1  ;;  %v1449_v6 = vpop.f32.mrf.mxu0  ;;  %v1856_v20 = vpack.c.bf16 %v1656_v49, %v1656_v49 }
 0x18b   : > { %v1603_v7 = vsub.f32 %v3962_v33, %v3970_v48  ;;  %v1609_v24 = vsub.f32 %v1449_v6, %v3849_v4 }
 0x18c   : > { %v3973_v39 = vmul.f32 %v1628_v31, %v3852_v28  ;;  %v1879_v26 = vunpack.c.l.b16 %v1856_v20 }
 0x18d   : > { %v3983_v9 = vmul.f32 %v1603_v7, %v3940_v12  ;;  %v1625_v38 = vsub.f32 %v1609_v24, %v3860_v30  ;;  %v4003_v7 = vld [vmem:[%s4502_s5 + $0x20] sm:$0xff] }
 0x18e   : > { %v2044_v56 = vadd.f32 %v3973_v39, %v1644_v57  ;;  %v1183_v8 = vpop.f32.mrf.mxu3 }
 0x18f   : > { %v1489_v21 = vpop.f32.mrf.mxu2  ;;  %v1683_v3 = vpack.c.bf16 %v3983_v9, %v3983_v9  ;;  %v1657_v61 = vmul.f32 %v1625_v38, %v3858_v29  ;;  %v1604_v57 = vsub.f32 %v1183_v8, %v3934_v16 }
 0x190   : > { %v1613_v4 = vsub.f32 %v1489_v21, %v3897_v10  ;;  %v2060_v0 = vpack.c.bf16 %v2044_v56, %v2044_v56 }
 0x191   : > { %v1799_v22 = vunpack.c.l.b16 %v1683_v3  ;;  %v1857_v18 = vpack.c.bf16 %v1657_v61, %v1657_v61  ;;  %v3995_v10 = vmul.f32 %v1604_v57, %v3930_v23  ;;  %v2041_v20 = vadd.f32 %v1657_v61, %v3869_v60 }
 0x192   : > { %v1629_v35 = vsub.f32 %v1613_v4, %v1289_v58  ;;  %v1467_v43 = vpop.f32.mrf.mxu1  ;;  %v1527_v36 = vpop.f32.mrf.mxu0  ;;  %v4018_v3 = vunpack.c.l.b16 %v2060_v0 }
 0x193   : > { %v1610_v30 = vsub.f32 %v1467_v43, %v3871_v25  ;;  %v1800_v19 = vpack.c.b16 %v1799_v22, %v1798_v62  ;;  %v1880_v2 = vunpack.c.l.b16 %v1857_v18  ;;  %v1616_v54 = vsub.f32 %v1527_v36, %v3921_v17 }
 0x194   : > { %v1661_v27 = vmul.f32 %v1629_v35, %v3858_v29  ;;  %v1684_v45 = vpack.c.bf16 %v3995_v10, %v3995_v10 }
 0x195   : > { %1809 = vmatpush.bf16.msra.mxu1 %v1800_v19  ;;  %v1881_v58 = vpack.c.b16 %v1880_v2, %v1879_v26  ;;  %v1626_v31 = vsub.f32 %v1610_v30, %v3875_v52  ;;  %v1632_v24 = vsub.f32 %v1616_v54, %v3925_v63  ;;  %v1860_v63 = vpack.c.bf16 %v3973_v39, %v3973_v39 }
 0x196   : > { %v2045_v1 = vadd.f32 %v1661_v27, %v3915_v37  ;;  %v1185_v32 = vpop.f32.mrf.mxu3  ;;  %v1861_v37 = vpack.c.bf16 %v1661_v27, %v1661_v27  ;;  %v2040_v39 = vadd.f32 %v1656_v49, %v3855_v47  ;;  %v1818_v61 = vunpack.c.l.b16 %v1684_v45 }
 0x197   : > { %v1567_v34 = vpop.f32.mrf.mxu2  ;;  %v1605_v25 = vsub.f32 %v1185_v32, %v3953_v15  ;;  %1893 = vmatpush.bf16.msrb.mxu0 %v1881_v58  ;;  %v4022_v4 = vmul.f32 %v1626_v31, %v3852_v28  ;;  %v1664_v62 = vmul.f32 %v1632_v24, %v3930_v23  ;;  %v1922_v26 = vunpack.c.l.b16 %v1860_v63 }
 0x198   : > { %v1620_v6 = vsub.f32 %v1567_v34, %v1183_v8  ;;  %v2061_v17 = vpack.c.bf16 %v2045_v1, %v2045_v1  ;;  %3180 = vmatmul.msk.bf16.vlgmr.msra.gmra.mxu1 %vm712_vm0, %v3902_v46  ;;  %v1923_v57 = vunpack.c.l.b16 %v1861_v37  ;;  %v2056_v0 = vpack.c.bf16 %v2040_v39, %v2040_v39 }
 0x199   : > { %v4013_v56 = vmul.f32 %v1605_v25, %v3940_v12  ;;  %v1858_v47 = vpack.c.bf16 %v4022_v4, %v4022_v4  ;;  %v1864_v49 = vpack.c.bf16 %v1664_v62, %v1664_v62  ;;  %v2048_v1 = vadd.f32 %v1664_v62, %v3937_v44 }
 0x19a   : > { %v4010_v52 = vunpack.c.l.b16 %v2061_v17  ;;  %v1636_v38 = vsub.f32 %v1620_v6, %v3934_v16  ;;  %v1469_v8 = vpop.f32.mrf.mxu1  ;;  %v1529_v21 = vpop.f32.mrf.mxu0  ;;  %3187 = vmatmul.msk.bf16.vlgmr.msrb.gmra.mxu0 %vm712_vm0, %v4003_v7  ;;  %v1924_v58 = vpack.c.b16 %v1923_v57, %v1922_v26 }
 0x19b   : > { %v1685_v16 = vpack.c.bf16 %v4013_v56, %v4013_v56  ;;  %v1611_v22 = vsub.f32 %v1469_v8, %v3877_v40  ;;  %v1617_v18 = vsub.f32 %v1529_v21, %v3932_v13  ;;  %v2057_v40 = vpack.c.bf16 %v2041_v20, %v2041_v20 }
 0x19c   : > { %v2124_v60 = vpack.c.b16 %v4010_v52, %v4018_v3  ;;  %v4035_v43 = vmul.f32 %v1636_v38, %v3930_v23  ;;  %v1902_v37 = vunpack.c.l.b16 %v1858_v47  ;;  %v1962_v45 = vunpack.c.l.b16 %v1864_v49 }
 0x19d   : > { %v1819_v35 = vunpack.c.l.b16 %v1685_v16  ;;  %v1627_v36 = vsub.f32 %v1611_v22, %v3886_v42  ;;  %v1633_v13 = vsub.f32 %v1617_v18, %v3942_v14  ;;  %v2080_v44 = vunpack.c.l.b16 %v2057_v40 }
 0x19e   : > { %v4038_v30 = vpop.f32.mrf.mxu3  ;;  %v1868_v31 = vpack.c.bf16 %v4035_v43, %v4035_v43  ;;  %v2064_v38 = vpack.c.bf16 %v2048_v1, %v2048_v1  ;;  %v2079_v20 = vunpack.c.l.b16 %v2056_v0  ;;  %v2052_v3 = vadd.f32 %v4035_v43, %v3995_v10 }
 0x19f   : > { %v1569_v19 = vpop.f32.mrf.mxu2  ;;  %v1659_v27 = vmul.f32 %v1627_v36, %v3858_v29  ;;  %v1820_v54 = vpack.c.b16 %v1819_v35, %v1818_v61  ;;  %v1665_v34 = vmul.f32 %v1633_v13, %v3940_v12 }
 0x1a0   : > { %v1621_v2 = vsub.f32 %v1569_v19, %v1185_v32  ;;  %v2002_v62 = vunpack.c.l.b16 %v1868_v31  ;;  %v2081_v57 = vpack.c.b16 %v2080_v44, %v2079_v20  ;;  %v2162_v61 = vunpack.c.l.b16 %v2064_v38 }
 0x1a1   : > { %v1859_v14 = vpack.c.bf16 %v1659_v27, %v1659_v27  ;;  %1829 = vmatpush.bf16.msra.mxu2 %v1820_v54  ;;  %v1865_v25 = vpack.c.bf16 %v1665_v34, %v1665_v34  ;;  %v2049_v6 = vadd.f32 %v1665_v34, %v3949_v50  ;;  %v2043_v36 = vadd.f32 %v1659_v27, %v3893_v53 }
 0x1a2   : > { %v1637_v42 = vsub.f32 %v1621_v2, %v3953_v15  ;;  %v1547_v32 = vpop.f32.mrf.mxu1 }
 0x1a3   : > { %v1618_v24 = vsub.f32 %v1547_v32, %v3951_v5  ;;  %v1903_v15 = vunpack.c.l.b16 %v1859_v14  ;;  %v1963_v8 = vunpack.c.l.b16 %v1865_v25  ;;  %v2065_v21 = vpack.c.bf16 %v2049_v6, %v2049_v6 }
 0x1a4   : > { %v1669_v17 = vmul.f32 %v1637_v42, %v3940_v12  ;;  %3181 = vmatmul.msk.bf16.vlgmr.msra.gmra.mxu2 %vm712_vm0, %v3902_v46  ;;  %v2059_v53 = vpack.c.bf16 %v2043_v36, %v2043_v36 }
 0x1a5   : > { %1933 = vmatpush.bf16.msrb.mxu2 %v1924_v58  ;;  %v1904_v50 = vpack.c.b16 %v1903_v15, %v1902_v37  ;;  %v2163_v22 = vunpack.c.l.b16 %v2065_v21  ;;  %v1634_v5 = vsub.f32 %v1618_v24, %v3957_v11  ;;  %v1964_v39 = vpack.c.b16 %v1963_v8, %v1962_v45  ;;  %v4087_v37 = vld [vmem:[%s4502_s5 + $0x28] sm:$0xff] }
 0x1a6   : > { %v1869_v63 = vpack.c.bf16 %v1669_v17, %v1669_v17  ;;  %v4054_v16 = vpop.f32.mrf.mxu3  ;;  %v2042_v11 = vadd.f32 %v4022_v4, %v3882_v41  ;;  %v2103_v4 = vunpack.c.l.b16 %v2059_v53  ;;  %v2053_v24 = vadd.f32 %v1669_v17, %v4013_v56 }
 0x1a7   : > { %1913 = vmatpush.bf16.msrb.mxu1 %v1904_v50  ;;  %1973 = vmatpush.bf16.msra.mxu0 %v1964_v39  ;;  %v1666_v26 = vmul.f32 %v1634_v5, %v3930_v23  ;;  %v2164_v13 = vpack.c.b16 %v2163_v22, %v2162_v61  ;;  %v2068_v8 = vpack.c.bf16 %v2052_v3, %v2052_v3 }
 0x1a8   : > { %v2003_v18 = vunpack.c.l.b16 %v1869_v63  ;;  %v2058_v27 = vpack.c.bf16 %v2042_v11, %v2042_v11  ;;  %v2069_v56 = vpack.c.bf16 %v2053_v24, %v2053_v24 }
 0x1a9   : > { %v1866_v49 = vpack.c.bf16 %v1666_v26, %v1666_v26  ;;  %v2050_v54 = vadd.f32 %v1666_v26, %v3968_v55  ;;  %v2202_v10 = vunpack.c.l.b16 %v2068_v8 }
 0x1aa   : > { %v2004_v35 = vpack.c.b16 %v2003_v18, %v2002_v62  ;;  %v1549_v19 = vpop.f32.mrf.mxu1  ;;  %3188 = vmatmul.msk.bf16.vlgmr.msrb.gmra.mxu1 %vm712_vm0, %v4003_v7  ;;  %3191 = vmatmul.msk.bf16.vlgmr.msra.gmra.mxu0 %vm712_vm0, %v4003_v7  ;;  %v2102_v0 = vunpack.c.l.b16 %v2058_v27  ;;  %v2203_v20 = vunpack.c.l.b16 %v2069_v56  ;;  %v3261_v56 = vld [vmem:[%s4503_s6 + $0x18] sm:$0xff] }
 0x1ab   : > { %2093 = vmatpush.bf16.msrb.mxu0 %v2081_v57  ;;  %v1619_v40 = vsub.f32 %v1549_v19, %v3962_v33  ;;  %v1982_v42 = vunpack.c.l.b16 %v1866_v49  ;;  %v2066_v31 = vpack.c.bf16 %v2050_v54, %v2050_v54 }
 0x1ac   : > { %2013 = vmatpush.bf16.msra.mxu2 %v2004_v35  ;;  %v2104_v25 = vpack.c.b16 %v2103_v4, %v2102_v0  ;;  %v2204_v43 = vpack.c.b16 %v2203_v20, %v2202_v10 }
 0x1ad   : > { %v1635_v2 = vsub.f32 %v1619_v40, %v3970_v48  ;;  %v2182_v44 = vunpack.c.l.b16 %v2066_v31 }
 0x1ae   : > { %v4067_v47 = vpop.f32.mrf.mxu3 }
 0x1af   : > { %2173 = vmatpush.bf16.msra.mxu0 %v2164_v13  ;;  %v1667_v33 = vmul.f32 %v1635_v2, %v3940_v12  ;;  %v1598_v41 = vsub.f32 %v3910_v51, %v4067_v47 }
 0x1b1   : > { %v1867_v1 = vpack.c.bf16 %v1667_v33, %v1667_v33  ;;  %v2051_v34 = vadd.f32 %v1667_v33, %v3983_v9  ;;  %v4075_v14 = vmul.f32 %v1598_v41, %v3852_v28 }
 0x1b3   : > { %v1983_v58 = vunpack.c.l.b16 %v1867_v1  ;;  %v2067_v48 = vpack.c.bf16 %v2051_v34, %v2051_v34  ;;  %v1678_v45 = vpack.c.bf16 %v4075_v14, %v4075_v14 }
 0x1b4   : > { %3189 = vmatmul.msk.bf16.vlgmr.msrb.gmra.mxu2 %vm712_vm0, %v4003_v7 }
 0x1b5   : > { %v1984_v32 = vpack.c.b16 %v1983_v58, %v1982_v42  ;;  %v2183_v55 = vunpack.c.l.b16 %v2067_v48  ;;  %2133 = vmatpush.bf16.msrb.mxu2 %v2124_v60  ;;  %v1758_v17 = vunpack.c.l.b16 %v1678_v45 }
 0x1b6   : > { %v1309_v9 = vpop.f32.mrf.mxu3 }
 0x1b7   : > { %v1599_v6 = vsub.f32 %v3919_v59, %v1309_v9  ;;  %1993 = vmatpush.bf16.msra.mxu1 %v1984_v32  ;;  %v2184_v60 = vpack.c.b16 %v2183_v55, %v2182_v44 }
 0x1b9   : > { %v1647_v52 = vmul.f32 %v1599_v6, %v3858_v29 }
 0x1ba   : > { %3192 = vmatmul.msk.bf16.vlgmr.msra.gmra.mxu1 %vm712_vm0, %v4003_v7  ;;  %3199 = vmatmul.msk.bf16.vlgmr.msrb.gmra.mxu0 %vm712_vm0, %v4087_v37 }
 0x1bb   : > { %2113 = vmatpush.bf16.msrb.mxu1 %v2104_v25  ;;  %v1679_v15 = vpack.c.bf16 %v1647_v52, %v1647_v52  ;;  %2333 = vmatpush.bf16.msrb.mxu0 %v3261_v56 }
 0x1bd   : > { %v1759_v38 = vunpack.c.l.b16 %v1679_v15 }
 0x1be   : > { %v1387_v21 = vpop.f32.mrf.mxu3 }
 0x1bf   : > { %2193 = vmatpush.bf16.msra.mxu1 %v2184_v60  ;;  %v1760_v63 = vpack.c.b16 %v1759_v38, %v1758_v17  ;;  %v1606_v62 = vsub.f32 %v4038_v30, %v1387_v21 }
 0x1c1   : > { %1769 = vmatpush.bf16.msrb.mxu3 %v1760_v63  ;;  %v1654_v50 = vmul.f32 %v1606_v62, %v3930_v23 }
 0x1c3   : > { %v1686_v5 = vpack.c.bf16 %v1654_v50, %v1654_v50 }
 0x1c4   : > { %3178 = vmatmul.msk.bf16.vlgmr.msrb.gmra.mxu3 %vm712_vm0, %v3902_v46  ;;  %3193 = vmatmul.msk.bf16.vlgmr.msra.gmra.mxu2 %vm712_vm0, %v4003_v7 }
 0x1c5   : > { %2213 = vmatpush.bf16.msra.mxu2 %v2204_v43  ;;  %v1838_v61 = vunpack.c.l.b16 %v1686_v5  ;;  %v1711_v3 = vpop.f32.mrf.mxu0 }
 0x1c6   : > { %v1389_v22 = vpop.f32.mrf.mxu3 }
 0x1c7   : > { %v1607_v18 = vsub.f32 %v4054_v16, %v1389_v22 }
 0x1c9   : > { %v1655_v39 = vmul.f32 %v1607_v18, %v3940_v12  ;;  %v3262_v18 = vld [vmem:[%s4503_s6 + $0x20] sm:$0xff] }
 0x1ca   : > { %3200 = vmatmul.msk.bf16.vlgmr.msrb.gmra.mxu1 %vm712_vm0, %v4087_v37  ;;  %3203 = vmatmul.msk.bf16.vlgmr.msra.gmra.mxu0 %vm712_vm0, %v4087_v37 }
 0x1cb   : > { %v1687_v57 = vpack.c.bf16 %v1655_v39, %v1655_v39  ;;  %2420 = vmatpush.bf16.msrb.mxu1 %v3262_v18 }
 0x1cd   : > { %v1839_v35 = vunpack.c.l.b16 %v1687_v57 }
 0x1ce   : > { %v1507_v36 = vpop.f32.mrf.mxu3 }
 0x1cf   : > { %v1614_v19 = vsub.f32 %v1507_v36, %v3910_v51  ;;  %v1840_v26 = vpack.c.b16 %v1839_v35, %v1838_v61 }
 0x1d1   : > { %1849 = vmatpush.bf16.msra.mxu3 %v1840_v26  ;;  %v1630_v40 = vsub.f32 %v1614_v19, %v4067_v47 }
 0x1d3   : > { %v1662_v11 = vmul.f32 %v1630_v40, %v3852_v28 }
 0x1d4   : > { %3182 = vmatmul.msk.bf16.vlgmr.msra.gmra.mxu3 %vm712_vm0, %v3902_v46  ;;  %3201 = vmatmul.msk.bf16.vlgmr.msrb.gmra.mxu2 %vm712_vm0, %v4087_v37 }
 0x1d5   : > { %v1862_v49 = vpack.c.bf16 %v1662_v11, %v1662_v11  ;;  %v2046_v4 = vadd.f32 %v1662_v11, %v4075_v14  ;;  %v4132_v15 = vpop.f32.mrf.mxu1 }
 0x1d6   : > { %v1509_v13 = vpop.f32.mrf.mxu3 }
 0x1d7   : > { %v1615_v2 = vsub.f32 %v1509_v13, %v3919_v59  ;;  %v1942_v27 = vunpack.c.l.b16 %v1862_v49  ;;  %v2062_v31 = vpack.c.bf16 %v2046_v4, %v2046_v4 }
 0x1d9   : > { %v1631_v53 = vsub.f32 %v1615_v2, %v1309_v9  ;;  %v2142_v44 = vunpack.c.l.b16 %v2062_v31 }
 0x1da   : > { %3204 = vmatmul.msk.bf16.vlgmr.msra.gmra.mxu1 %vm712_vm0, %v4087_v37 }
 0x1db   : > { %v1663_v33 = vmul.f32 %v1631_v53, %v3858_v29 }
 0x1dd   : > { %v1863_v51 = vpack.c.bf16 %v1663_v33, %v1663_v33  ;;  %v2047_v59 = vadd.f32 %v1663_v33, %v1647_v52  ;;  %v4139_v38 = vpop.f32.mrf.mxu1 }
 0x1de   : > { %v1587_v47 = vpop.f32.mrf.mxu3 }
 0x1df   : > { %v1943_v54 = vunpack.c.l.b16 %v1863_v51  ;;  %v1622_v46 = vsub.f32 %v1587_v47, %v4038_v30  ;;  %v2063_v30 = vpack.c.bf16 %v2047_v59, %v2047_v59 }
 0x1e1   : > { %v1638_v1 = vsub.f32 %v1622_v46, %v1387_v21  ;;  %v1944_v34 = vpack.c.b16 %v1943_v54, %v1942_v27  ;;  %v2143_v9 = vunpack.c.l.b16 %v2063_v30 }
 0x1e3   : > { %1953 = vmatpush.bf16.msrb.mxu3 %v1944_v34  ;;  %v1670_v28 = vmul.f32 %v1638_v1, %v3930_v23  ;;  %v2144_v14 = vpack.c.b16 %v2143_v9, %v2142_v44 }
 0x1e4   : > { %3205 = vmatmul.msk.bf16.vlgmr.msra.gmra.mxu2 %vm712_vm0, %v4087_v37 }
 0x1e5   : > { %v2054_v42 = vadd.f32 %v1670_v28, %v1654_v50  ;;  %v1870_v48 = vpack.c.bf16 %v1670_v28, %v1670_v28 }
 0x1e6   : > { %v1589_v41 = vpop.f32.mrf.mxu3  ;;  %3190 = vmatmul.msk.bf16.vlgmr.msrb.gmra.mxu3 %vm712_vm0, %v4003_v7 }
 0x1e7   : > { %v1623_v29 = vsub.f32 %v1589_v41, %v4054_v16  ;;  %v2070_v23 = vpack.c.bf16 %v2054_v42, %v2054_v42  ;;  %v2022_v25 = vunpack.c.l.b16 %v1870_v48 }
 0x1e9   : > { %v1639_v58 = vsub.f32 %v1623_v29, %v1389_v22  ;;  %v2222_v45 = vunpack.c.l.b16 %v2070_v23 }
 0x1eb   : > { %v1671_v0 = vmul.f32 %v1639_v58, %v3940_v12  ;;  %v1713_v12 = vpop.f32.mrf.mxu0 }
 0x1ed   : > { %v1871_v32 = vpack.c.bf16 %v1671_v0, %v1671_v0  ;;  %v2055_v55 = vadd.f32 %v1671_v0, %v1655_v39 }
 0x1ef   : > { %v2023_v6 = vunpack.c.l.b16 %v1871_v32  ;;  %v2071_v24 = vpack.c.bf16 %v2055_v55, %v2055_v55 }
 0x1f1   : > { %v2223_v52 = vunpack.c.l.b16 %v2071_v24  ;;  %v2024_v16 = vpack.c.b16 %v2023_v6, %v2022_v25  ;;  %v4143_v21 = vpop.f32.mrf.mxu2 }
 0x1f3   : > { %2033 = vmatpush.bf16.msra.mxu3 %v2024_v16  ;;  %v2224_v60 = vpack.c.b16 %v2223_v52, %v2222_v45 }
 0x1f6   : > { %3194 = vmatmul.msk.bf16.vlgmr.msra.gmra.mxu3 %vm712_vm0, %v4003_v7 }
 0x1f7   : > { %2153 = vmatpush.bf16.msrb.mxu3 %v2144_v14 }
 0x1f9   : > { %v4149_v20 = vpop.f32.mrf.mxu2 }
 0x1fb   : > { %2233 = vmatpush.bf16.msra.mxu3 %v2224_v60 }
 0x205   : > { %v1791_v17 = vpop.f32.mrf.mxu0 }
 0x206   : > { %3202 = vmatmul.msk.bf16.vlgmr.msrb.gmra.mxu3 %vm712_vm0, %v4087_v37 }
 0x20d   : > { %v4141_v8 = vpop.f32.mrf.mxu0 }
 0x215   : > { %v4145_v7 = vpop.f32.mrf.mxu1 }
 0x216   : > { %3206 = vmatmul.msk.bf16.vlgmr.msra.gmra.mxu3 %vm712_vm0, %v4087_v37  ;;  %v3263_v37 = vld [vmem:[%s4503_s6 + $0x28] sm:$0xff] }
 0x217   : > { %v1895_v63 = vpop.f32.mrf.mxu0  ;;  %2523 = vmatpush.bf16.msrb.mxu2 %v3263_v37 }
 0x218   : > { %v2240_v43 = vsub.f32 %v1711_v3, %v1895_v63 }
 0x21d   : > { %v4151_v62 = vpop.f32.mrf.mxu1 }
 0x21f   : > { %v1897_v10 = vpop.f32.mrf.mxu0 }
 0x220   : > { %v2241_v50 = vsub.f32 %v1713_v12, %v1897_v10 }
 0x222   : > { %v2288_v22 = vpack.c.bf16 %v2241_v50, %v2240_v43 }
 0x224   : > { %3211 = vmatmul.msk.bf16.vlgmr.msrb.gmra.mxu0 %vm712_vm0, %v2288_v22 }
 0x227   : > { %v4160_v5 = vpop.f32.mrf.mxu2  ;;  %v1915_v39 = vpop.f32.mrf.mxu1 }
 0x228   : > { %v1975_v57 = vpop.f32.mrf.mxu0  ;;  %v2242_v19 = vsub.f32 %v4132_v15, %v1915_v39 }
 0x229   : > { %v4162_v61 = vsub.f32 %v1791_v17, %v1975_v57 }
 0x22f   : > { %v4164_v35 = vpop.f32.mrf.mxu2  ;;  %v1917_v36 = vpop.f32.mrf.mxu1 }
 0x230   : > { %v2243_v26 = vsub.f32 %v4139_v38, %v1917_v36  ;;  %v1977_v40 = vpop.f32.mrf.mxu0 }
 0x231   : > { %v4169_v13 = vsub.f32 %v4141_v8, %v1977_v40 }
 0x232   : > { %v2289_v11 = vpack.c.bf16 %v2243_v26, %v2242_v19 }
 0x233   : > { %v2292_v2 = vpack.c.bf16 %v4169_v13, %v4162_v61 }
 0x234   : > { %3212 = vmatmul.msk.bf16.gmra.mxu0 %vm712_vm0, %v2289_v11 }
 0x237   : > { %v1935_v53 = vpop.f32.mrf.mxu2  ;;  %v1995_v49 = vpop.f32.mrf.mxu1 }
 0x238   : > { %v4175_v33 = vsub.f32 %v4145_v7, %v1995_v49  ;;  %v2095_v51 = vpop.f32.mrf.mxu0  ;;  %v2244_v46 = vsub.f32 %v4143_v21, %v1935_v53 }
 0x239   : > { %v2256_v47 = vsub.f32 %v2095_v51, %v1711_v3 }
 0x23b   : > { %v2272_v59 = vsub.f32 %v2256_v47, %v1895_v63 }
 0x23d   : > { %v2462_v58 = vadd.f32 %v2272_v59, %v2240_v43 }
 0x23f   : > { %v1937_v27 = vpop.f32.mrf.mxu2  ;;  %v1997_v54 = vpop.f32.mrf.mxu1 }
 0x240   : > { %v2245_v1 = vsub.f32 %v4149_v20, %v1937_v27  ;;  %v4180_v34 = vsub.f32 %v4151_v62, %v1997_v54  ;;  %v2097_v28 = vpop.f32.mrf.mxu0 }
 0x241   : > { %v2257_v41 = vsub.f32 %v2097_v28, %v1713_v12 }
 0x242   : > { %v2290_v29 = vpack.c.bf16 %v2245_v1, %v2244_v46  ;;  %v2293_v4 = vpack.c.bf16 %v4180_v34, %v4175_v33 }
 0x243   : > { %v2273_v42 = vsub.f32 %v2257_v41, %v1897_v10 }
 0x244   : > { %3213 = vmatmul.msk.bf16.gmra.mxu0 %vm712_vm0, %v2290_v29 }
 0x245   : > { %v2375_v30 = vpack.c.bf16 %v2273_v42, %v2272_v59  ;;  %v2463_v48 = vadd.f32 %v2273_v42, %v2241_v50 }
 0x247   : > { %v4185_v0 = vpop.f32.mrf.mxu3  ;;  %v2478_v31 = vpack.c.bf16 %v2463_v48, %v2462_v58  ;;  %3223 = vmatmul.msk.bf16.vlgmr.msrb.gmra.mxu1 %vm712_vm0, %v2375_v30  ;;  %v2015_v23 = vpop.f32.mrf.mxu2 }
 0x248   : > { %v2115_v32 = vpop.f32.mrf.mxu1  ;;  %v4189_v55 = vsub.f32 %v4160_v5, %v2015_v23  ;;  %v2175_v9 = vpop.f32.mrf.mxu0 }
 0x249   : > { %v2264_v25 = vsub.f32 %v2175_v9, %v1791_v17  ;;  %3235 = vmatmul.msk.bf16.vlgmr.msrb.gmra.mxu2 %vm712_vm0, %v2478_v31  ;;  %v2258_v24 = vsub.f32 %v2115_v32, %v4132_v15 }
 0x24b   : > { %v4192_v6 = vsub.f32 %v2264_v25, %v1975_v57  ;;  %v2274_v3 = vsub.f32 %v2258_v24, %v1915_v39 }
 0x24d   : > { %v4197_v44 = vadd.f32 %v4192_v6, %v4162_v61  ;;  %v2464_v10 = vadd.f32 %v2274_v3, %v2242_v19 }
 0x24f   : > { %v4199_v45 = vpop.f32.mrf.mxu3  ;;  %v2017_v52 = vpop.f32.mrf.mxu2 }
 0x250   : > { %v2117_v16 = vpop.f32.mrf.mxu1  ;;  %v4202_v14 = vsub.f32 %v4164_v35, %v2017_v52  ;;  %v2177_v12 = vpop.f32.mrf.mxu0 }
 0x251   : > { %v2259_v60 = vsub.f32 %v2117_v16, %v4139_v38  ;;  %v2265_v56 = vsub.f32 %v2177_v12, %v4141_v8 }
 0x252   : > { %v2294_v15 = vpack.c.bf16 %v4202_v14, %v4189_v55 }
 0x253   : > { %v2275_v17 = vsub.f32 %v2259_v60, %v1917_v36  ;;  %v4208_v63 = vsub.f32 %v2265_v56, %v1977_v40 }
 0x255   : > { %v2376_v43 = vpack.c.bf16 %v2275_v17, %v2274_v3  ;;  %v2465_v50 = vadd.f32 %v2275_v17, %v2243_v26  ;;  %v2379_v22 = vpack.c.bf16 %v4208_v63, %v4192_v6  ;;  %v4214_v18 = vadd.f32 %v4208_v63, %v4169_v13 }
 0x257   : > { %v2479_v38 = vpack.c.bf16 %v2465_v50, %v2464_v10  ;;  %v4216_v37 = vpop.f32.mrf.mxu3  ;;  %v2482_v8 = vpack.c.bf16 %v4214_v18, %v4197_v44  ;;  %3224 = vmatmul.msk.bf16.gmra.mxu1 %vm712_vm0, %v2376_v43  ;;  %v2135_v39 = vpop.f32.mrf.mxu2 }
 0x258   : > { %v2195_v57 = vpop.f32.mrf.mxu1  ;;  %v2260_v26 = vsub.f32 %v2135_v39, %v4143_v21 }
 0x259   : > { %v2266_v36 = vsub.f32 %v2195_v57, %v4145_v7  ;;  %3236 = vmatmul.msk.bf16.gmra.mxu2 %vm712_vm0, %v2479_v38 }
 0x25a   : > { %v2276_v11 = vsub.f32 %v2260_v26, %v1935_v53 }
 0x25b   : > { %v4223_v19 = vsub.f32 %v2266_v36, %v1995_v49 }
 0x25c   : > { %v2466_v42 = vadd.f32 %v2276_v11, %v2244_v46 }
 0x25d   : > { %v4228_v40 = vadd.f32 %v4223_v19, %v4175_v33 }
 0x25f   : > { %v2137_v51 = vpop.f32.mrf.mxu2  ;;  %v1853_v41 = vpop.f32.mrf.mxu3 }
 0x260   : > { %v2197_v47 = vpop.f32.mrf.mxu1  ;;  %v2261_v28 = vsub.f32 %v2137_v51, %v4149_v20 }
 0x261   : > { %v2267_v59 = vsub.f32 %v2197_v47, %v4151_v62 }
 0x262   : > { %v2277_v29 = vsub.f32 %v2261_v28, %v1937_v27 }
 0x263   : > { %v2283_v7 = vsub.f32 %v2267_v59, %v1997_v54 }
 0x264   : > { %v2377_v58 = vpack.c.bf16 %v2277_v29, %v2276_v11  ;;  %v2467_v49 = vadd.f32 %v2277_v29, %v2245_v1 }
 0x265   : > { %v2380_v30 = vpack.c.bf16 %v2283_v7, %v4223_v19  ;;  %v2473_v21 = vadd.f32 %v2283_v7, %v4180_v34 }
 0x266   : > { %v2480_v48 = vpack.c.bf16 %v2467_v49, %v2466_v42 }
 0x267   : > { %v2483_v31 = vpack.c.bf16 %v2473_v21, %v4228_v40  ;;  %3225 = vmatmul.msk.bf16.gmra.mxu1 %vm712_vm0, %v2377_v58  ;;  %v2215_v53 = vpop.f32.mrf.mxu2 }
 0x268   : > { %v2268_v20 = vsub.f32 %v2215_v53, %v4160_v5 }
 0x269   : > { %v1955_v32 = vpop.f32.mrf.mxu3  ;;  %3237 = vmatmul.msk.bf16.gmra.mxu2 %vm712_vm0, %v2480_v48 }
 0x26a   : > { %v2284_v62 = vsub.f32 %v2268_v20, %v2015_v23  ;;  %v2246_v9 = vsub.f32 %v4185_v0, %v1955_v32 }
 0x26c   : > { %v2474_v27 = vadd.f32 %v2284_v62, %v4189_v55 }
 0x26f   : > { %v2217_v54 = vpop.f32.mrf.mxu2 }
 0x270   : > { %v2269_v46 = vsub.f32 %v2217_v54, %v4164_v35 }
 0x271   : > { %v1957_v1 = vpop.f32.mrf.mxu3 }
 0x272   : > { %v2247_v25 = vsub.f32 %v4199_v45, %v1957_v1  ;;  %v2285_v24 = vsub.f32 %v2269_v46, %v2017_v52  ;;  %v4292_v46 = vld [vmem:[%s3436_s9 + $0x10] sm:$0xff] }
 0x274   : > { %v2291_v16 = vpack.c.bf16 %v2247_v25, %v2246_v9  ;;  %v2381_v3 = vpack.c.bf16 %v2285_v24, %v2284_v62  ;;  %v2475_v60 = vadd.f32 %v2285_v24, %v4202_v14  ;;  %v4299_v24 = vld [vmem:[%s3431_s25 + $0x10] sm:$0xff] }
 0x276   : > { %3214 = vmatmul.msk.bf16.gmra.mxu0 %vm712_vm0, %v2291_v16  ;;  %v2484_v5 = vpack.c.bf16 %v2475_v60, %v2474_v27  ;;  %v4288_v27 = vld [vmem:[%s3431_s25] sm:$0xff] }
 0x279   : > { %v2035_v12 = vpop.f32.mrf.mxu3 }
 0x27a   : > { %v2254_v56 = vsub.f32 %v4216_v37, %v2035_v12 }
 0x281   : > { %v2037_v23 = vpop.f32.mrf.mxu3 }
 0x282   : > { %v2255_v17 = vsub.f32 %v1853_v41, %v2037_v23 }
 0x284   : > { %v2295_v10 = vpack.c.bf16 %v2255_v17, %v2254_v56 }
 0x286   : > { %3215 = vmatmul.msk.bf16.gmra.mxu0 %vm712_vm0, %v2292_v2 }
 0x289   : > { %v2155_v35 = vpop.f32.mrf.mxu3 }
 0x28a   : > { %v2262_v52 = vsub.f32 %v2155_v35, %v4185_v0 }
 0x28c   : > { %v2278_v50 = vsub.f32 %v2262_v52, %v1955_v32  ;;  %v4284_v32 = vld [vmem:[%s3436_s9] sm:$0xff] }
 0x28e   : > { %v2468_v57 = vadd.f32 %v2278_v50, %v2246_v9 }
 0x291   : > { %v2157_v43 = vpop.f32.mrf.mxu3 }
 0x292   : > { %v2263_v38 = vsub.f32 %v2157_v43, %v4199_v45 }
 0x294   : > { %v2279_v39 = vsub.f32 %v2263_v38, %v1957_v1 }
 0x296   : > { %v2378_v36 = vpack.c.bf16 %v2279_v39, %v2278_v50  ;;  %v2469_v19 = vadd.f32 %v2279_v39, %v2247_v25  ;;  %3216 = vmatmul.msk.bf16.gmra.mxu0 %vm712_vm0, %v2293_v4 }
 0x298   : > { %v2481_v26 = vpack.c.bf16 %v2469_v19, %v2468_v57  ;;  %3226 = vmatmul.msk.bf16.gmra.mxu1 %vm712_vm0, %v2378_v36  ;;  %v4306_v57 = vld [vmem:[%s3436_s9 + $0x20] sm:$0xff] }
 0x299   : > { %v2235_v61 = vpop.f32.mrf.mxu3  ;;  %v4310_v19 = vld [vmem:[%s3431_s25 + $0x20] sm:$0xff] }
 0x29a   : > { %v2270_v13 = vsub.f32 %v2235_v61, %v4216_v37  ;;  %3238 = vmatmul.msk.bf16.gmra.mxu2 %vm712_vm0, %v2481_v26 }
 0x29c   : > { %v2286_v2 = vsub.f32 %v2270_v13, %v2035_v12  ;;  %v4315_v13 = vld [vmem:[%s3431_s25 + $0x8] sm:$0xff] }
 0x29e   : > { %v2476_v0 = vadd.f32 %v2286_v2, %v2254_v56 }
 0x2a1   : > { %v2237_v45 = vpop.f32.mrf.mxu3  ;;  %v2335_v34 = vpop.f32.mrf.mxu0 }
 0x2a2   : > { %v2271_v40 = vsub.f32 %v2237_v45, %v1853_v41 }
 0x2a4   : > { %v2287_v11 = vsub.f32 %v2271_v40, %v2037_v23 }
 0x2a6   : > { %v2382_v51 = vpack.c.bf16 %v2287_v11, %v2286_v2  ;;  %v2477_v47 = vadd.f32 %v2287_v11, %v2255_v17  ;;  %3217 = vmatmul.msk.bf16.gmra.mxu0 %vm712_vm0, %v2294_v15 }
 0x2a8   : > { %v2485_v33 = vpack.c.bf16 %v2477_v47, %v2476_v0  ;;  %3227 = vmatmul.msk.bf16.gmra.mxu1 %vm712_vm0, %v2379_v22  ;;  %v4319_v0 = vld [vmem:[%s3436_s9 + $0x8] sm:$0xff] }
 0x2a9   : > { %v2337_v4 = vpop.f32.mrf.mxu0 }
 0x2aa   : > { %3239 = vmatmul.msk.bf16.gmra.mxu2 %vm712_vm0, %v2482_v8 }
 0x2b1   : > { %v2340_v44 = vpop.f32.mrf.mxu0 }
 0x2b6   : > { %3218 = vmatmul.msk.bf16.gmra.mxu0 %vm712_vm0, %v2295_v10 }
 0x2b8   : > { %3228 = vmatmul.msk.bf16.gmra.mxu1 %vm712_vm0, %v2380_v30 }
 0x2b9   : > { %v2342_v63 = vpop.f32.mrf.mxu0 }
 0x2ba   : > { %3240 = vmatmul.msk.bf16.gmra.mxu2 %vm712_vm0, %v2483_v31 }
 0x2c1   : > { %v2345_v37 = vpop.f32.mrf.mxu0 }
 0x2c4   : > { %v2422_v55 = vpop.f32.mrf.mxu1 }
 0x2c5   : > { %v2565_v48 = vsub.f32 %v2335_v34, %v2422_v55 }
 0x2c7   : > { %v2613_v25 = vmul.f32 %v4288_v27, %v2565_v48  ;;  %v2705_v12 = vmul.f32 %v4284_v32, %v2565_v48 }
 0x2c8   : > { %3229 = vmatmul.msk.bf16.gmra.mxu1 %vm712_vm0, %v2381_v3 }
 0x2c9   : > { %v4277_v59 = vpop.f32.mrf.mxu0 }
 0x2ca   : > { %3241 = vmatmul.msk.bf16.gmra.mxu2 %vm712_vm0, %v2484_v5 }
 0x2cc   : > { %v2525_v6 = vpop.f32.mrf.mxu2  ;;  %v2424_v14 = vpop.f32.mrf.mxu1 }
 0x2cd   : > { %v2581_v42 = vsub.f32 %v2525_v6, %v2335_v34  ;;  %v2566_v23 = vsub.f32 %v2337_v4, %v2424_v14 }
 0x2cf   : > { %v2597_v30 = vsub.f32 %v2581_v42, %v2422_v55  ;;  %v2614_v2 = vmul.f32 %v4315_v13, %v2566_v23  ;;  %v2706_v34 = vmul.f32 %v4319_v0, %v2566_v23  ;;  %v4339_v42 = vld [vmem:[%s3431_s25 + $0x18] sm:$0xff] }
 0x2d1   : > { %v2629_v62 = vmul.f32 %v4284_v32, %v2597_v30  ;;  %v2689_v54 = vmul.f32 %v4288_v27, %v2597_v30  ;;  %v4343_v30 = vld [vmem:[%s3436_s9 + $0x18] sm:$0xff] }
 0x2d3   : > { %v2645_v43 = vadd.f32 %v2629_v62, %v2613_v25  ;;  %v2721_v50 = vsub.f32 %v2689_v54, %v2705_v12  ;;  %v4353_v25 = vld [vmem:[%s3436_s9 + $0x28] sm:$0xff]  ;;  %v4361_v12 = vld [vmem:[%s3431_s25 + $0x30] sm:$0xff] }
 0x2d4   : > { %v2527_v15 = vpop.f32.mrf.mxu2  ;;  %v2427_v22 = vpop.f32.mrf.mxu1 }
 0x2d5   : > { %v2567_v53 = vsub.f32 %v2340_v44, %v2427_v22  ;;  %v2582_v20 = vsub.f32 %v2527_v15, %v2337_v4  ;;  %v2661_v4 = vsel %vm712_vm0, %v2645_v43, 0.0  ;;  %v2737_v55 = vsel %vm712_vm0, %v2721_v50, 0.0 }
 0x2d7   : > { %v2615_v56 = vmul.f32 %v4299_v24, %v2567_v53  ;;  %v2598_v17 = vsub.f32 %v2582_v20, %v2424_v14  ;;  %v2707_v10 = vmul.f32 %v4292_v46, %v2567_v53 }
 0x2d8   : > { %3230 = vmatmul.msk.bf16.gmra.mxu1 %vm712_vm0, %v2382_v51 }
 0x2d9   : > { %v2630_v45 = vmul.f32 %v4319_v0, %v2598_v17  ;;  %v4323_v40 = vmul.f32 %v4315_v13, %v2598_v17 }
 0x2da   : > { %3242 = vmatmul.msk.bf16.gmra.mxu2 %vm712_vm0, %v2485_v33 }
 0x2dc   : > { %v2530_v18 = vpop.f32.mrf.mxu2  ;;  %v2429_v8 = vpop.f32.mrf.mxu1 }
 0x2dd   : > { %v2583_v58 = vsub.f32 %v2530_v18, %v2340_v44  ;;  %v2568_v11 = vsub.f32 %v2342_v63, %v2429_v8 }
 0x2df   : > { %v2599_v21 = vsub.f32 %v2583_v58, %v2427_v22  ;;  %v2616_v58 = vmul.f32 %v4339_v42, %v2568_v11  ;;  %v2708_v53 = vmul.f32 %v4343_v30, %v2568_v11 }
 0x2e1   : > { %v2631_v1 = vmul.f32 %v4292_v46, %v2599_v21  ;;  %v2691_v16 = vmul.f32 %v4299_v24, %v2599_v21 }
 0x2e3   : > { %v2647_v38 = vadd.f32 %v2631_v1, %v2615_v56  ;;  %v2723_v39 = vsub.f32 %v2691_v16, %v2707_v10 }
 0x2e4   : > { %v2532_v28 = vpop.f32.mrf.mxu2  ;;  %v2432_v41 = vpop.f32.mrf.mxu1 }
 0x2e5   : > { %v2569_v35 = vsub.f32 %v2345_v37, %v2432_v41  ;;  %v2584_v52 = vsub.f32 %v2532_v28, %v2342_v63  ;;  %v2662_v6 = vsel %vm712_vm0, %v2647_v38, 0.0  ;;  %v2738_v44 = vsel %vm712_vm0, %v2723_v39, 0.0 }
 0x2e6   : > { %v2663_v20 = vadd.f32 %v2662_v6, %v2661_v4  ;;  %v2739_v62 = vadd.f32 %v2738_v44, %v2737_v55 }
 0x2e7   : > { %v2617_v51 = vmul.f32 %v4310_v19, %v2569_v35  ;;  %v2709_v47 = vmul.f32 %v4306_v57, %v2569_v35  ;;  %v2600_v33 = vsub.f32 %v2584_v52, %v2429_v8  ;;  %v2722_v8 = vsub.f32 %v4323_v40, %v2706_v34 }
 0x2e9   : > { %v2632_v21 = vmul.f32 %v4343_v30, %v2600_v33  ;;  %v2692_v48 = vmul.f32 %v4339_v42, %v2600_v33 }
 0x2eb   : > { %v2648_v17 = vadd.f32 %v2632_v21, %v2616_v58  ;;  %v2724_v10 = vsub.f32 %v2692_v48, %v2708_v53  ;;  %v4401_v58 = vld [vmem:[%s3431_s25 + $0x38] sm:$0xff] }
 0x2ec   : > { %v2535_v7 = vpop.f32.mrf.mxu2  ;;  %v4281_v49 = vpop.f32.mrf.mxu1  ;;  %v4405_v48 = vld [vmem:[%s3436_s9 + $0x38] sm:$0xff] }
 0x2ed   : > { %v2585_v31 = vsub.f32 %v2535_v7, %v2345_v37  ;;  %v2646_v37 = vadd.f32 %v2630_v45, %v2614_v2  ;;  %v3306_v45 = vld [vmem:[%s3426_s22] sm:$0xff] }
 0x2ee   : > { %v2781_v40 = vmul.f32 0.01, %v3306_v45 }
 0x2ef   : > { %v2601_v3 = vsub.f32 %v2585_v31, %v2432_v41  ;;  %v2570_v31 = vsub.f32 %v4277_v59, %v4281_v49  ;;  %v2668_v55 = vsel %vm712_vm0, %v2646_v37, 0.0 }
 0x2f1   : > { %v2633_v36 = vmul.f32 %v4306_v57, %v2601_v3  ;;  %v2693_v26 = vmul.f32 %v4310_v19, %v2601_v3  ;;  %v4357_v3 = vld [vmem:[%s3431_s25 + $0x28] sm:$0xff]  ;;  %v2710_v52 = vmul.f32 %v4353_v25, %v2570_v31 }
 0x2f2   : > { %v2618_v35 = vmul.f32 %v4357_v3, %v2570_v31 }
 0x2f3   : > { %v4279_v29 = vpop.f32.mrf.mxu0  ;;  %v2649_v14 = vadd.f32 %v2633_v36, %v2617_v51  ;;  %v2725_v15 = vsub.f32 %v2693_v26, %v2709_v47 }
 0x2f4   : > { %v2537_v60 = vpop.f32.mrf.mxu2 }
 0x2f5   : > { %v2586_v61 = vsub.f32 %v2537_v60, %v4277_v59  ;;  %v2664_v54 = vsel %vm712_vm0, %v2649_v14, 0.0  ;;  %v2740_v1 = vsel %vm712_vm0, %v2725_v15, 0.0  ;;  %v2744_v14 = vsel %vm712_vm0, %v2722_v8, 0.0 }
 0x2f6   : > { %v2665_v43 = vadd.f32 %v2664_v54, %v2663_v20  ;;  %v2741_v50 = vadd.f32 %v2740_v1, %v2739_v62  ;;  %v2669_v15 = vsel %vm712_vm0, %v2648_v17, 0.0 }
 0x2f7   : > { %v2602_v63 = vsub.f32 %v2586_v61, %v4281_v49  ;;  %v4365_v49 = vld [vmem:[%s3436_s9 + $0x30] sm:$0xff]  ;;  %v3305_v61 = vld [vmem:[%s3420_s19] sm:$0xff]  ;;  %v2670_v20 = vadd.f32 %v2669_v15, %v2668_v55 }
 0x2f8   : > { %v2769_v2 = vmul.f32 0.01, %v3305_v61 }
 0x2f9   : > { %v2634_v16 = vmul.f32 %v4353_v25, %v2602_v63  ;;  %v2694_v60 = vmul.f32 %v4357_v3, %v2602_v63  ;;  %v2745_v63 = vsel %vm712_vm0, %v2724_v10, 0.0 }
 0x2fa   : > { %v2746_v62 = vadd.f32 %v2745_v63, %v2744_v14 }
 0x2fb   : > { %v4295_v9 = vpop.f32.mrf.mxu0  ;;  %v2650_v36 = vadd.f32 %v2634_v16, %v2618_v35  ;;  %v2726_v26 = vsub.f32 %v2694_v60, %v2710_v52  ;;  %v3309_v60 = vld [vmem:[%s3420_s19 + $0x8] sm:$0xff] }
 0x2fd   : > { %v2671_v37 = vsel %vm712_vm0, %v2650_v36, 0.0 }
 0x2fe   : > { %v2672_v1 = vadd.f32 %v2671_v37, %v2670_v20 }
 0x303   : > { %v4334_v28 = vpop.f32.mrf.mxu0 }
 0x315   : > { %v2437_v5 = vpop.f32.mrf.mxu1 }
 0x316   : > { %v2571_v41 = vsub.f32 %v4279_v29, %v2437_v5 }
 0x318   : > { %v2619_v59 = vmul.f32 %v4361_v12, %v2571_v41 }
 0x31d   : > { %v2439_v22 = vpop.f32.mrf.mxu1  ;;  %v2540_v18 = vpop.f32.mrf.mxu2 }
 0x31e   : > { %v2587_v7 = vsub.f32 %v2540_v18, %v4279_v29  ;;  %v2572_v47 = vsub.f32 %v4295_v9, %v2439_v22  ;;  %v4384_v18 = vpop.f32.mrf.mxu0 }
 0x320   : > { %v2603_v29 = vsub.f32 %v2587_v7, %v2437_v5  ;;  %v2711_v5 = vmul.f32 %v4365_v49, %v2571_v41  ;;  %v2747_v41 = vsel %vm712_vm0, %v2726_v26, 0.0  ;;  %v2620_v21 = vmul.f32 %v4401_v58, %v2572_v47 }
 0x321   : > { %v2748_v16 = vadd.f32 %v2747_v41, %v2746_v62 }
 0x322   : > { %v2635_v23 = vmul.f32 %v4365_v49, %v2603_v29  ;;  %v2695_v56 = vmul.f32 %v4361_v12, %v2603_v29 }
 0x324   : > { %v2651_v38 = vadd.f32 %v2635_v23, %v2619_v59  ;;  %v2727_v39 = vsub.f32 %v2695_v56, %v2711_v5  ;;  %v2770_v59 = vmul.f32 0.01, %v3309_v60  ;;  %v3310_v5 = vld [vmem:[%s3426_s22 + $0x8] sm:$0xff] }
 0x325   : > { %v4374_v11 = vpop.f32.mrf.mxu1  ;;  %v2542_v51 = vpop.f32.mrf.mxu2  ;;  %v2782_v23 = vmul.f32 0.01, %v3310_v5 }
 0x326   : > { %v2666_v33 = vsel %vm712_vm0, %v2651_v38, 0.0  ;;  %v2742_v34 = vsel %vm712_vm0, %v2727_v39, 0.0  ;;  %v2588_v4 = vsub.f32 %v2542_v51, %v4295_v9  ;;  %v2360_v39 = vpop.f32.mrf.mxu0  ;;  %v2573_v14 = vsub.f32 %v4334_v28, %v4374_v11 }
 0x327   : > { %v2667_v6 = vadd.f32 %v2666_v33, %v2665_v43  ;;  %v2743_v44 = vadd.f32 %v2742_v34, %v2741_v50 }
 0x328   : > { %v2604_v9 = vsub.f32 %v2588_v4, %v2439_v22  ;;  %v2712_v22 = vmul.f32 %v4405_v48, %v2572_v47  ;;  %v2713_v20 = vmul.f32 %v4284_v32, %v2573_v14 }
 0x329   : > { %v2773_v8 = vadd.f32 %v2769_v2, %v2667_v6  ;;  %v2785_v7 = vadd.f32 %v2781_v40, %v2743_v44 }
 0x32a   : > { %v2636_v31 = vmul.f32 %v4405_v48, %v2604_v9  ;;  %v2696_v53 = vmul.f32 %v4401_v58, %v2604_v9 }
 0x32b   : > { %2777 = vst.msk [vmem:[%s4390_s21] sm:$0xff] %vm712_vm0, %v2773_v8 }
 0x32c   : > { %2789 = vst.msk [vmem:[%s4398_s26] sm:$0xff] %vm712_vm0, %v2785_v7  ;;  %v2652_v29 = vadd.f32 %v2636_v31, %v2620_v21  ;;  %v2728_v54 = vsub.f32 %v2696_v53, %v2712_v22  ;;  %v2621_v21 = vmul.f32 %v4288_v27, %v2573_v14 }
 0x32d   : > { %v2444_v56 = vpop.f32.mrf.mxu1  ;;  %v2545_v17 = vpop.f32.mrf.mxu2 }
 0x32e   : > { %v2673_v10 = vsel %vm712_vm0, %v2652_v29, 0.0  ;;  %v2749_v35 = vsel %vm712_vm0, %v2728_v54, 0.0  ;;  %v2362_v61 = vpop.f32.mrf.mxu0  ;;  %v2589_v33 = vsub.f32 %v2545_v17, %v4334_v28  ;;  %v2574_v28 = vsub.f32 %v4384_v18, %v2444_v56 }
 0x32f   : > { %v2674_v52 = vadd.f32 %v2673_v10, %v2672_v1  ;;  %v2750_v43 = vadd.f32 %v2749_v35, %v2748_v16 }
 0x330   : > { %v2605_v6 = vsub.f32 %v2589_v33, %v4374_v11 }
 0x331   : > { %v2774_v50 = vadd.f32 %v2770_v59, %v2674_v52  ;;  %v2786_v38 = vadd.f32 %v2782_v23, %v2750_v43 }
 0x332   : > { %v2637_v41 = vmul.f32 %v4284_v32, %v2605_v6  ;;  %v2697_v8 = vmul.f32 %v4288_v27, %v2605_v6  ;;  %v2622_v32 = vmul.f32 %v4315_v13, %v2574_v28 }
 0x333   : > { %2778 = vst.msk [vmem:[%s4390_s21 + $0x8] sm:$0xff] %vm712_vm0, %v2774_v50 }
 0x334   : > { %2790 = vst.msk [vmem:[%s4398_s26 + $0x8] sm:$0xff] %vm712_vm0, %v2786_v38  ;;  %v2653_v1 = vadd.f32 %v2637_v41, %v2621_v21  ;;  %v2729_v16 = vsub.f32 %v2697_v8, %v2713_v20 }
 0x335   : > { %v2447_v36 = vpop.f32.mrf.mxu1  ;;  %v2547_v26 = vpop.f32.mrf.mxu2 }
 0x336   : > { %v2365_v47 = vpop.f32.mrf.mxu0  ;;  %v2575_v9 = vsub.f32 %v2360_v39, %v2447_v36  ;;  %v2590_v37 = vsub.f32 %v2547_v26, %v4384_v18  ;;  %v2675_v50 = vsel %vm712_vm0, %v2653_v1, 0.0  ;;  %v2751_v38 = vsel %vm712_vm0, %v2729_v16, 0.0 }
 0x338   : > { %v2623_v11 = vmul.f32 %v4299_v24, %v2575_v9  ;;  %v2606_v62 = vsub.f32 %v2590_v37, %v2444_v56  ;;  %v2715_v29 = vmul.f32 %v4292_v46, %v2575_v9 }
 0x33a   : > { %v2638_v18 = vmul.f32 %v4319_v0, %v2606_v62 }
 0x33d   : > { %v2449_v2 = vpop.f32.mrf.mxu1  ;;  %v2550_v45 = vpop.f32.mrf.mxu2 }
 0x33e   : > { %v2591_v34 = vsub.f32 %v2550_v45, %v2360_v39  ;;  %v2367_v15 = vpop.f32.mrf.mxu0  ;;  %v2576_v35 = vsub.f32 %v2362_v61, %v2449_v2 }
 0x340   : > { %v2607_v44 = vsub.f32 %v2591_v34, %v2447_v36 }
 0x342   : > { %v2639_v7 = vmul.f32 %v4292_v46, %v2607_v44  ;;  %v2699_v22 = vmul.f32 %v4299_v24, %v2607_v44  ;;  %v2698_v24 = vmul.f32 %v4315_v13, %v2606_v62  ;;  %v2714_v46 = vmul.f32 %v4319_v0, %v2574_v28 }
 0x343   : > { %v2654_v0 = vadd.f32 %v2638_v18, %v2622_v32 }
 0x344   : > { %v2655_v60 = vadd.f32 %v2639_v7, %v2623_v11  ;;  %v2731_v5 = vsub.f32 %v2699_v22, %v2715_v29  ;;  %v3311_v22 = vld [vmem:[%s3420_s19 + $0x10] sm:$0xff] }
 0x345   : > { %v2452_v40 = vpop.f32.mrf.mxu1  ;;  %v2552_v51 = vpop.f32.mrf.mxu2 }
 0x346   : > { %v2577_v54 = vsub.f32 %v2365_v47, %v2452_v40  ;;  %v2592_v59 = vsub.f32 %v2552_v51, %v2362_v61  ;;  %v2370_v56 = vpop.f32.mrf.mxu0  ;;  %v2676_v39 = vsel %vm712_vm0, %v2655_v60, 0.0  ;;  %v2752_v26 = vsel %vm712_vm0, %v2731_v5, 0.0 }
 0x347   : > { %v2677_v34 = vadd.f32 %v2676_v39, %v2675_v50  ;;  %v2753_v6 = vadd.f32 %v2752_v26, %v2751_v38 }
 0x348   : > { %v2625_v52 = vmul.f32 %v4310_v19, %v2577_v54  ;;  %v2717_v43 = vmul.f32 %v4306_v57, %v2577_v54  ;;  %v2608_v36 = vsub.f32 %v2592_v59, %v2449_v2 }
 0x34a   : > { %v2640_v2 = vmul.f32 %v4343_v30, %v2608_v36  ;;  %v2700_v44 = vmul.f32 %v4339_v42, %v2608_v36 }
 0x34d   : > { %v2555_v4 = vpop.f32.mrf.mxu2  ;;  %v2454_v55 = vpop.f32.mrf.mxu1 }
 0x34e   : > { %v2593_v63 = vsub.f32 %v2555_v4, %v2365_v47  ;;  %v2730_v47 = vsub.f32 %v2698_v24, %v2714_v46  ;;  %v2578_v4 = vsub.f32 %v2367_v15, %v2454_v55  ;;  %v2372_v54 = vpop.f32.mrf.mxu0 }
 0x350   : > { %v2609_v31 = vsub.f32 %v2593_v63, %v2452_v40  ;;  %v2626_v7 = vmul.f32 %v4357_v3, %v2578_v4 }
 0x352   : > { %v2641_v27 = vmul.f32 %v4306_v57, %v2609_v31  ;;  %v2701_v23 = vmul.f32 %v4310_v19, %v2609_v31  ;;  %v2624_v19 = vmul.f32 %v4339_v42, %v2576_v35  ;;  %v2716_v57 = vmul.f32 %v4343_v30, %v2576_v35 }
 0x353   : > { %v2718_v42 = vmul.f32 %v4353_v25, %v2578_v4  ;;  %v2771_v31 = vmul.f32 0.01, %v3311_v22 }
 0x354   : > { %v2657_v45 = vadd.f32 %v2641_v27, %v2625_v52  ;;  %v2733_v40 = vsub.f32 %v2701_v23, %v2717_v43  ;;  %v2656_v28 = vadd.f32 %v2640_v2, %v2624_v19  ;;  %v2732_v11 = vsub.f32 %v2700_v44, %v2716_v57 }
 0x355   : > { %v2557_v53 = vpop.f32.mrf.mxu2  ;;  %v2457_v17 = vpop.f32.mrf.mxu1  ;;  %v2682_v27 = vsel %vm712_vm0, %v2654_v0, 0.0  ;;  %v3313_v0 = vld [vmem:[%s3420_s19 + $0x18] sm:$0xff] }
 0x356   : > { %v2594_v10 = vsub.f32 %v2557_v53, %v2367_v15  ;;  %v2579_v61 = vsub.f32 %v2370_v56, %v2457_v17  ;;  %v2678_v63 = vsel %vm712_vm0, %v2657_v45, 0.0  ;;  %v2754_v9 = vsel %vm712_vm0, %v2733_v40, 0.0  ;;  %v3312_v53 = vld [vmem:[%s3426_s22 + $0x10] sm:$0xff] }
 0x357   : > { %v2783_v20 = vmul.f32 0.01, %v3312_v53  ;;  %v2679_v1 = vadd.f32 %v2678_v63, %v2677_v34  ;;  %v2755_v16 = vadd.f32 %v2754_v9, %v2753_v6  ;;  %v2683_v32 = vsel %vm712_vm0, %v2656_v28, 0.0 }
 0x358   : > { %v2610_v13 = vsub.f32 %v2594_v10, %v2454_v55  ;;  %v2627_v8 = vmul.f32 %v4361_v12, %v2579_v61  ;;  %v2719_v55 = vmul.f32 %v4365_v49, %v2579_v61  ;;  %v2758_v10 = vsel %vm712_vm0, %v2730_v47, 0.0  ;;  %v3314_v61 = vld [vmem:[%s3426_s22 + $0x18] sm:$0xff] }
 0x359   : > { %v2759_v18 = vsel %vm712_vm0, %v2732_v11, 0.0  ;;  %v2684_v36 = vadd.f32 %v2683_v32, %v2682_v27  ;;  %v2772_v47 = vmul.f32 0.01, %v3313_v0 }
 0x35a   : > { %v2642_v37 = vmul.f32 %v4353_v25, %v2610_v13  ;;  %v2702_v41 = vmul.f32 %v4357_v3, %v2610_v13  ;;  %v2760_v26 = vadd.f32 %v2759_v18, %v2758_v10 }
 0x35c   : > { %v2658_v60 = vadd.f32 %v2642_v37, %v2626_v7 }
 0x35d   : > { %v2560_v51 = vpop.f32.mrf.mxu2  ;;  %v2459_v21 = vpop.f32.mrf.mxu1 }
 0x35e   : > { %v2595_v33 = vsub.f32 %v2560_v51, %v2370_v56  ;;  %v2685_v46 = vsel %vm712_vm0, %v2658_v60, 0.0 }
 0x35f   : > { %v2686_v13 = vadd.f32 %v2685_v46, %v2684_v36 }
 0x360   : > { %v2611_v14 = vsub.f32 %v2595_v33, %v2457_v17  ;;  %v2784_v33 = vmul.f32 0.01, %v3314_v61 }
 0x362   : > { %v2643_v15 = vmul.f32 %v4365_v49, %v2611_v14  ;;  %v2703_v30 = vmul.f32 %v4361_v12, %v2611_v14  ;;  %v2734_v49 = vsub.f32 %v2702_v41, %v2718_v42  ;;  %v2580_v12 = vsub.f32 %v2372_v54, %v2459_v21 }
 0x364   : > { %v2659_v62 = vadd.f32 %v2643_v15, %v2627_v8  ;;  %v2735_v29 = vsub.f32 %v2703_v30, %v2719_v55  ;;  %v2761_v56 = vsel %vm712_vm0, %v2734_v49, 0.0  ;;  %v2628_v43 = vmul.f32 %v4401_v58, %v2580_v12 }
 0x365   : > { %v2562_v59 = vpop.f32.mrf.mxu2  ;;  %v2720_v50 = vmul.f32 %v4405_v48, %v2580_v12  ;;  %v2762_v51 = vadd.f32 %v2761_v56, %v2760_v26 }
 0x366   : > { %v2680_v3 = vsel %vm712_vm0, %v2659_v62, 0.0  ;;  %v2756_v25 = vsel %vm712_vm0, %v2735_v29, 0.0  ;;  %v2596_v5 = vsub.f32 %v2562_v59, %v2372_v54 }
 0x367   : > { %v2681_v23 = vadd.f32 %v2680_v3, %v2679_v1  ;;  %v2757_v17 = vadd.f32 %v2756_v25, %v2755_v16 }
 0x368   : > { %v2612_v24 = vsub.f32 %v2596_v5, %v2459_v21 }
 0x369   : > { %v2775_v35 = vadd.f32 %v2771_v31, %v2681_v23  ;;  %v2787_v52 = vadd.f32 %v2783_v20, %v2757_v17 }
 0x36a   : > { %v2644_v38 = vmul.f32 %v4405_v48, %v2612_v24  ;;  %v2704_v39 = vmul.f32 %v4401_v58, %v2612_v24 }
 0x36b   : > { %2779 = vst.msk [vmem:[%s4390_s21 + $0x10] sm:$0xff] %vm712_vm0, %v2775_v35 }
 0x36c   : > { %2791 = vst.msk [vmem:[%s4398_s26 + $0x10] sm:$0xff] %vm712_vm0, %v2787_v52  ;;  %v2660_v45 = vadd.f32 %v2644_v38, %v2628_v43  ;;  %v2736_v40 = vsub.f32 %v2704_v39, %v2720_v50 }
 0x36e   : > { %v2687_v48 = vsel %vm712_vm0, %v2660_v45, 0.0  ;;  %v2763_v58 = vsel %vm712_vm0, %v2736_v40, 0.0 }
 0x36f   : > { %v2688_v19 = vadd.f32 %v2687_v48, %v2686_v13  ;;  %v2764_v57 = vadd.f32 %v2763_v58, %v2762_v51 }
 0x371   : > { %v2776_v34 = vadd.f32 %v2772_v47, %v2688_v19  ;;  %v2788_v4 = vadd.f32 %v2784_v33, %v2764_v57 }
 0x373   : > { %2780 = vst.msk [vmem:[%s4390_s21 + $0x18] sm:$0xff] %vm712_vm0, %v2776_v34 }
 0x374   : > { %2792 = vst.msk [vmem:[%s4398_s26 + $0x18] sm:$0xff] %vm712_vm0, %v2788_v4 }
 0x375 PF: > { %s19_s29 = sadd.s32 1, %s3337_s29   ;;  %s4506_s27 = smov %s3333_s28 }
 0x376   : > { %p16_p5 = scmp.ge.s32.totalorder %s19_s29, 4   ;;  %s4507_s28 = smov %s4509_s30 }
 0x378   :  { %18 = sbr.rel (!%p16_p5) target bundleno = 2 (0x2), region = 120 }

</bundles_post_ra>
